<compile_context>
chip_gen: v7x
topology: tpu7x:2x2x1
jax: 0.10.0
libtpu: 0.0.40
codegen_flags: <defaults>
</compile_context>

<pallas_src>
import functools
import math

import jax
import jax.numpy as jnp
from jax import lax
from jax.experimental import pallas as pl
from jax.experimental.pallas import tpu as pltpu


# ------------------------------ in-kernel helpers ----------------------------


def _layer_norm(z, g, b, eps):
    mu = jnp.mean(z, axis=-1, keepdims=True)
    var = jnp.mean((z - mu) ** 2, axis=-1, keepdims=True)
    return (z - mu) * lax.rsqrt(var + eps) * g + b


def _mha(x_rows, kv_rows, wq, wk, wv, wo, bo, *, num_heads, n_batch, tq, tk,
         causal, compute_dtype):
    """Multi-head attention on flattened (n_batch*tq, D) / (n_batch*tk, D) rows.

    wq/wk/wv/wo are full (D, D) weights already in `compute_dtype`; the
    1/sqrt(Dh) scale is pre-folded into wq.  Per-head score/context matmuls run
    on static slices; the head contexts are concatenated so there is exactly
    ONE output projection per call.
    NOTE: attention dropout (rate=0.1) is identity in eval mode.
    """
    d = x_rows.shape[-1]
    dh = d // num_heads

    xq_c = x_rows.astype(compute_dtype)
    xkv_c = kv_rows.astype(compute_dtype)
    # Dense (rows, D) x (D, D) projections -> one big MXU op each.
    q = jnp.dot(xq_c, wq, preferred_element_type=jnp.float32)
    k = jnp.dot(xkv_c, wk, preferred_element_type=jnp.float32)
    v = jnp.dot(xkv_c, wv, preferred_element_type=jnp.float32)

    q_c = q.astype(compute_dtype)
    k_c = k.astype(compute_dtype)
    v_c = v.astype(compute_dtype)

    if causal:
        row = lax.broadcasted_iota(jnp.int32, (tq, tk), 0)
        col = lax.broadcasted_iota(jnp.int32, (tq, tk), 1)
        keep = row >= col

    ctx_parts = []
    for bi in range(n_batch):                 # static unroll, tiny n_batch
        q_b = q_c[bi * tq:(bi + 1) * tq]      # sublane-aligned row slices
        k_b = k_c[bi * tk:(bi + 1) * tk]
        v_b = v_c[bi * tk:(bi + 1) * tk]
        head_parts = []
        for h in range(num_heads):            # static unroll, tiny H
            sl = slice(h * dh, (h + 1) * dh)
            qh = q_b[:, sl]
            kh = k_b[:, sl]
            vh = v_b[:, sl]
            # Contract last dims directly (no explicit kh.T / XLU transpose).
            s = lax.dot_general(qh, kh, (((1,), (1,)), ((), ())),
                                preferred_element_type=jnp.float32)
            if causal:
                s = jnp.where(keep, s, -1e30)
            m = jnp.max(s, axis=-1, keepdims=True)
            p = jnp.exp(s - m)
            # EUP reciprocal instead of a VALU divide.
            p = p * pl.reciprocal(jnp.sum(p, axis=-1, keepdims=True),
                                  approx=True)
            ctx_h = jnp.dot(p.astype(compute_dtype), vh,
                            preferred_element_type=jnp.float32)
            head_parts.append(ctx_h)
        ctx_parts.append(jnp.concatenate(head_parts, axis=-1))
    ctx = jnp.concatenate(ctx_parts, axis=0)        # (n_batch*tq, D)

    # Single concatenated output projection (contraction depth D, not Dh).
    return jnp.dot(ctx.astype(compute_dtype), wo,
                   preferred_element_type=jnp.float32) + bo


# --------------------------- fused decoder-stack kernel ----------------------


def _decoder_stack_kernel(*refs, num_heads, eps, has_cross, n_batch, tq, tk,
                          compute_dtype):
    """One (batch_block, layer) grid step: run a full decoder layer on the
    activation slab resident in o_ref.  The layer axis is the inner
    'arbitrary' axis, so o_ref stays in VMEM across all layers."""
    if has_cross:
        (x_ref, y_ref,
         sa_wq, sa_wk, sa_wv, sa_wo, sa_bo,
         ca_wq, ca_wk, ca_wv, ca_wo, ca_bo,
         ff_w1, ff_b1, ff_w2, ff_b2,
         g1, b1, g2, b2, g3, b3,
         o_ref) = refs
    else:
        (x_ref,
         sa_wq, sa_wk, sa_wv, sa_wo, sa_bo,
         ff_w1, ff_b1, ff_w2, ff_b2,
         g1, b1, g2, b2, g3, b3,
         o_ref) = refs
        y_ref = None

    layer = pl.program_id(1)

    @pl.when(layer == 0)
    def _():
        o_ref[...] = x_ref[...]        # seed the resident activation

    x = o_ref[...]                     # (n_batch*tq, D) f32

    # --- self attention + add & norm ---
    a = _mha(x, x, sa_wq[...], sa_wk[...], sa_wv[...], sa_wo[...], sa_bo[...],
             num_heads=num_heads, n_batch=n_batch, tq=tq, tk=tq,
             causal=True, compute_dtype=compute_dtype)
    x = _layer_norm(x + a, g1[...], b1[...], eps)

    # --- cross attention + add & norm (only when encoder memory is given) ---
    if has_cross:
        a = _mha(x, y_ref[...], ca_wq[...], ca_wk[...], ca_wv[...], ca_wo[...],
                 ca_bo[...], num_heads=num_heads, n_batch=n_batch, tq=tq,
                 tk=tk, causal=False, compute_dtype=compute_dtype)
        x = _layer_norm(x + a, g2[...], b2[...], eps)

    # --- feed-forward + add & norm (dropout is identity in eval mode) ---
    h = jnp.dot(x.astype(compute_dtype), ff_w1[...],
                preferred_element_type=jnp.float32) + ff_b1[...]
    h = jax.nn.gelu(h, approximate=True)
    f = jnp.dot(h.astype(compute_dtype), ff_w2[...],
                preferred_element_type=jnp.float32) + ff_b2[...]
    x = _layer_norm(x + f, g3[...], b3[...], eps)

    o_ref[...] = x


def decoder_stack_pallas(x_emb, y, layer_params, *, num_heads, eps,
                         b_tile=None):
    """Run the whole decoder stack in ONE pallas_call. grid = (B/B_TILE, L)."""
    B, T, D = x_emb.shape
    L = layer_params["sa_wq"].shape[0]
    has_cross = y is not None
    compute_dtype = layer_params["sa_wq"].dtype   # set by prepare_params

    if b_tile is None:
        b_tile = B // 2 if (B % 2 == 0 and B > 2) else 1
    assert B % b_tile == 0, "batch must be divisible by b_tile"
    assert (b_tile * T) % 8 == 0, "b_tile*T must be a multiple of 8"

    # Lane-dense 2-D activation slabs: (B*T, D) with (b_tile*T, D) blocks.
    x2 = x_emb.reshape(B * T, D)

    in_specs = [pl.BlockSpec((b_tile * T, D), lambda b, l: (b, 0))]
    inputs = [x2]
    block_nbytes = [b_tile * T * D * x2.dtype.itemsize]

    Tk = T
    if has_cross:
        Tk = y.shape[1]
        assert (b_tile * Tk) % 8 == 0, "b_tile*Tk must be a multiple of 8"
        y2 = y.reshape(B * Tk, D)
        in_specs.append(pl.BlockSpec((b_tile * Tk, D), lambda b, l: (b, 0)))
        inputs.append(y2)
        block_nbytes.append(b_tile * Tk * D * y2.dtype.itemsize)

    def add_weight(name):
        arr = layer_params[name]
        in_specs.append(
            pl.BlockSpec((None,) + arr.shape[1:], lambda b, l: (l, 0, 0)))
        inputs.append(arr)
        block_nbytes.append(math.prod(arr.shape[1:]) * arr.dtype.itemsize)

    for name in ("sa_wq", "sa_wk", "sa_wv", "sa_wo", "sa_bo"):
        add_weight(name)
    if has_cross:
        for name in ("ca_wq", "ca_wk", "ca_wv", "ca_wo", "ca_bo"):
            add_weight(name)
    for name in ("ff_w1", "ff_b1", "ff_w2", "ff_b2",
                 "g1", "b1", "g2", "b2", "g3", "b3"):
        add_weight(name)

    out_nbytes = b_tile * T * D * 4
    # Double-buffered blocks + generous headroom for in-kernel intermediates.
    vmem_limit = int(min(64 * 2**20,
                         2 * (sum(block_nbytes) + out_nbytes) + (16 * 2**20)))

    kernel = functools.partial(
        _decoder_stack_kernel, num_heads=num_heads, eps=eps,
        has_cross=has_cross, n_batch=b_tile, tq=T, tk=Tk,
        compute_dtype=compute_dtype)

    out2 = pl.pallas_call(
        kernel,
        out_shape=jax.ShapeDtypeStruct((B * T, D), jnp.float32),
        grid=(B // b_tile, L),
        in_specs=in_specs,
        out_specs=pl.BlockSpec((b_tile * T, D), lambda b, l: (b, 0)),
        compiler_params=pltpu.CompilerParams(
            # Layer axis must stay "arbitrary": the output block is revisited
            # (it carries the activation across layers). Batch axis is
            # outermost + parallel -> v7x 2-TC sharding.
            dimension_semantics=("parallel", "arbitrary"),
            vmem_limit_bytes=vmem_limit),
    )(*inputs)
    return out2.reshape(B, T, D)


# ------------------------------ parameter handling ----------------------------


def init_params(key, *, vocab, num_layers, d_model, num_heads, context_length,
                scaling_value):
    del num_heads  # heads are handled inside the kernel; weights stay (D, D)
    hidden = scaling_value * d_model

    def dense(k, shape):
        return (0.02 * jax.random.normal(k, shape)).astype(jnp.float32)

    keys = jax.random.split(key, 2 + num_layers)
    params = {
        "tok_emb": dense(keys[0], (vocab, d_model)),
        "pos_emb": dense(keys[1], (context_length, d_model)),
    }

    names = ["sa_wq", "sa_wk", "sa_wv", "sa_wo", "sa_bo",
             "ca_wq", "ca_wk", "ca_wv", "ca_wo", "ca_bo",
             "ff_w1", "ff_b1", "ff_w2", "ff_b2",
             "g1", "b1", "g2", "b2", "g3", "b3"]
    per_layer = {n: [] for n in names}
    for li in range(num_layers):
        lk = jax.random.split(keys[2 + li], 14)
        per_layer["sa_wq"].append(dense(lk[0], (d_model, d_model)))
        per_layer["sa_wk"].append(dense(lk[1], (d_model, d_model)))
        per_layer["sa_wv"].append(dense(lk[2], (d_model, d_model)))
        per_layer["sa_wo"].append(dense(lk[3], (d_model, d_model)))
        per_layer["sa_bo"].append(dense(lk[4], (1, d_model)))
        per_layer["ca_wq"].append(dense(lk[5], (d_model, d_model)))
        per_layer["ca_wk"].append(dense(lk[6], (d_model, d_model)))
        per_layer["ca_wv"].append(dense(lk[7], (d_model, d_model)))
        per_layer["ca_wo"].append(dense(lk[8], (d_model, d_model)))
        per_layer["ca_bo"].append(dense(lk[9], (1, d_model)))
        per_layer["ff_w1"].append(dense(lk[10], (d_model, hidden)))
        per_layer["ff_b1"].append(dense(lk[11], (1, hidden)))
        per_layer["ff_w2"].append(dense(lk[12], (hidden, d_model)))
        per_layer["ff_b2"].append(dense(lk[13], (1, d_model)))
        for g, b in (("g1", "b1"), ("g2", "b2"), ("g3", "b3")):
            per_layer[g].append(jnp.ones((1, d_model), jnp.float32))
            per_layer[b].append(jnp.zeros((1, d_model), jnp.float32))
    params["layers"] = {k: jnp.stack(v) for k, v in per_layer.items()}
    return params


_MATMUL_WEIGHTS = ("sa_wq", "sa_wk", "sa_wv", "sa_wo",
                   "ca_wq", "ca_wk", "ca_wv", "ca_wo", "ff_w1", "ff_w2")


def prepare_params(params, *, num_heads, compute_dtype=jnp.bfloat16):
    """One-time host-side prep: fold 1/sqrt(Dh) into W_q and cast the matmul
    weights to the MXU input dtype (bf16 by default). Biases / LN stay f32."""
    lp = params["layers"]
    d_model = lp["sa_wq"].shape[-1]
    scale = 1.0 / math.sqrt(d_model // num_heads)
    prepared = {}
    for name, arr in lp.items():
        if name in ("sa_wq", "ca_wq"):
            arr = arr * scale
        if name in _MATMUL_WEIGHTS:
            arr = arr.astype(compute_dtype)
        prepared[name] = arr
    out = dict(params)
    out["layers"] = prepared
    return out


# ------------------------------ decoder forward ------------------------------


def decoder_forward(prepared_params, tokens, y=None, *, num_heads, eps=1e-5,
                    b_tile=None):
    # TODO(synk): token-embedding gather + positional add stay in plain JAX
    # (data-dependent row gather; not a hot path at these sizes).
    T = tokens.shape[1]
    x = (jnp.take(prepared_params["tok_emb"], tokens, axis=0)
         + prepared_params["pos_emb"][:T])
    return decoder_stack_pallas(x, y, prepared_params["layers"],
                                num_heads=num_heads, eps=eps, b_tile=b_tile)


# ------------------------------ pure-JAX reference ---------------------------


def _ref_mha(xq, xkv, wq, wk, wv, wo, bo, num_heads, causal):
    B, Tq, D = xq.shape
    Tk = xkv.shape[1]
    Dh = D // num_heads
    q = (xq @ wq).reshape(B, Tq, num_heads, Dh).transpose(0, 2, 1, 3)
    k = (xkv @ wk).reshape(B, Tk, num_heads, Dh).transpose(0, 2, 1, 3)
    v = (xkv @ wv).reshape(B, Tk, num_heads, Dh).transpose(0, 2, 1, 3)
    s = jnp.einsum("bhqd,bhkd->bhqk", q, k) / math.sqrt(Dh)
    if causal:
        mask = jnp.arange(Tq)[:, None] >= jnp.arange(Tk)[None, :]
        s = jnp.where(mask[None, None], s, -1e30)
    p = jax.nn.softmax(s, axis=-1)
    ctx = jnp.einsum("bhqk,bhkd->bhqd", p, v)
    ctx = ctx.transpose(0, 2, 1, 3).reshape(B, Tq, D)
    return ctx @ wo + bo


def _ref_ln(z, g, b, eps):
    mu = jnp.mean(z, -1, keepdims=True)
    var = jnp.mean((z - mu) ** 2, -1, keepdims=True)
    return (z - mu) / jnp.sqrt(var + eps) * g + b


def decoder_ref(params, tokens, y=None, *, num_heads, eps=1e-5):
    T = tokens.shape[1]
    x = jnp.take(params["tok_emb"], tokens, axis=0) + params["pos_emb"][:T]
    lp = params["layers"]
    L = lp["sa_wq"].shape[0]
    for li in range(L):
        x = _ref_ln(x + _ref_mha(x, x, lp["sa_wq"][li], lp["sa_wk"][li],
                                 lp["sa_wv"][li], lp["sa_wo"][li],
                                 lp["sa_bo"][li], num_heads, True),
                    lp["g1"][li], lp["b1"][li], eps)
        if y is not None:
            x = _ref_ln(x + _ref_mha(x, y, lp["ca_wq"][li], lp["ca_wk"][li],
                                     lp["ca_wv"][li], lp["ca_wo"][li],
                                     lp["ca_bo"][li], num_heads, False),
                        lp["g2"][li], lp["b2"][li], eps)
        h = jax.nn.gelu(x @ lp["ff_w1"][li] + lp["ff_b1"][li],
                        approximate=True)
        x = _ref_ln(x + (h @ lp["ff_w2"][li] + lp["ff_b2"][li]),
                    lp["g3"][li], lp["b3"][li], eps)
    return x


# ----------------------------------- main -------------------------------------


if __name__ == "__main__":
    VOCAB = 50
    NUM_LAYERS = 2
    D_MODEL = 128          # lane-dense last dim (multiple of 128)
    NUM_HEADS = 4
    CONTEXT = 16
    B, T, T_ENC = 4, 8, 8  # b_tile defaults to 2 -> 2 parallel batch blocks
    SCALING = 4
    EPS = 1e-5

    root = jax.random.PRNGKey(0)
    kp, kt, ky = jax.random.split(root, 3)

    raw_params = init_params(kp, vocab=VOCAB, num_layers=NUM_LAYERS,
                             d_model=D_MODEL, num_heads=NUM_HEADS,
                             context_length=CONTEXT, scaling_value=SCALING)

    tokens = jax.random.randint(kt, (B, T), 0, VOCAB, dtype=jnp.int32)
    y_enc = jax.random.normal(ky, (B, T_ENC, D_MODEL), dtype=jnp.float32)

    ref = decoder_ref(raw_params, tokens, y_enc, num_heads=NUM_HEADS, eps=EPS)
    ref_self = decoder_ref(raw_params, tokens, None, num_heads=NUM_HEADS,
                           eps=EPS)

    # f32 matmul path (tight check; approx-reciprocal softmax -> ~1e-3 noise).
    p_f32 = prepare_params(raw_params, num_heads=NUM_HEADS,
                           compute_dtype=jnp.float32)
    out = decoder_forward(p_f32, tokens, y_enc, num_heads=NUM_HEADS, eps=EPS)
    out = jax.block_until_ready(out)
    assert out.shape == (B, T, D_MODEL)
    assert jnp.allclose(out, ref, rtol=5e-3, atol=5e-3), "mismatch (cross)"

    # Self-attention-only path (y=None), as in Decoder.forward(x).
    out_self = decoder_forward(p_f32, tokens, None, num_heads=NUM_HEADS,
                               eps=EPS)
    out_self = jax.block_until_ready(out_self)
    assert jnp.allclose(out_self, ref_self, rtol=5e-3, atol=5e-3), \
        "mismatch (self-only)"

    # bf16 weight-streaming path (default production config on v5e/v6e/v7x).
    p_bf16 = prepare_params(raw_params, num_heads=NUM_HEADS)   # bf16 default
    out_bf16 = decoder_forward(p_bf16, tokens, y_enc, num_heads=NUM_HEADS,
                               eps=EPS)
    out_bf16 = jax.block_until_ready(out_bf16)
    assert jnp.allclose(out_bf16, ref, rtol=1e-1, atol=1e-1), "mismatch (bf16)"

    print("KERNEL_OK")
</pallas_src>

<mosaic_0001>
module attributes {stable_mosaic.version = 11 : i64} {
  func.func @_decoder_stack_kernel(%arg0: i32, %arg1: i32, %arg2: memref<16x128xf32, #tpu.memory_space<vmem>>, %arg3: memref<16x128xf32, #tpu.memory_space<vmem>>, %arg4: memref<1x128x128xf32, #tpu.memory_space<vmem>>, %arg5: memref<1x128x128xf32, #tpu.memory_space<vmem>>, %arg6: memref<1x128x128xf32, #tpu.memory_space<vmem>>, %arg7: memref<1x128x128xf32, #tpu.memory_space<vmem>>, %arg8: memref<1x1x128xf32, #tpu.memory_space<vmem>>, %arg9: memref<1x128x128xf32, #tpu.memory_space<vmem>>, %arg10: memref<1x128x128xf32, #tpu.memory_space<vmem>>, %arg11: memref<1x128x128xf32, #tpu.memory_space<vmem>>, %arg12: memref<1x128x128xf32, #tpu.memory_space<vmem>>, %arg13: memref<1x1x128xf32, #tpu.memory_space<vmem>>, %arg14: memref<1x128x512xf32, #tpu.memory_space<vmem>>, %arg15: memref<1x1x512xf32, #tpu.memory_space<vmem>>, %arg16: memref<1x512x128xf32, #tpu.memory_space<vmem>>, %arg17: memref<1x1x128xf32, #tpu.memory_space<vmem>>, %arg18: memref<1x1x128xf32, #tpu.memory_space<vmem>>, %arg19: memref<1x1x128xf32, #tpu.memory_space<vmem>>, %arg20: memref<1x1x128xf32, #tpu.memory_space<vmem>>, %arg21: memref<1x1x128xf32, #tpu.memory_space<vmem>>, %arg22: memref<1x1x128xf32, #tpu.memory_space<vmem>>, %arg23: memref<1x1x128xf32, #tpu.memory_space<vmem>>, %arg24: memref<16x128xf32, #tpu.memory_space<vmem>>) attributes {dimension_semantics = [#tpu.dimension_semantics<parallel>, #tpu.dimension_semantics<arbitrary>], iteration_bounds = array<i64: 2, 2>, scalar_prefetch = 0 : i64, scratch_operands = 0 : i64, tpu.core_type = #tpu.core_type<tc>, window_params = [{transform_indices = @transform_0, window_bounds = array<i64: 16, 128>}, {transform_indices = @transform_1, window_bounds = array<i64: 16, 128>}, {transform_indices = @transform_2, window_bounds = array<i64: 1, 128, 128>}, {transform_indices = @transform_3, window_bounds = array<i64: 1, 128, 128>}, {transform_indices = @transform_4, window_bounds = array<i64: 1, 128, 128>}, {transform_indices = @transform_5, window_bounds = array<i64: 1, 128, 128>}, {transform_indices = @transform_6, window_bounds = array<i64: 1, 1, 128>}, {transform_indices = @transform_7, window_bounds = array<i64: 1, 128, 128>}, {transform_indices = @transform_8, window_bounds = array<i64: 1, 128, 128>}, {transform_indices = @transform_9, window_bounds = array<i64: 1, 128, 128>}, {transform_indices = @transform_10, window_bounds = array<i64: 1, 128, 128>}, {transform_indices = @transform_11, window_bounds = array<i64: 1, 1, 128>}, {transform_indices = @transform_12, window_bounds = array<i64: 1, 128, 512>}, {transform_indices = @transform_13, window_bounds = array<i64: 1, 1, 512>}, {transform_indices = @transform_14, window_bounds = array<i64: 1, 512, 128>}, {transform_indices = @transform_15, window_bounds = array<i64: 1, 1, 128>}, {transform_indices = @transform_16, window_bounds = array<i64: 1, 1, 128>}, {transform_indices = @transform_17, window_bounds = array<i64: 1, 1, 128>}, {transform_indices = @transform_18, window_bounds = array<i64: 1, 1, 128>}, {transform_indices = @transform_19, window_bounds = array<i64: 1, 1, 128>}, {transform_indices = @transform_20, window_bounds = array<i64: 1, 1, 128>}, {transform_indices = @transform_21, window_bounds = array<i64: 1, 1, 128>}, {transform_indices = @transform_22, window_bounds = array<i64: 16, 128>}]} {
    %c0_i32 = arith.constant 0 : i32
    %0 = arith.cmpi eq, %arg1, %c0_i32 : i32
    %1 = arith.extui %0 : i1 to i32
    %c0_i32_0 = arith.constant 0 : i32
    %2 = arith.cmpi ne, %1, %c0_i32_0 : i32
    scf.if %2 {
      %c0_166 = arith.constant 0 : index
      %c0_167 = arith.constant 0 : index
      %423 = vector.load %arg2[%c0_166, %c0_167] : memref<16x128xf32, #tpu.memory_space<vmem>>, vector<16x128xf32>
      %c0_168 = arith.constant 0 : index
      %c0_169 = arith.constant 0 : index
      %424 = vector.load %arg24[%c0_168, %c0_169] : memref<16x128xf32, #tpu.memory_space<vmem>>, vector<16x128xf32>
      tpu.vector_store %arg24[%c0_168, %c0_169], %423 {strides = array<i32>} : memref<16x128xf32, #tpu.memory_space<vmem>>, vector<16x128xf32>,
    } else {
    }
    %c0 = arith.constant 0 : index
    %c0_1 = arith.constant 0 : index
    %3 = vector.load %arg24[%c0, %c0_1] : memref<16x128xf32, #tpu.memory_space<vmem>>, vector<16x128xf32>
    %c0_2 = arith.constant 0 : index
    %c0_3 = arith.constant 0 : index
    %c0_4 = arith.constant 0 : index
    %4 = vector.load %arg4[%c0_2, %c0_3, %c0_4] : memref<1x128x128xf32, #tpu.memory_space<vmem>>, vector<1x128x128xf32>
    %5 = vector.shape_cast %4 : vector<1x128x128xf32> to vector<128x128xf32>
    %c0_5 = arith.constant 0 : index
    %c0_6 = arith.constant 0 : index
    %c0_7 = arith.constant 0 : index
    %6 = vector.load %arg5[%c0_5, %c0_6, %c0_7] : memref<1x128x128xf32, #tpu.memory_space<vmem>>, vector<1x128x128xf32>
    %7 = vector.shape_cast %6 : vector<1x128x128xf32> to vector<128x128xf32>
    %c0_8 = arith.constant 0 : index
    %c0_9 = arith.constant 0 : index
    %c0_10 = arith.constant 0 : index
    %8 = vector.load %arg6[%c0_8, %c0_9, %c0_10] : memref<1x128x128xf32, #tpu.memory_space<vmem>>, vector<1x128x128xf32>
    %9 = vector.shape_cast %8 : vector<1x128x128xf32> to vector<128x128xf32>
    %c0_11 = arith.constant 0 : index
    %c0_12 = arith.constant 0 : index
    %c0_13 = arith.constant 0 : index
    %10 = vector.load %arg7[%c0_11, %c0_12, %c0_13] : memref<1x128x128xf32, #tpu.memory_space<vmem>>, vector<1x128x128xf32>
    %11 = vector.shape_cast %10 : vector<1x128x128xf32> to vector<128x128xf32>
    %c0_14 = arith.constant 0 : index
    %c0_15 = arith.constant 0 : index
    %c0_16 = arith.constant 0 : index
    %12 = vector.load %arg8[%c0_14, %c0_15, %c0_16] : memref<1x1x128xf32, #tpu.memory_space<vmem>>, vector<1x1x128xf32>
    %13 = vector.shape_cast %12 : vector<1x1x128xf32> to vector<1x128xf32>
    %cst = arith.constant dense<0.000000e+00> : vector<16x128xf32>
    %14 = tpu.matmul %3, %5, %cst {dimension_numbers = #tpu.dot_dimension_numbers<[1], [0], [0], [1], [0, 0, 1, 1], [], []>} : vector<16x128xf32>, vector<128x128xf32>, vector<16x128xf32> -> vector<16x128xf32>
    %cst_17 = arith.constant dense<0.000000e+00> : vector<16x128xf32>
    %15 = tpu.matmul %3, %7, %cst_17 {dimension_numbers = #tpu.dot_dimension_numbers<[1], [0], [0], [1], [0, 0, 1, 1], [], []>} : vector<16x128xf32>, vector<128x128xf32>, vector<16x128xf32> -> vector<16x128xf32>
    %cst_18 = arith.constant dense<0.000000e+00> : vector<16x128xf32>
    %16 = tpu.matmul %3, %9, %cst_18 {dimension_numbers = #tpu.dot_dimension_numbers<[1], [0], [0], [1], [0, 0, 1, 1], [], []>} : vector<16x128xf32>, vector<128x128xf32>, vector<16x128xf32> -> vector<16x128xf32>
    %17 = tpu.iota {dimensions = array<i32: 0>} : vector<8x8xi32>
    %18 = tpu.iota {dimensions = array<i32: 1>} : vector<8x8xi32>
    %19 = arith.cmpi sge, %17, %18 : vector<8x8xi32>
    %20 = vector.extract_strided_slice %14 {offsets = [0, 0], sizes = [8, 128], strides = [1, 1]} : vector<16x128xf32> to vector<8x128xf32>
    %21 = vector.extract_strided_slice %15 {offsets = [0, 0], sizes = [8, 128], strides = [1, 1]} : vector<16x128xf32> to vector<8x128xf32>
    %22 = vector.extract_strided_slice %16 {offsets = [0, 0], sizes = [8, 128], strides = [1, 1]} : vector<16x128xf32> to vector<8x128xf32>
    %23 = vector.extract_strided_slice %20 {offsets = [0, 0], sizes = [8, 32], strides = [1, 1]} : vector<8x128xf32> to vector<8x32xf32>
    %24 = vector.extract_strided_slice %21 {offsets = [0, 0], sizes = [8, 32], strides = [1, 1]} : vector<8x128xf32> to vector<8x32xf32>
    %25 = vector.extract_strided_slice %22 {offsets = [0, 0], sizes = [8, 32], strides = [1, 1]} : vector<8x128xf32> to vector<8x32xf32>
    %cst_19 = arith.constant dense<0.000000e+00> : vector<8x8xf32>
    %26 = tpu.matmul %23, %24, %cst_19 {dimension_numbers = #tpu.dot_dimension_numbers<[1], [1], [0], [0], [0, 0, 1, 0], [], []>} : vector<8x32xf32>, vector<8x32xf32>, vector<8x8xf32> -> vector<8x8xf32>
    %cst_20 = arith.constant -1.000000e+30 : f32
    %27 = vector.broadcast %cst_20 : f32 to vector<8x8xf32>
    %28 = arith.select %19, %26, %27 : vector<8x8xi1>, vector<8x8xf32>
    %cst_21 = arith.constant dense<0xFF800000> : vector<8xf32>
    %29 = vector.multi_reduction <maximumf>, %28, %cst_21 [1] : vector<8x8xf32> to vector<8xf32>
    %30 = vector.shape_cast %29 : vector<8xf32> to vector<8x1xf32>
    %31 = vector.broadcast %30 : vector<8x1xf32> to vector<8x8xf32>
    %32 = arith.subf %28, %31 : vector<8x8xf32>
    %33 = math.exp %32 : vector<8x8xf32>
    %cst_22 = arith.constant dense<0.000000e+00> : vector<8xf32>
    %34 = vector.multi_reduction <add>, %33, %cst_22 [1] : vector<8x8xf32> to vector<8xf32>
    %35 = vector.shape_cast %34 : vector<8xf32> to vector<8x1xf32>
    %36 = tpu.reciprocal %35 {approx = true} : vector<8x1xf32> -> vector<8x1xf32>
    %37 = vector.broadcast %36 : vector<8x1xf32> to vector<8x8xf32>
    %38 = arith.mulf %33, %37 : vector<8x8xf32>
    %cst_23 = arith.constant dense<0.000000e+00> : vector<8x32xf32>
    %39 = tpu.matmul %38, %25, %cst_23 {dimension_numbers = #tpu.dot_dimension_numbers<[1], [0], [0], [1], [0, 0, 1, 1], [], []>} : vector<8x8xf32>, vector<8x32xf32>, vector<8x32xf32> -> vector<8x32xf32>
    %40 = vector.extract_strided_slice %20 {offsets = [0, 32], sizes = [8, 32], strides = [1, 1]} : vector<8x128xf32> to vector<8x32xf32>
    %41 = vector.extract_strided_slice %21 {offsets = [0, 32], sizes = [8, 32], strides = [1, 1]} : vector<8x128xf32> to vector<8x32xf32>
    %42 = vector.extract_strided_slice %22 {offsets = [0, 32], sizes = [8, 32], strides = [1, 1]} : vector<8x128xf32> to vector<8x32xf32>
    %cst_24 = arith.constant dense<0.000000e+00> : vector<8x8xf32>
    %43 = tpu.matmul %40, %41, %cst_24 {dimension_numbers = #tpu.dot_dimension_numbers<[1], [1], [0], [0], [0, 0, 1, 0], [], []>} : vector<8x32xf32>, vector<8x32xf32>, vector<8x8xf32> -> vector<8x8xf32>
    %cst_25 = arith.constant -1.000000e+30 : f32
    %44 = vector.broadcast %cst_25 : f32 to vector<8x8xf32>
    %45 = arith.select %19, %43, %44 : vector<8x8xi1>, vector<8x8xf32>
    %cst_26 = arith.constant dense<0xFF800000> : vector<8xf32>
    %46 = vector.multi_reduction <maximumf>, %45, %cst_26 [1] : vector<8x8xf32> to vector<8xf32>
    %47 = vector.shape_cast %46 : vector<8xf32> to vector<8x1xf32>
    %48 = vector.broadcast %47 : vector<8x1xf32> to vector<8x8xf32>
    %49 = arith.subf %45, %48 : vector<8x8xf32>
    %50 = math.exp %49 : vector<8x8xf32>
    %cst_27 = arith.constant dense<0.000000e+00> : vector<8xf32>
    %51 = vector.multi_reduction <add>, %50, %cst_27 [1] : vector<8x8xf32> to vector<8xf32>
    %52 = vector.shape_cast %51 : vector<8xf32> to vector<8x1xf32>
    %53 = tpu.reciprocal %52 {approx = true} : vector<8x1xf32> -> vector<8x1xf32>
    %54 = vector.broadcast %53 : vector<8x1xf32> to vector<8x8xf32>
    %55 = arith.mulf %50, %54 : vector<8x8xf32>
    %cst_28 = arith.constant dense<0.000000e+00> : vector<8x32xf32>
    %56 = tpu.matmul %55, %42, %cst_28 {dimension_numbers = #tpu.dot_dimension_numbers<[1], [0], [0], [1], [0, 0, 1, 1], [], []>} : vector<8x8xf32>, vector<8x32xf32>, vector<8x32xf32> -> vector<8x32xf32>
    %57 = vector.extract_strided_slice %20 {offsets = [0, 64], sizes = [8, 32], strides = [1, 1]} : vector<8x128xf32> to vector<8x32xf32>
    %58 = vector.extract_strided_slice %21 {offsets = [0, 64], sizes = [8, 32], strides = [1, 1]} : vector<8x128xf32> to vector<8x32xf32>
    %59 = vector.extract_strided_slice %22 {offsets = [0, 64], sizes = [8, 32], strides = [1, 1]} : vector<8x128xf32> to vector<8x32xf32>
    %cst_29 = arith.constant dense<0.000000e+00> : vector<8x8xf32>
    %60 = tpu.matmul %57, %58, %cst_29 {dimension_numbers = #tpu.dot_dimension_numbers<[1], [1], [0], [0], [0, 0, 1, 0], [], []>} : vector<8x32xf32>, vector<8x32xf32>, vector<8x8xf32> -> vector<8x8xf32>
    %cst_30 = arith.constant -1.000000e+30 : f32
    %61 = vector.broadcast %cst_30 : f32 to vector<8x8xf32>
    %62 = arith.select %19, %60, %61 : vector<8x8xi1>, vector<8x8xf32>
    %cst_31 = arith.constant dense<0xFF800000> : vector<8xf32>
    %63 = vector.multi_reduction <maximumf>, %62, %cst_31 [1] : vector<8x8xf32> to vector<8xf32>
    %64 = vector.shape_cast %63 : vector<8xf32> to vector<8x1xf32>
    %65 = vector.broadcast %64 : vector<8x1xf32> to vector<8x8xf32>
    %66 = arith.subf %62, %65 : vector<8x8xf32>
    %67 = math.exp %66 : vector<8x8xf32>
    %cst_32 = arith.constant dense<0.000000e+00> : vector<8xf32>
    %68 = vector.multi_reduction <add>, %67, %cst_32 [1] : vector<8x8xf32> to vector<8xf32>
    %69 = vector.shape_cast %68 : vector<8xf32> to vector<8x1xf32>
    %70 = tpu.reciprocal %69 {approx = true} : vector<8x1xf32> -> vector<8x1xf32>
    %71 = vector.broadcast %70 : vector<8x1xf32> to vector<8x8xf32>
    %72 = arith.mulf %67, %71 : vector<8x8xf32>
    %cst_33 = arith.constant dense<0.000000e+00> : vector<8x32xf32>
    %73 = tpu.matmul %72, %59, %cst_33 {dimension_numbers = #tpu.dot_dimension_numbers<[1], [0], [0], [1], [0, 0, 1, 1], [], []>} : vector<8x8xf32>, vector<8x32xf32>, vector<8x32xf32> -> vector<8x32xf32>
    %74 = vector.extract_strided_slice %20 {offsets = [0, 96], sizes = [8, 32], strides = [1, 1]} : vector<8x128xf32> to vector<8x32xf32>
    %75 = vector.extract_strided_slice %21 {offsets = [0, 96], sizes = [8, 32], strides = [1, 1]} : vector<8x128xf32> to vector<8x32xf32>
    %76 = vector.extract_strided_slice %22 {offsets = [0, 96], sizes = [8, 32], strides = [1, 1]} : vector<8x128xf32> to vector<8x32xf32>
    %cst_34 = arith.constant dense<0.000000e+00> : vector<8x8xf32>
    %77 = tpu.matmul %74, %75, %cst_34 {dimension_numbers = #tpu.dot_dimension_numbers<[1], [1], [0], [0], [0, 0, 1, 0], [], []>} : vector<8x32xf32>, vector<8x32xf32>, vector<8x8xf32> -> vector<8x8xf32>
    %cst_35 = arith.constant -1.000000e+30 : f32
    %78 = vector.broadcast %cst_35 : f32 to vector<8x8xf32>
    %79 = arith.select %19, %77, %78 : vector<8x8xi1>, vector<8x8xf32>
    %cst_36 = arith.constant dense<0xFF800000> : vector<8xf32>
    %80 = vector.multi_reduction <maximumf>, %79, %cst_36 [1] : vector<8x8xf32> to vector<8xf32>
    %81 = vector.shape_cast %80 : vector<8xf32> to vector<8x1xf32>
    %82 = vector.broadcast %81 : vector<8x1xf32> to vector<8x8xf32>
    %83 = arith.subf %79, %82 : vector<8x8xf32>
    %84 = math.exp %83 : vector<8x8xf32>
    %cst_37 = arith.constant dense<0.000000e+00> : vector<8xf32>
    %85 = vector.multi_reduction <add>, %84, %cst_37 [1] : vector<8x8xf32> to vector<8xf32>
    %86 = vector.shape_cast %85 : vector<8xf32> to vector<8x1xf32>
    %87 = tpu.reciprocal %86 {approx = true} : vector<8x1xf32> -> vector<8x1xf32>
    %88 = vector.broadcast %87 : vector<8x1xf32> to vector<8x8xf32>
    %89 = arith.mulf %84, %88 : vector<8x8xf32>
    %cst_38 = arith.constant dense<0.000000e+00> : vector<8x32xf32>
    %90 = tpu.matmul %89, %76, %cst_38 {dimension_numbers = #tpu.dot_dimension_numbers<[1], [0], [0], [1], [0, 0, 1, 1], [], []>} : vector<8x8xf32>, vector<8x32xf32>, vector<8x32xf32> -> vector<8x32xf32>
    %91 = tpu.concatenate %39, %56, %73, %90 in 1 : vector<8x32xf32>, vector<8x32xf32>, vector<8x32xf32>, vector<8x32xf32> -> vector<8x128xf32>
    %92 = vector.extract_strided_slice %14 {offsets = [8, 0], sizes = [8, 128], strides = [1, 1]} : vector<16x128xf32> to vector<8x128xf32>
    %93 = vector.extract_strided_slice %15 {offsets = [8, 0], sizes = [8, 128], strides = [1, 1]} : vector<16x128xf32> to vector<8x128xf32>
    %94 = vector.extract_strided_slice %16 {offsets = [8, 0], sizes = [8, 128], strides = [1, 1]} : vector<16x128xf32> to vector<8x128xf32>
    %95 = vector.extract_strided_slice %92 {offsets = [0, 0], sizes = [8, 32], strides = [1, 1]} : vector<8x128xf32> to vector<8x32xf32>
    %96 = vector.extract_strided_slice %93 {offsets = [0, 0], sizes = [8, 32], strides = [1, 1]} : vector<8x128xf32> to vector<8x32xf32>
    %97 = vector.extract_strided_slice %94 {offsets = [0, 0], sizes = [8, 32], strides = [1, 1]} : vector<8x128xf32> to vector<8x32xf32>
    %cst_39 = arith.constant dense<0.000000e+00> : vector<8x8xf32>
    %98 = tpu.matmul %95, %96, %cst_39 {dimension_numbers = #tpu.dot_dimension_numbers<[1], [1], [0], [0], [0, 0, 1, 0], [], []>} : vector<8x32xf32>, vector<8x32xf32>, vector<8x8xf32> -> vector<8x8xf32>
    %cst_40 = arith.constant -1.000000e+30 : f32
    %99 = vector.broadcast %cst_40 : f32 to vector<8x8xf32>
    %100 = arith.select %19, %98, %99 : vector<8x8xi1>, vector<8x8xf32>
    %cst_41 = arith.constant dense<0xFF800000> : vector<8xf32>
    %101 = vector.multi_reduction <maximumf>, %100, %cst_41 [1] : vector<8x8xf32> to vector<8xf32>
    %102 = vector.shape_cast %101 : vector<8xf32> to vector<8x1xf32>
    %103 = vector.broadcast %102 : vector<8x1xf32> to vector<8x8xf32>
    %104 = arith.subf %100, %103 : vector<8x8xf32>
    %105 = math.exp %104 : vector<8x8xf32>
    %cst_42 = arith.constant dense<0.000000e+00> : vector<8xf32>
    %106 = vector.multi_reduction <add>, %105, %cst_42 [1] : vector<8x8xf32> to vector<8xf32>
    %107 = vector.shape_cast %106 : vector<8xf32> to vector<8x1xf32>
    %108 = tpu.reciprocal %107 {approx = true} : vector<8x1xf32> -> vector<8x1xf32>
    %109 = vector.broadcast %108 : vector<8x1xf32> to vector<8x8xf32>
    %110 = arith.mulf %105, %109 : vector<8x8xf32>
    %cst_43 = arith.constant dense<0.000000e+00> : vector<8x32xf32>
    %111 = tpu.matmul %110, %97, %cst_43 {dimension_numbers = #tpu.dot_dimension_numbers<[1], [0], [0], [1], [0, 0, 1, 1], [], []>} : vector<8x8xf32>, vector<8x32xf32>, vector<8x32xf32> -> vector<8x32xf32>
    %112 = vector.extract_strided_slice %92 {offsets = [0, 32], sizes = [8, 32], strides = [1, 1]} : vector<8x128xf32> to vector<8x32xf32>
    %113 = vector.extract_strided_slice %93 {offsets = [0, 32], sizes = [8, 32], strides = [1, 1]} : vector<8x128xf32> to vector<8x32xf32>
    %114 = vector.extract_strided_slice %94 {offsets = [0, 32], sizes = [8, 32], strides = [1, 1]} : vector<8x128xf32> to vector<8x32xf32>
    %cst_44 = arith.constant dense<0.000000e+00> : vector<8x8xf32>
    %115 = tpu.matmul %112, %113, %cst_44 {dimension_numbers = #tpu.dot_dimension_numbers<[1], [1], [0], [0], [0, 0, 1, 0], [], []>} : vector<8x32xf32>, vector<8x32xf32>, vector<8x8xf32> -> vector<8x8xf32>
    %cst_45 = arith.constant -1.000000e+30 : f32
    %116 = vector.broadcast %cst_45 : f32 to vector<8x8xf32>
    %117 = arith.select %19, %115, %116 : vector<8x8xi1>, vector<8x8xf32>
    %cst_46 = arith.constant dense<0xFF800000> : vector<8xf32>
    %118 = vector.multi_reduction <maximumf>, %117, %cst_46 [1] : vector<8x8xf32> to vector<8xf32>
    %119 = vector.shape_cast %118 : vector<8xf32> to vector<8x1xf32>
    %120 = vector.broadcast %119 : vector<8x1xf32> to vector<8x8xf32>
    %121 = arith.subf %117, %120 : vector<8x8xf32>
    %122 = math.exp %121 : vector<8x8xf32>
    %cst_47 = arith.constant dense<0.000000e+00> : vector<8xf32>
    %123 = vector.multi_reduction <add>, %122, %cst_47 [1] : vector<8x8xf32> to vector<8xf32>
    %124 = vector.shape_cast %123 : vector<8xf32> to vector<8x1xf32>
    %125 = tpu.reciprocal %124 {approx = true} : vector<8x1xf32> -> vector<8x1xf32>
    %126 = vector.broadcast %125 : vector<8x1xf32> to vector<8x8xf32>
    %127 = arith.mulf %122, %126 : vector<8x8xf32>
    %cst_48 = arith.constant dense<0.000000e+00> : vector<8x32xf32>
    %128 = tpu.matmul %127, %114, %cst_48 {dimension_numbers = #tpu.dot_dimension_numbers<[1], [0], [0], [1], [0, 0, 1, 1], [], []>} : vector<8x8xf32>, vector<8x32xf32>, vector<8x32xf32> -> vector<8x32xf32>
    %129 = vector.extract_strided_slice %92 {offsets = [0, 64], sizes = [8, 32], strides = [1, 1]} : vector<8x128xf32> to vector<8x32xf32>
    %130 = vector.extract_strided_slice %93 {offsets = [0, 64], sizes = [8, 32], strides = [1, 1]} : vector<8x128xf32> to vector<8x32xf32>
    %131 = vector.extract_strided_slice %94 {offsets = [0, 64], sizes = [8, 32], strides = [1, 1]} : vector<8x128xf32> to vector<8x32xf32>
    %cst_49 = arith.constant dense<0.000000e+00> : vector<8x8xf32>
    %132 = tpu.matmul %129, %130, %cst_49 {dimension_numbers = #tpu.dot_dimension_numbers<[1], [1], [0], [0], [0, 0, 1, 0], [], []>} : vector<8x32xf32>, vector<8x32xf32>, vector<8x8xf32> -> vector<8x8xf32>
    %cst_50 = arith.constant -1.000000e+30 : f32
    %133 = vector.broadcast %cst_50 : f32 to vector<8x8xf32>
    %134 = arith.select %19, %132, %133 : vector<8x8xi1>, vector<8x8xf32>
    %cst_51 = arith.constant dense<0xFF800000> : vector<8xf32>
    %135 = vector.multi_reduction <maximumf>, %134, %cst_51 [1] : vector<8x8xf32> to vector<8xf32>
    %136 = vector.shape_cast %135 : vector<8xf32> to vector<8x1xf32>
    %137 = vector.broadcast %136 : vector<8x1xf32> to vector<8x8xf32>
    %138 = arith.subf %134, %137 : vector<8x8xf32>
    %139 = math.exp %138 : vector<8x8xf32>
    %cst_52 = arith.constant dense<0.000000e+00> : vector<8xf32>
    %140 = vector.multi_reduction <add>, %139, %cst_52 [1] : vector<8x8xf32> to vector<8xf32>
    %141 = vector.shape_cast %140 : vector<8xf32> to vector<8x1xf32>
    %142 = tpu.reciprocal %141 {approx = true} : vector<8x1xf32> -> vector<8x1xf32>
    %143 = vector.broadcast %142 : vector<8x1xf32> to vector<8x8xf32>
    %144 = arith.mulf %139, %143 : vector<8x8xf32>
    %cst_53 = arith.constant dense<0.000000e+00> : vector<8x32xf32>
    %145 = tpu.matmul %144, %131, %cst_53 {dimension_numbers = #tpu.dot_dimension_numbers<[1], [0], [0], [1], [0, 0, 1, 1], [], []>} : vector<8x8xf32>, vector<8x32xf32>, vector<8x32xf32> -> vector<8x32xf32>
    %146 = vector.extract_strided_slice %92 {offsets = [0, 96], sizes = [8, 32], strides = [1, 1]} : vector<8x128xf32> to vector<8x32xf32>
    %147 = vector.extract_strided_slice %93 {offsets = [0, 96], sizes = [8, 32], strides = [1, 1]} : vector<8x128xf32> to vector<8x32xf32>
    %148 = vector.extract_strided_slice %94 {offsets = [0, 96], sizes = [8, 32], strides = [1, 1]} : vector<8x128xf32> to vector<8x32xf32>
    %cst_54 = arith.constant dense<0.000000e+00> : vector<8x8xf32>
    %149 = tpu.matmul %146, %147, %cst_54 {dimension_numbers = #tpu.dot_dimension_numbers<[1], [1], [0], [0], [0, 0, 1, 0], [], []>} : vector<8x32xf32>, vector<8x32xf32>, vector<8x8xf32> -> vector<8x8xf32>
    %cst_55 = arith.constant -1.000000e+30 : f32
    %150 = vector.broadcast %cst_55 : f32 to vector<8x8xf32>
    %151 = arith.select %19, %149, %150 : vector<8x8xi1>, vector<8x8xf32>
    %cst_56 = arith.constant dense<0xFF800000> : vector<8xf32>
    %152 = vector.multi_reduction <maximumf>, %151, %cst_56 [1] : vector<8x8xf32> to vector<8xf32>
    %153 = vector.shape_cast %152 : vector<8xf32> to vector<8x1xf32>
    %154 = vector.broadcast %153 : vector<8x1xf32> to vector<8x8xf32>
    %155 = arith.subf %151, %154 : vector<8x8xf32>
    %156 = math.exp %155 : vector<8x8xf32>
    %cst_57 = arith.constant dense<0.000000e+00> : vector<8xf32>
    %157 = vector.multi_reduction <add>, %156, %cst_57 [1] : vector<8x8xf32> to vector<8xf32>
    %158 = vector.shape_cast %157 : vector<8xf32> to vector<8x1xf32>
    %159 = tpu.reciprocal %158 {approx = true} : vector<8x1xf32> -> vector<8x1xf32>
    %160 = vector.broadcast %159 : vector<8x1xf32> to vector<8x8xf32>
    %161 = arith.mulf %156, %160 : vector<8x8xf32>
    %cst_58 = arith.constant dense<0.000000e+00> : vector<8x32xf32>
    %162 = tpu.matmul %161, %148, %cst_58 {dimension_numbers = #tpu.dot_dimension_numbers<[1], [0], [0], [1], [0, 0, 1, 1], [], []>} : vector<8x8xf32>, vector<8x32xf32>, vector<8x32xf32> -> vector<8x32xf32>
    %163 = tpu.concatenate %111, %128, %145, %162 in 1 : vector<8x32xf32>, vector<8x32xf32>, vector<8x32xf32>, vector<8x32xf32> -> vector<8x128xf32>
    %164 = tpu.concatenate %91, %163 in 0 : vector<8x128xf32>, vector<8x128xf32> -> vector<16x128xf32>
    %cst_59 = arith.constant dense<0.000000e+00> : vector<16x128xf32>
    %165 = tpu.matmul %164, %11, %cst_59 {dimension_numbers = #tpu.dot_dimension_numbers<[1], [0], [0], [1], [0, 0, 1, 1], [], []>} : vector<16x128xf32>, vector<128x128xf32>, vector<16x128xf32> -> vector<16x128xf32>
    %166 = vector.broadcast %13 : vector<1x128xf32> to vector<16x128xf32>
    %167 = arith.addf %165, %166 : vector<16x128xf32>
    %168 = arith.addf %3, %167 : vector<16x128xf32>
    %c0_60 = arith.constant 0 : index
    %c0_61 = arith.constant 0 : index
    %c0_62 = arith.constant 0 : index
    %169 = vector.load %arg18[%c0_60, %c0_61, %c0_62] : memref<1x1x128xf32, #tpu.memory_space<vmem>>, vector<1x1x128xf32>
    %170 = vector.shape_cast %169 : vector<1x1x128xf32> to vector<1x128xf32>
    %c0_63 = arith.constant 0 : index
    %c0_64 = arith.constant 0 : index
    %c0_65 = arith.constant 0 : index
    %171 = vector.load %arg19[%c0_63, %c0_64, %c0_65] : memref<1x1x128xf32, #tpu.memory_space<vmem>>, vector<1x1x128xf32>
    %172 = vector.shape_cast %171 : vector<1x1x128xf32> to vector<1x128xf32>
    %cst_66 = arith.constant dense<0.000000e+00> : vector<16xf32>
    %173 = vector.multi_reduction <add>, %168, %cst_66 [1] : vector<16x128xf32> to vector<16xf32>
    %174 = vector.shape_cast %173 : vector<16xf32> to vector<16x1xf32>
    %cst_67 = arith.constant 1.280000e+02 : f32
    %175 = vector.broadcast %cst_67 : f32 to vector<16x1xf32>
    %176 = arith.divf %174, %175 : vector<16x1xf32>
    %177 = vector.broadcast %176 : vector<16x1xf32> to vector<16x128xf32>
    %178 = arith.subf %168, %177 : vector<16x128xf32>
    %179 = arith.mulf %178, %178 : vector<16x128xf32>
    %cst_68 = arith.constant dense<0.000000e+00> : vector<16xf32>
    %180 = vector.multi_reduction <add>, %179, %cst_68 [1] : vector<16x128xf32> to vector<16xf32>
    %181 = vector.shape_cast %180 : vector<16xf32> to vector<16x1xf32>
    %cst_69 = arith.constant 1.280000e+02 : f32
    %182 = vector.broadcast %cst_69 : f32 to vector<16x1xf32>
    %183 = arith.divf %181, %182 : vector<16x1xf32>
    %184 = vector.broadcast %176 : vector<16x1xf32> to vector<16x128xf32>
    %185 = arith.subf %168, %184 : vector<16x128xf32>
    %cst_70 = arith.constant 9.99999974E-6 : f32
    %186 = vector.broadcast %cst_70 : f32 to vector<16x1xf32>
    %187 = arith.addf %183, %186 : vector<16x1xf32>
    %188 = math.rsqrt %187 : vector<16x1xf32>
    %189 = vector.broadcast %188 : vector<16x1xf32> to vector<16x128xf32>
    %190 = arith.mulf %185, %189 : vector<16x128xf32>
    %191 = vector.broadcast %170 : vector<1x128xf32> to vector<16x128xf32>
    %192 = arith.mulf %190, %191 : vector<16x128xf32>
    %193 = vector.broadcast %172 : vector<1x128xf32> to vector<16x128xf32>
    %194 = arith.addf %192, %193 : vector<16x128xf32>
    %c0_71 = arith.constant 0 : index
    %c0_72 = arith.constant 0 : index
    %195 = vector.load %arg3[%c0_71, %c0_72] : memref<16x128xf32, #tpu.memory_space<vmem>>, vector<16x128xf32>
    %c0_73 = arith.constant 0 : index
    %c0_74 = arith.constant 0 : index
    %c0_75 = arith.constant 0 : index
    %196 = vector.load %arg9[%c0_73, %c0_74, %c0_75] : memref<1x128x128xf32, #tpu.memory_space<vmem>>, vector<1x128x128xf32>
    %197 = vector.shape_cast %196 : vector<1x128x128xf32> to vector<128x128xf32>
    %c0_76 = arith.constant 0 : index
    %c0_77 = arith.constant 0 : index
    %c0_78 = arith.constant 0 : index
    %198 = vector.load %arg10[%c0_76, %c0_77, %c0_78] : memref<1x128x128xf32, #tpu.memory_space<vmem>>, vector<1x128x128xf32>
    %199 = vector.shape_cast %198 : vector<1x128x128xf32> to vector<128x128xf32>
    %c0_79 = arith.constant 0 : index
    %c0_80 = arith.constant 0 : index
    %c0_81 = arith.constant 0 : index
    %200 = vector.load %arg11[%c0_79, %c0_80, %c0_81] : memref<1x128x128xf32, #tpu.memory_space<vmem>>, vector<1x128x128xf32>
    %201 = vector.shape_cast %200 : vector<1x128x128xf32> to vector<128x128xf32>
    %c0_82 = arith.constant 0 : index
    %c0_83 = arith.constant 0 : index
    %c0_84 = arith.constant 0 : index
    %202 = vector.load %arg12[%c0_82, %c0_83, %c0_84] : memref<1x128x128xf32, #tpu.memory_space<vmem>>, vector<1x128x128xf32>
    %203 = vector.shape_cast %202 : vector<1x128x128xf32> to vector<128x128xf32>
    %c0_85 = arith.constant 0 : index
    %c0_86 = arith.constant 0 : index
    %c0_87 = arith.constant 0 : index
    %204 = vector.load %arg13[%c0_85, %c0_86, %c0_87] : memref<1x1x128xf32, #tpu.memory_space<vmem>>, vector<1x1x128xf32>
    %205 = vector.shape_cast %204 : vector<1x1x128xf32> to vector<1x128xf32>
    %cst_88 = arith.constant dense<0.000000e+00> : vector<16x128xf32>
    %206 = tpu.matmul %194, %197, %cst_88 {dimension_numbers = #tpu.dot_dimension_numbers<[1], [0], [0], [1], [0, 0, 1, 1], [], []>} : vector<16x128xf32>, vector<128x128xf32>, vector<16x128xf32> -> vector<16x128xf32>
    %cst_89 = arith.constant dense<0.000000e+00> : vector<16x128xf32>
    %207 = tpu.matmul %195, %199, %cst_89 {dimension_numbers = #tpu.dot_dimension_numbers<[1], [0], [0], [1], [0, 0, 1, 1], [], []>} : vector<16x128xf32>, vector<128x128xf32>, vector<16x128xf32> -> vector<16x128xf32>
    %cst_90 = arith.constant dense<0.000000e+00> : vector<16x128xf32>
    %208 = tpu.matmul %195, %201, %cst_90 {dimension_numbers = #tpu.dot_dimension_numbers<[1], [0], [0], [1], [0, 0, 1, 1], [], []>} : vector<16x128xf32>, vector<128x128xf32>, vector<16x128xf32> -> vector<16x128xf32>
    %209 = vector.extract_strided_slice %206 {offsets = [0, 0], sizes = [8, 128], strides = [1, 1]} : vector<16x128xf32> to vector<8x128xf32>
    %210 = vector.extract_strided_slice %207 {offsets = [0, 0], sizes = [8, 128], strides = [1, 1]} : vector<16x128xf32> to vector<8x128xf32>
    %211 = vector.extract_strided_slice %208 {offsets = [0, 0], sizes = [8, 128], strides = [1, 1]} : vector<16x128xf32> to vector<8x128xf32>
    %212 = vector.extract_strided_slice %209 {offsets = [0, 0], sizes = [8, 32], strides = [1, 1]} : vector<8x128xf32> to vector<8x32xf32>
    %213 = vector.extract_strided_slice %210 {offsets = [0, 0], sizes = [8, 32], strides = [1, 1]} : vector<8x128xf32> to vector<8x32xf32>
    %214 = vector.extract_strided_slice %211 {offsets = [0, 0], sizes = [8, 32], strides = [1, 1]} : vector<8x128xf32> to vector<8x32xf32>
    %cst_91 = arith.constant dense<0.000000e+00> : vector<8x8xf32>
    %215 = tpu.matmul %212, %213, %cst_91 {dimension_numbers = #tpu.dot_dimension_numbers<[1], [1], [0], [0], [0, 0, 1, 0], [], []>} : vector<8x32xf32>, vector<8x32xf32>, vector<8x8xf32> -> vector<8x8xf32>
    %cst_92 = arith.constant dense<0xFF800000> : vector<8xf32>
    %216 = vector.multi_reduction <maximumf>, %215, %cst_92 [1] : vector<8x8xf32> to vector<8xf32>
    %217 = vector.shape_cast %216 : vector<8xf32> to vector<8x1xf32>
    %218 = vector.broadcast %217 : vector<8x1xf32> to vector<8x8xf32>
    %219 = arith.subf %215, %218 : vector<8x8xf32>
    %220 = math.exp %219 : vector<8x8xf32>
    %cst_93 = arith.constant dense<0.000000e+00> : vector<8xf32>
    %221 = vector.multi_reduction <add>, %220, %cst_93 [1] : vector<8x8xf32> to vector<8xf32>
    %222 = vector.shape_cast %221 : vector<8xf32> to vector<8x1xf32>
    %223 = tpu.reciprocal %222 {approx = true} : vector<8x1xf32> -> vector<8x1xf32>
    %224 = vector.broadcast %223 : vector<8x1xf32> to vector<8x8xf32>
    %225 = arith.mulf %220, %224 : vector<8x8xf32>
    %cst_94 = arith.constant dense<0.000000e+00> : vector<8x32xf32>
    %226 = tpu.matmul %225, %214, %cst_94 {dimension_numbers = #tpu.dot_dimension_numbers<[1], [0], [0], [1], [0, 0, 1, 1], [], []>} : vector<8x8xf32>, vector<8x32xf32>, vector<8x32xf32> -> vector<8x32xf32>
    %227 = vector.extract_strided_slice %209 {offsets = [0, 32], sizes = [8, 32], strides = [1, 1]} : vector<8x128xf32> to vector<8x32xf32>
    %228 = vector.extract_strided_slice %210 {offsets = [0, 32], sizes = [8, 32], strides = [1, 1]} : vector<8x128xf32> to vector<8x32xf32>
    %229 = vector.extract_strided_slice %211 {offsets = [0, 32], sizes = [8, 32], strides = [1, 1]} : vector<8x128xf32> to vector<8x32xf32>
    %cst_95 = arith.constant dense<0.000000e+00> : vector<8x8xf32>
    %230 = tpu.matmul %227, %228, %cst_95 {dimension_numbers = #tpu.dot_dimension_numbers<[1], [1], [0], [0], [0, 0, 1, 0], [], []>} : vector<8x32xf32>, vector<8x32xf32>, vector<8x8xf32> -> vector<8x8xf32>
    %cst_96 = arith.constant dense<0xFF800000> : vector<8xf32>
    %231 = vector.multi_reduction <maximumf>, %230, %cst_96 [1] : vector<8x8xf32> to vector<8xf32>
    %232 = vector.shape_cast %231 : vector<8xf32> to vector<8x1xf32>
    %233 = vector.broadcast %232 : vector<8x1xf32> to vector<8x8xf32>
    %234 = arith.subf %230, %233 : vector<8x8xf32>
    %235 = math.exp %234 : vector<8x8xf32>
    %cst_97 = arith.constant dense<0.000000e+00> : vector<8xf32>
    %236 = vector.multi_reduction <add>, %235, %cst_97 [1] : vector<8x8xf32> to vector<8xf32>
    %237 = vector.shape_cast %236 : vector<8xf32> to vector<8x1xf32>
    %238 = tpu.reciprocal %237 {approx = true} : vector<8x1xf32> -> vector<8x1xf32>
    %239 = vector.broadcast %238 : vector<8x1xf32> to vector<8x8xf32>
    %240 = arith.mulf %235, %239 : vector<8x8xf32>
    %cst_98 = arith.constant dense<0.000000e+00> : vector<8x32xf32>
    %241 = tpu.matmul %240, %229, %cst_98 {dimension_numbers = #tpu.dot_dimension_numbers<[1], [0], [0], [1], [0, 0, 1, 1], [], []>} : vector<8x8xf32>, vector<8x32xf32>, vector<8x32xf32> -> vector<8x32xf32>
    %242 = vector.extract_strided_slice %209 {offsets = [0, 64], sizes = [8, 32], strides = [1, 1]} : vector<8x128xf32> to vector<8x32xf32>
    %243 = vector.extract_strided_slice %210 {offsets = [0, 64], sizes = [8, 32], strides = [1, 1]} : vector<8x128xf32> to vector<8x32xf32>
    %244 = vector.extract_strided_slice %211 {offsets = [0, 64], sizes = [8, 32], strides = [1, 1]} : vector<8x128xf32> to vector<8x32xf32>
    %cst_99 = arith.constant dense<0.000000e+00> : vector<8x8xf32>
    %245 = tpu.matmul %242, %243, %cst_99 {dimension_numbers = #tpu.dot_dimension_numbers<[1], [1], [0], [0], [0, 0, 1, 0], [], []>} : vector<8x32xf32>, vector<8x32xf32>, vector<8x8xf32> -> vector<8x8xf32>
    %cst_100 = arith.constant dense<0xFF800000> : vector<8xf32>
    %246 = vector.multi_reduction <maximumf>, %245, %cst_100 [1] : vector<8x8xf32> to vector<8xf32>
    %247 = vector.shape_cast %246 : vector<8xf32> to vector<8x1xf32>
    %248 = vector.broadcast %247 : vector<8x1xf32> to vector<8x8xf32>
    %249 = arith.subf %245, %248 : vector<8x8xf32>
    %250 = math.exp %249 : vector<8x8xf32>
    %cst_101 = arith.constant dense<0.000000e+00> : vector<8xf32>
    %251 = vector.multi_reduction <add>, %250, %cst_101 [1] : vector<8x8xf32> to vector<8xf32>
    %252 = vector.shape_cast %251 : vector<8xf32> to vector<8x1xf32>
    %253 = tpu.reciprocal %252 {approx = true} : vector<8x1xf32> -> vector<8x1xf32>
    %254 = vector.broadcast %253 : vector<8x1xf32> to vector<8x8xf32>
    %255 = arith.mulf %250, %254 : vector<8x8xf32>
    %cst_102 = arith.constant dense<0.000000e+00> : vector<8x32xf32>
    %256 = tpu.matmul %255, %244, %cst_102 {dimension_numbers = #tpu.dot_dimension_numbers<[1], [0], [0], [1], [0, 0, 1, 1], [], []>} : vector<8x8xf32>, vector<8x32xf32>, vector<8x32xf32> -> vector<8x32xf32>
    %257 = vector.extract_strided_slice %209 {offsets = [0, 96], sizes = [8, 32], strides = [1, 1]} : vector<8x128xf32> to vector<8x32xf32>
    %258 = vector.extract_strided_slice %210 {offsets = [0, 96], sizes = [8, 32], strides = [1, 1]} : vector<8x128xf32> to vector<8x32xf32>
    %259 = vector.extract_strided_slice %211 {offsets = [0, 96], sizes = [8, 32], strides = [1, 1]} : vector<8x128xf32> to vector<8x32xf32>
    %cst_103 = arith.constant dense<0.000000e+00> : vector<8x8xf32>
    %260 = tpu.matmul %257, %258, %cst_103 {dimension_numbers = #tpu.dot_dimension_numbers<[1], [1], [0], [0], [0, 0, 1, 0], [], []>} : vector<8x32xf32>, vector<8x32xf32>, vector<8x8xf32> -> vector<8x8xf32>
    %cst_104 = arith.constant dense<0xFF800000> : vector<8xf32>
    %261 = vector.multi_reduction <maximumf>, %260, %cst_104 [1] : vector<8x8xf32> to vector<8xf32>
    %262 = vector.shape_cast %261 : vector<8xf32> to vector<8x1xf32>
    %263 = vector.broadcast %262 : vector<8x1xf32> to vector<8x8xf32>
    %264 = arith.subf %260, %263 : vector<8x8xf32>
    %265 = math.exp %264 : vector<8x8xf32>
    %cst_105 = arith.constant dense<0.000000e+00> : vector<8xf32>
    %266 = vector.multi_reduction <add>, %265, %cst_105 [1] : vector<8x8xf32> to vector<8xf32>
    %267 = vector.shape_cast %266 : vector<8xf32> to vector<8x1xf32>
    %268 = tpu.reciprocal %267 {approx = true} : vector<8x1xf32> -> vector<8x1xf32>
    %269 = vector.broadcast %268 : vector<8x1xf32> to vector<8x8xf32>
    %270 = arith.mulf %265, %269 : vector<8x8xf32>
    %cst_106 = arith.constant dense<0.000000e+00> : vector<8x32xf32>
    %271 = tpu.matmul %270, %259, %cst_106 {dimension_numbers = #tpu.dot_dimension_numbers<[1], [0], [0], [1], [0, 0, 1, 1], [], []>} : vector<8x8xf32>, vector<8x32xf32>, vector<8x32xf32> -> vector<8x32xf32>
    %272 = tpu.concatenate %226, %241, %256, %271 in 1 : vector<8x32xf32>, vector<8x32xf32>, vector<8x32xf32>, vector<8x32xf32> -> vector<8x128xf32>
    %273 = vector.extract_strided_slice %206 {offsets = [8, 0], sizes = [8, 128], strides = [1, 1]} : vector<16x128xf32> to vector<8x128xf32>
    %274 = vector.extract_strided_slice %207 {offsets = [8, 0], sizes = [8, 128], strides = [1, 1]} : vector<16x128xf32> to vector<8x128xf32>
    %275 = vector.extract_strided_slice %208 {offsets = [8, 0], sizes = [8, 128], strides = [1, 1]} : vector<16x128xf32> to vector<8x128xf32>
    %276 = vector.extract_strided_slice %273 {offsets = [0, 0], sizes = [8, 32], strides = [1, 1]} : vector<8x128xf32> to vector<8x32xf32>
    %277 = vector.extract_strided_slice %274 {offsets = [0, 0], sizes = [8, 32], strides = [1, 1]} : vector<8x128xf32> to vector<8x32xf32>
    %278 = vector.extract_strided_slice %275 {offsets = [0, 0], sizes = [8, 32], strides = [1, 1]} : vector<8x128xf32> to vector<8x32xf32>
    %cst_107 = arith.constant dense<0.000000e+00> : vector<8x8xf32>
    %279 = tpu.matmul %276, %277, %cst_107 {dimension_numbers = #tpu.dot_dimension_numbers<[1], [1], [0], [0], [0, 0, 1, 0], [], []>} : vector<8x32xf32>, vector<8x32xf32>, vector<8x8xf32> -> vector<8x8xf32>
    %cst_108 = arith.constant dense<0xFF800000> : vector<8xf32>
    %280 = vector.multi_reduction <maximumf>, %279, %cst_108 [1] : vector<8x8xf32> to vector<8xf32>
    %281 = vector.shape_cast %280 : vector<8xf32> to vector<8x1xf32>
    %282 = vector.broadcast %281 : vector<8x1xf32> to vector<8x8xf32>
    %283 = arith.subf %279, %282 : vector<8x8xf32>
    %284 = math.exp %283 : vector<8x8xf32>
    %cst_109 = arith.constant dense<0.000000e+00> : vector<8xf32>
    %285 = vector.multi_reduction <add>, %284, %cst_109 [1] : vector<8x8xf32> to vector<8xf32>
    %286 = vector.shape_cast %285 : vector<8xf32> to vector<8x1xf32>
    %287 = tpu.reciprocal %286 {approx = true} : vector<8x1xf32> -> vector<8x1xf32>
    %288 = vector.broadcast %287 : vector<8x1xf32> to vector<8x8xf32>
    %289 = arith.mulf %284, %288 : vector<8x8xf32>
    %cst_110 = arith.constant dense<0.000000e+00> : vector<8x32xf32>
    %290 = tpu.matmul %289, %278, %cst_110 {dimension_numbers = #tpu.dot_dimension_numbers<[1], [0], [0], [1], [0, 0, 1, 1], [], []>} : vector<8x8xf32>, vector<8x32xf32>, vector<8x32xf32> -> vector<8x32xf32>
    %291 = vector.extract_strided_slice %273 {offsets = [0, 32], sizes = [8, 32], strides = [1, 1]} : vector<8x128xf32> to vector<8x32xf32>
    %292 = vector.extract_strided_slice %274 {offsets = [0, 32], sizes = [8, 32], strides = [1, 1]} : vector<8x128xf32> to vector<8x32xf32>
    %293 = vector.extract_strided_slice %275 {offsets = [0, 32], sizes = [8, 32], strides = [1, 1]} : vector<8x128xf32> to vector<8x32xf32>
    %cst_111 = arith.constant dense<0.000000e+00> : vector<8x8xf32>
    %294 = tpu.matmul %291, %292, %cst_111 {dimension_numbers = #tpu.dot_dimension_numbers<[1], [1], [0], [0], [0, 0, 1, 0], [], []>} : vector<8x32xf32>, vector<8x32xf32>, vector<8x8xf32> -> vector<8x8xf32>
    %cst_112 = arith.constant dense<0xFF800000> : vector<8xf32>
    %295 = vector.multi_reduction <maximumf>, %294, %cst_112 [1] : vector<8x8xf32> to vector<8xf32>
    %296 = vector.shape_cast %295 : vector<8xf32> to vector<8x1xf32>
    %297 = vector.broadcast %296 : vector<8x1xf32> to vector<8x8xf32>
    %298 = arith.subf %294, %297 : vector<8x8xf32>
    %299 = math.exp %298 : vector<8x8xf32>
    %cst_113 = arith.constant dense<0.000000e+00> : vector<8xf32>
    %300 = vector.multi_reduction <add>, %299, %cst_113 [1] : vector<8x8xf32> to vector<8xf32>
    %301 = vector.shape_cast %300 : vector<8xf32> to vector<8x1xf32>
    %302 = tpu.reciprocal %301 {approx = true} : vector<8x1xf32> -> vector<8x1xf32>
    %303 = vector.broadcast %302 : vector<8x1xf32> to vector<8x8xf32>
    %304 = arith.mulf %299, %303 : vector<8x8xf32>
    %cst_114 = arith.constant dense<0.000000e+00> : vector<8x32xf32>
    %305 = tpu.matmul %304, %293, %cst_114 {dimension_numbers = #tpu.dot_dimension_numbers<[1], [0], [0], [1], [0, 0, 1, 1], [], []>} : vector<8x8xf32>, vector<8x32xf32>, vector<8x32xf32> -> vector<8x32xf32>
    %306 = vector.extract_strided_slice %273 {offsets = [0, 64], sizes = [8, 32], strides = [1, 1]} : vector<8x128xf32> to vector<8x32xf32>
    %307 = vector.extract_strided_slice %274 {offsets = [0, 64], sizes = [8, 32], strides = [1, 1]} : vector<8x128xf32> to vector<8x32xf32>
    %308 = vector.extract_strided_slice %275 {offsets = [0, 64], sizes = [8, 32], strides = [1, 1]} : vector<8x128xf32> to vector<8x32xf32>
    %cst_115 = arith.constant dense<0.000000e+00> : vector<8x8xf32>
    %309 = tpu.matmul %306, %307, %cst_115 {dimension_numbers = #tpu.dot_dimension_numbers<[1], [1], [0], [0], [0, 0, 1, 0], [], []>} : vector<8x32xf32>, vector<8x32xf32>, vector<8x8xf32> -> vector<8x8xf32>
    %cst_116 = arith.constant dense<0xFF800000> : vector<8xf32>
    %310 = vector.multi_reduction <maximumf>, %309, %cst_116 [1] : vector<8x8xf32> to vector<8xf32>
    %311 = vector.shape_cast %310 : vector<8xf32> to vector<8x1xf32>
    %312 = vector.broadcast %311 : vector<8x1xf32> to vector<8x8xf32>
    %313 = arith.subf %309, %312 : vector<8x8xf32>
    %314 = math.exp %313 : vector<8x8xf32>
    %cst_117 = arith.constant dense<0.000000e+00> : vector<8xf32>
    %315 = vector.multi_reduction <add>, %314, %cst_117 [1] : vector<8x8xf32> to vector<8xf32>
    %316 = vector.shape_cast %315 : vector<8xf32> to vector<8x1xf32>
    %317 = tpu.reciprocal %316 {approx = true} : vector<8x1xf32> -> vector<8x1xf32>
    %318 = vector.broadcast %317 : vector<8x1xf32> to vector<8x8xf32>
    %319 = arith.mulf %314, %318 : vector<8x8xf32>
    %cst_118 = arith.constant dense<0.000000e+00> : vector<8x32xf32>
    %320 = tpu.matmul %319, %308, %cst_118 {dimension_numbers = #tpu.dot_dimension_numbers<[1], [0], [0], [1], [0, 0, 1, 1], [], []>} : vector<8x8xf32>, vector<8x32xf32>, vector<8x32xf32> -> vector<8x32xf32>
    %321 = vector.extract_strided_slice %273 {offsets = [0, 96], sizes = [8, 32], strides = [1, 1]} : vector<8x128xf32> to vector<8x32xf32>
    %322 = vector.extract_strided_slice %274 {offsets = [0, 96], sizes = [8, 32], strides = [1, 1]} : vector<8x128xf32> to vector<8x32xf32>
    %323 = vector.extract_strided_slice %275 {offsets = [0, 96], sizes = [8, 32], strides = [1, 1]} : vector<8x128xf32> to vector<8x32xf32>
    %cst_119 = arith.constant dense<0.000000e+00> : vector<8x8xf32>
    %324 = tpu.matmul %321, %322, %cst_119 {dimension_numbers = #tpu.dot_dimension_numbers<[1], [1], [0], [0], [0, 0, 1, 0], [], []>} : vector<8x32xf32>, vector<8x32xf32>, vector<8x8xf32> -> vector<8x8xf32>
    %cst_120 = arith.constant dense<0xFF800000> : vector<8xf32>
    %325 = vector.multi_reduction <maximumf>, %324, %cst_120 [1] : vector<8x8xf32> to vector<8xf32>
    %326 = vector.shape_cast %325 : vector<8xf32> to vector<8x1xf32>
    %327 = vector.broadcast %326 : vector<8x1xf32> to vector<8x8xf32>
    %328 = arith.subf %324, %327 : vector<8x8xf32>
    %329 = math.exp %328 : vector<8x8xf32>
    %cst_121 = arith.constant dense<0.000000e+00> : vector<8xf32>
    %330 = vector.multi_reduction <add>, %329, %cst_121 [1] : vector<8x8xf32> to vector<8xf32>
    %331 = vector.shape_cast %330 : vector<8xf32> to vector<8x1xf32>
    %332 = tpu.reciprocal %331 {approx = true} : vector<8x1xf32> -> vector<8x1xf32>
    %333 = vector.broadcast %332 : vector<8x1xf32> to vector<8x8xf32>
    %334 = arith.mulf %329, %333 : vector<8x8xf32>
    %cst_122 = arith.constant dense<0.000000e+00> : vector<8x32xf32>
    %335 = tpu.matmul %334, %323, %cst_122 {dimension_numbers = #tpu.dot_dimension_numbers<[1], [0], [0], [1], [0, 0, 1, 1], [], []>} : vector<8x8xf32>, vector<8x32xf32>, vector<8x32xf32> -> vector<8x32xf32>
    %336 = tpu.concatenate %290, %305, %320, %335 in 1 : vector<8x32xf32>, vector<8x32xf32>, vector<8x32xf32>, vector<8x32xf32> -> vector<8x128xf32>
    %337 = tpu.concatenate %272, %336 in 0 : vector<8x128xf32>, vector<8x128xf32> -> vector<16x128xf32>
    %cst_123 = arith.constant dense<0.000000e+00> : vector<16x128xf32>
    %338 = tpu.matmul %337, %203, %cst_123 {dimension_numbers = #tpu.dot_dimension_numbers<[1], [0], [0], [1], [0, 0, 1, 1], [], []>} : vector<16x128xf32>, vector<128x128xf32>, vector<16x128xf32> -> vector<16x128xf32>
    %339 = vector.broadcast %205 : vector<1x128xf32> to vector<16x128xf32>
    %340 = arith.addf %338, %339 : vector<16x128xf32>
    %341 = arith.addf %194, %340 : vector<16x128xf32>
    %c0_124 = arith.constant 0 : index
    %c0_125 = arith.constant 0 : index
    %c0_126 = arith.constant 0 : index
    %342 = vector.load %arg20[%c0_124, %c0_125, %c0_126] : memref<1x1x128xf32, #tpu.memory_space<vmem>>, vector<1x1x128xf32>
    %343 = vector.shape_cast %342 : vector<1x1x128xf32> to vector<1x128xf32>
    %c0_127 = arith.constant 0 : index
    %c0_128 = arith.constant 0 : index
    %c0_129 = arith.constant 0 : index
    %344 = vector.load %arg21[%c0_127, %c0_128, %c0_129] : memref<1x1x128xf32, #tpu.memory_space<vmem>>, vector<1x1x128xf32>
    %345 = vector.shape_cast %344 : vector<1x1x128xf32> to vector<1x128xf32>
    %cst_130 = arith.constant dense<0.000000e+00> : vector<16xf32>
    %346 = vector.multi_reduction <add>, %341, %cst_130 [1] : vector<16x128xf32> to vector<16xf32>
    %347 = vector.shape_cast %346 : vector<16xf32> to vector<16x1xf32>
    %cst_131 = arith.constant 1.280000e+02 : f32
    %348 = vector.broadcast %cst_131 : f32 to vector<16x1xf32>
    %349 = arith.divf %347, %348 : vector<16x1xf32>
    %350 = vector.broadcast %349 : vector<16x1xf32> to vector<16x128xf32>
    %351 = arith.subf %341, %350 : vector<16x128xf32>
    %352 = arith.mulf %351, %351 : vector<16x128xf32>
    %cst_132 = arith.constant dense<0.000000e+00> : vector<16xf32>
    %353 = vector.multi_reduction <add>, %352, %cst_132 [1] : vector<16x128xf32> to vector<16xf32>
    %354 = vector.shape_cast %353 : vector<16xf32> to vector<16x1xf32>
    %cst_133 = arith.constant 1.280000e+02 : f32
    %355 = vector.broadcast %cst_133 : f32 to vector<16x1xf32>
    %356 = arith.divf %354, %355 : vector<16x1xf32>
    %357 = vector.broadcast %349 : vector<16x1xf32> to vector<16x128xf32>
    %358 = arith.subf %341, %357 : vector<16x128xf32>
    %cst_134 = arith.constant 9.99999974E-6 : f32
    %359 = vector.broadcast %cst_134 : f32 to vector<16x1xf32>
    %360 = arith.addf %356, %359 : vector<16x1xf32>
    %361 = math.rsqrt %360 : vector<16x1xf32>
    %362 = vector.broadcast %361 : vector<16x1xf32> to vector<16x128xf32>
    %363 = arith.mulf %358, %362 : vector<16x128xf32>
    %364 = vector.broadcast %343 : vector<1x128xf32> to vector<16x128xf32>
    %365 = arith.mulf %363, %364 : vector<16x128xf32>
    %366 = vector.broadcast %345 : vector<1x128xf32> to vector<16x128xf32>
    %367 = arith.addf %365, %366 : vector<16x128xf32>
    %c0_135 = arith.constant 0 : index
    %c0_136 = arith.constant 0 : index
    %c0_137 = arith.constant 0 : index
    %368 = vector.load %arg14[%c0_135, %c0_136, %c0_137] : memref<1x128x512xf32, #tpu.memory_space<vmem>>, vector<1x128x512xf32>
    %369 = vector.shape_cast %368 : vector<1x128x512xf32> to vector<128x512xf32>
    %cst_138 = arith.constant dense<0.000000e+00> : vector<16x512xf32>
    %370 = tpu.matmul %367, %369, %cst_138 {dimension_numbers = #tpu.dot_dimension_numbers<[1], [0], [0], [1], [0, 0, 1, 1], [], []>} : vector<16x128xf32>, vector<128x512xf32>, vector<16x512xf32> -> vector<16x512xf32>
    %c0_139 = arith.constant 0 : index
    %c0_140 = arith.constant 0 : index
    %c0_141 = arith.constant 0 : index
    %371 = vector.load %arg15[%c0_139, %c0_140, %c0_141] : memref<1x1x512xf32, #tpu.memory_space<vmem>>, vector<1x1x512xf32>
    %372 = vector.shape_cast %371 : vector<1x1x512xf32> to vector<1x512xf32>
    %373 = vector.broadcast %372 : vector<1x512xf32> to vector<16x512xf32>
    %374 = arith.addf %370, %373 : vector<16x512xf32>
    %375 = arith.mulf %374, %374 : vector<16x512xf32>
    %376 = arith.mulf %374, %375 : vector<16x512xf32>
    %cst_142 = arith.constant 4.471500e-02 : f32
    %377 = vector.broadcast %cst_142 : f32 to vector<16x512xf32>
    %378 = arith.mulf %377, %376 : vector<16x512xf32>
    %379 = arith.addf %374, %378 : vector<16x512xf32>
    %cst_143 = arith.constant 0.797884583 : f32
    %380 = vector.broadcast %cst_143 : f32 to vector<16x512xf32>
    %381 = arith.mulf %380, %379 : vector<16x512xf32>
    %382 = math.tanh %381 : vector<16x512xf32>
    %cst_144 = arith.constant 1.000000e+00 : f32
    %383 = vector.broadcast %cst_144 : f32 to vector<16x512xf32>
    %384 = arith.addf %383, %382 : vector<16x512xf32>
    %cst_145 = arith.constant 5.000000e-01 : f32
    %385 = vector.broadcast %cst_145 : f32 to vector<16x512xf32>
    %386 = arith.mulf %385, %384 : vector<16x512xf32>
    %387 = arith.mulf %374, %386 : vector<16x512xf32>
    %c0_146 = arith.constant 0 : index
    %c0_147 = arith.constant 0 : index
    %c0_148 = arith.constant 0 : index
    %388 = vector.load %arg16[%c0_146, %c0_147, %c0_148] : memref<1x512x128xf32, #tpu.memory_space<vmem>>, vector<1x512x128xf32>
    %389 = vector.shape_cast %388 : vector<1x512x128xf32> to vector<512x128xf32>
    %cst_149 = arith.constant dense<0.000000e+00> : vector<16x128xf32>
    %390 = tpu.matmul %387, %389, %cst_149 {dimension_numbers = #tpu.dot_dimension_numbers<[1], [0], [0], [1], [0, 0, 1, 1], [], []>} : vector<16x512xf32>, vector<512x128xf32>, vector<16x128xf32> -> vector<16x128xf32>
    %c0_150 = arith.constant 0 : index
    %c0_151 = arith.constant 0 : index
    %c0_152 = arith.constant 0 : index
    %391 = vector.load %arg17[%c0_150, %c0_151, %c0_152] : memref<1x1x128xf32, #tpu.memory_space<vmem>>, vector<1x1x128xf32>
    %392 = vector.shape_cast %391 : vector<1x1x128xf32> to vector<1x128xf32>
    %393 = vector.broadcast %392 : vector<1x128xf32> to vector<16x128xf32>
    %394 = arith.addf %390, %393 : vector<16x128xf32>
    %395 = arith.addf %367, %394 : vector<16x128xf32>
    %c0_153 = arith.constant 0 : index
    %c0_154 = arith.constant 0 : index
    %c0_155 = arith.constant 0 : index
    %396 = vector.load %arg22[%c0_153, %c0_154, %c0_155] : memref<1x1x128xf32, #tpu.memory_space<vmem>>, vector<1x1x128xf32>
    %397 = vector.shape_cast %396 : vector<1x1x128xf32> to vector<1x128xf32>
    %c0_156 = arith.constant 0 : index
    %c0_157 = arith.constant 0 : index
    %c0_158 = arith.constant 0 : index
    %398 = vector.load %arg23[%c0_156, %c0_157, %c0_158] : memref<1x1x128xf32, #tpu.memory_space<vmem>>, vector<1x1x128xf32>
    %399 = vector.shape_cast %398 : vector<1x1x128xf32> to vector<1x128xf32>
    %cst_159 = arith.constant dense<0.000000e+00> : vector<16xf32>
    %400 = vector.multi_reduction <add>, %395, %cst_159 [1] : vector<16x128xf32> to vector<16xf32>
    %401 = vector.shape_cast %400 : vector<16xf32> to vector<16x1xf32>
    %cst_160 = arith.constant 1.280000e+02 : f32
    %402 = vector.broadcast %cst_160 : f32 to vector<16x1xf32>
    %403 = arith.divf %401, %402 : vector<16x1xf32>
    %404 = vector.broadcast %403 : vector<16x1xf32> to vector<16x128xf32>
    %405 = arith.subf %395, %404 : vector<16x128xf32>
    %406 = arith.mulf %405, %405 : vector<16x128xf32>
    %cst_161 = arith.constant dense<0.000000e+00> : vector<16xf32>
    %407 = vector.multi_reduction <add>, %406, %cst_161 [1] : vector<16x128xf32> to vector<16xf32>
    %408 = vector.shape_cast %407 : vector<16xf32> to vector<16x1xf32>
    %cst_162 = arith.constant 1.280000e+02 : f32
    %409 = vector.broadcast %cst_162 : f32 to vector<16x1xf32>
    %410 = arith.divf %408, %409 : vector<16x1xf32>
    %411 = vector.broadcast %403 : vector<16x1xf32> to vector<16x128xf32>
    %412 = arith.subf %395, %411 : vector<16x128xf32>
    %cst_163 = arith.constant 9.99999974E-6 : f32
    %413 = vector.broadcast %cst_163 : f32 to vector<16x1xf32>
    %414 = arith.addf %410, %413 : vector<16x1xf32>
    %415 = math.rsqrt %414 : vector<16x1xf32>
    %416 = vector.broadcast %415 : vector<16x1xf32> to vector<16x128xf32>
    %417 = arith.mulf %412, %416 : vector<16x128xf32>
    %418 = vector.broadcast %397 : vector<1x128xf32> to vector<16x128xf32>
    %419 = arith.mulf %417, %418 : vector<16x128xf32>
    %420 = vector.broadcast %399 : vector<1x128xf32> to vector<16x128xf32>
    %421 = arith.addf %419, %420 : vector<16x128xf32>
    %c0_164 = arith.constant 0 : index
    %c0_165 = arith.constant 0 : index
    %422 = vector.load %arg24[%c0_164, %c0_165] : memref<16x128xf32, #tpu.memory_space<vmem>>, vector<16x128xf32>
    tpu.vector_store %arg24[%c0_164, %c0_165], %421 {strides = array<i32>} : memref<16x128xf32, #tpu.memory_space<vmem>>, vector<16x128xf32>,
    return
  }
  func.func @transform_0(%arg0: i32, %arg1: i32) -> (i32, i32) {
    %c0_i32 = arith.constant 0 : i32
    %c0_i32_0 = arith.constant 0 : i32
    return %arg0, %c0_i32 : i32, i32
  }
  func.func @transform_1(%arg0: i32, %arg1: i32) -> (i32, i32) {
    %c0_i32 = arith.constant 0 : i32
    %c0_i32_0 = arith.constant 0 : i32
    return %arg0, %c0_i32 : i32, i32
  }
  func.func @transform_2(%arg0: i32, %arg1: i32) -> (i32, i32, i32) {
    %c0_i32 = arith.constant 0 : i32
    %c0_i32_0 = arith.constant 0 : i32
    %c0_i32_1 = arith.constant 0 : i32
    return %arg1, %c0_i32, %c0_i32_0 : i32, i32, i32
  }
  func.func @transform_3(%arg0: i32, %arg1: i32) -> (i32, i32, i32) {
    %c0_i32 = arith.constant 0 : i32
    %c0_i32_0 = arith.constant 0 : i32
    %c0_i32_1 = arith.constant 0 : i32
    return %arg1, %c0_i32, %c0_i32_0 : i32, i32, i32
  }
  func.func @transform_4(%arg0: i32, %arg1: i32) -> (i32, i32, i32) {
    %c0_i32 = arith.constant 0 : i32
    %c0_i32_0 = arith.constant 0 : i32
    %c0_i32_1 = arith.constant 0 : i32
    return %arg1, %c0_i32, %c0_i32_0 : i32, i32, i32
  }
  func.func @transform_5(%arg0: i32, %arg1: i32) -> (i32, i32, i32) {
    %c0_i32 = arith.constant 0 : i32
    %c0_i32_0 = arith.constant 0 : i32
    %c0_i32_1 = arith.constant 0 : i32
    return %arg1, %c0_i32, %c0_i32_0 : i32, i32, i32
  }
  func.func @transform_6(%arg0: i32, %arg1: i32) -> (i32, i32, i32) {
    %c0_i32 = arith.constant 0 : i32
    %c0_i32_0 = arith.constant 0 : i32
    %c0_i32_1 = arith.constant 0 : i32
    return %arg1, %c0_i32, %c0_i32_0 : i32, i32, i32
  }
  func.func @transform_7(%arg0: i32, %arg1: i32) -> (i32, i32, i32) {
    %c0_i32 = arith.constant 0 : i32
    %c0_i32_0 = arith.constant 0 : i32
    %c0_i32_1 = arith.constant 0 : i32
    return %arg1, %c0_i32, %c0_i32_0 : i32, i32, i32
  }
  func.func @transform_8(%arg0: i32, %arg1: i32) -> (i32, i32, i32) {
    %c0_i32 = arith.constant 0 : i32
    %c0_i32_0 = arith.constant 0 : i32
    %c0_i32_1 = arith.constant 0 : i32
    return %arg1, %c0_i32, %c0_i32_0 : i32, i32, i32
  }
  func.func @transform_9(%arg0: i32, %arg1: i32) -> (i32, i32, i32) {
    %c0_i32 = arith.constant 0 : i32
    %c0_i32_0 = arith.constant 0 : i32
    %c0_i32_1 = arith.constant 0 : i32
    return %arg1, %c0_i32, %c0_i32_0 : i32, i32, i32
  }
  func.func @transform_10(%arg0: i32, %arg1: i32) -> (i32, i32, i32) {
    %c0_i32 = arith.constant 0 : i32
    %c0_i32_0 = arith.constant 0 : i32
    %c0_i32_1 = arith.constant 0 : i32
    return %arg1, %c0_i32, %c0_i32_0 : i32, i32, i32
  }
  func.func @transform_11(%arg0: i32, %arg1: i32) -> (i32, i32, i32) {
    %c0_i32 = arith.constant 0 : i32
    %c0_i32_0 = arith.constant 0 : i32
    %c0_i32_1 = arith.constant 0 : i32
    return %arg1, %c0_i32, %c0_i32_0 : i32, i32, i32
  }
  func.func @transform_12(%arg0: i32, %arg1: i32) -> (i32, i32, i32) {
    %c0_i32 = arith.constant 0 : i32
    %c0_i32_0 = arith.constant 0 : i32
    %c0_i32_1 = arith.constant 0 : i32
    return %arg1, %c0_i32, %c0_i32_0 : i32, i32, i32
  }
  func.func @transform_13(%arg0: i32, %arg1: i32) -> (i32, i32, i32) {
    %c0_i32 = arith.constant 0 : i32
    %c0_i32_0 = arith.constant 0 : i32
    %c0_i32_1 = arith.constant 0 : i32
    return %arg1, %c0_i32, %c0_i32_0 : i32, i32, i32
  }
  func.func @transform_14(%arg0: i32, %arg1: i32) -> (i32, i32, i32) {
    %c0_i32 = arith.constant 0 : i32
    %c0_i32_0 = arith.constant 0 : i32
    %c0_i32_1 = arith.constant 0 : i32
    return %arg1, %c0_i32, %c0_i32_0 : i32, i32, i32
  }
  func.func @transform_15(%arg0: i32, %arg1: i32) -> (i32, i32, i32) {
    %c0_i32 = arith.constant 0 : i32
    %c0_i32_0 = arith.constant 0 : i32
    %c0_i32_1 = arith.constant 0 : i32
    return %arg1, %c0_i32, %c0_i32_0 : i32, i32, i32
  }
  func.func @transform_16(%arg0: i32, %arg1: i32) -> (i32, i32, i32) {
    %c0_i32 = arith.constant 0 : i32
    %c0_i32_0 = arith.constant 0 : i32
    %c0_i32_1 = arith.constant 0 : i32
    return %arg1, %c0_i32, %c0_i32_0 : i32, i32, i32
  }
  func.func @transform_17(%arg0: i32, %arg1: i32) -> (i32, i32, i32) {
    %c0_i32 = arith.constant 0 : i32
    %c0_i32_0 = arith.constant 0 : i32
    %c0_i32_1 = arith.constant 0 : i32
    return %arg1, %c0_i32, %c0_i32_0 : i32, i32, i32
  }
  func.func @transform_18(%arg0: i32, %arg1: i32) -> (i32, i32, i32) {
    %c0_i32 = arith.constant 0 : i32
    %c0_i32_0 = arith.constant 0 : i32
    %c0_i32_1 = arith.constant 0 : i32
    return %arg1, %c0_i32, %c0_i32_0 : i32, i32, i32
  }
  func.func @transform_19(%arg0: i32, %arg1: i32) -> (i32, i32, i32) {
    %c0_i32 = arith.constant 0 : i32
    %c0_i32_0 = arith.constant 0 : i32
    %c0_i32_1 = arith.constant 0 : i32
    return %arg1, %c0_i32, %c0_i32_0 : i32, i32, i32
  }
  func.func @transform_20(%arg0: i32, %arg1: i32) -> (i32, i32, i32) {
    %c0_i32 = arith.constant 0 : i32
    %c0_i32_0 = arith.constant 0 : i32
    %c0_i32_1 = arith.constant 0 : i32
    return %arg1, %c0_i32, %c0_i32_0 : i32, i32, i32
  }
  func.func @transform_21(%arg0: i32, %arg1: i32) -> (i32, i32, i32) {
    %c0_i32 = arith.constant 0 : i32
    %c0_i32_0 = arith.constant 0 : i32
    %c0_i32_1 = arith.constant 0 : i32
    return %arg1, %c0_i32, %c0_i32_0 : i32, i32, i32
  }
  func.func @transform_22(%arg0: i32, %arg1: i32) -> (i32, i32) {
    %c0_i32 = arith.constant 0 : i32
    %c0_i32_0 = arith.constant 0 : i32
    return %arg0, %c0_i32 : i32, i32
  }
}

</mosaic_0001>

<bundles_post_ra>
// kernel: tpu_custom_call.1
= control target key start
LH: loop header
LB: loop body
LE: loop exit
PB: predicated region body
PF: predicated region fallthrough
CT: control target
= control target key end

     0   :  { %s9592_s0 = inlined_call_operand.hbm [shape: f32[32,128], index: 0, kind: input, shape index: {}]   ;;  %s9593_s1 = inlined_call_operand.hbm [shape: f32[32,128], index: 1, kind: input, shape index: {}]   ;;  %s9594_s2 = inlined_call_operand.hbm [shape: f32[2,128,128], index: 2, kind: input, shape index: {}]   ;;  %s9595_s3 = inlined_call_operand.hbm [shape: f32[2,128,128], index: 3, kind: input, shape index: {}]   ;;  %s9596_s4 = inlined_call_operand.hbm [shape: f32[2,128,128], index: 4, kind: input, shape index: {}]   ;;  %s9597_s5 = inlined_call_operand.hbm [shape: f32[2,128,128], index: 5, kind: input, shape index: {}]   ;;  %s9598_s6 = inlined_call_operand.vmem [shape: f32[2,1,128], index: 6, kind: input, shape index: {}]   ;;  %s9599_s7 = inlined_call_operand.hbm [shape: f32[2,128,128], index: 7, kind: input, shape index: {}]   ;;  %s9600_s8 = inlined_call_operand.hbm [shape: f32[2,128,128], index: 8, kind: input, shape index: {}]   ;;  %s9601_s9 = inlined_call_operand.hbm [shape: f32[2,128,128], index: 9, kind: input, shape index: {}]   ;;  %s9602_s10 = inlined_call_operand.hbm [shape: f32[2,128,128], index: 10, kind: input, shape index: {}]   ;;  %s9603_s11 = inlined_call_operand.vmem [shape: f32[2,1,128], index: 11, kind: input, shape index: {}]   ;;  %s9604_s12 = inlined_call_operand.hbm [shape: f32[2,128,512], index: 12, kind: input, shape index: {}]   ;;  %s9605_s13 = inlined_call_operand.vmem [shape: f32[2,1,512], index: 13, kind: input, shape index: {}]   ;;  %s9606_s14 = inlined_call_operand.hbm [shape: f32[2,512,128], index: 14, kind: input, shape index: {}]   ;;  %s9607_s15 = inlined_call_operand.vmem [shape: f32[2,1,128], index: 15, kind: input, shape index: {}]   ;;  %s9608_s16 = inlined_call_operand.vmem [shape: f32[2,1,128], index: 16, kind: input, shape index: {}]   ;;  %s9609_s17 = inlined_call_operand.vmem [shape: f32[2,1,128], index: 17, kind: input, shape index: {}]   ;;  %s9610_s18 = inlined_call_operand.vmem [shape: f32[2,1,128], index: 18, kind: input, shape index: {}]   ;;  %s9611_s19 = inlined_call_operand.vmem [shape: f32[2,1,128], index: 19, kind: input, shape index: {}]   ;;  %s9612_s20 = inlined_call_operand.vmem [shape: f32[2,1,128], index: 20, kind: input, shape index: {}]   ;;  %s9613_s21 = inlined_call_operand.vmem [shape: f32[2,1,128], index: 21, kind: input, shape index: {}]   ;;  %s9614_s22 = inlined_call_operand.hbm [shape: f32[32,128], index: 22, kind: output, shape index: {}]  }
   0x1   :  { %9674 = sst [smem:[#allocation58_spill]] %s9592_s0 }
   0x2   :  { %9675 = sst [smem:[#allocation59_spill]] %s9593_s1 }
   0x3   :  { %9676 = sst [smem:[#allocation60_spill]] %s9594_s2 }
   0x4   :  { %9677 = sst [smem:[#allocation61_spill]] %s9595_s3 }
   0x5   :  { %9678 = sst [smem:[#allocation62_spill]] %s9596_s4 }
   0x6   :  { %9679 = sst [smem:[#allocation63_spill]] %s9597_s5 }
   0x7   :  { %9680 = sst [smem:[#allocation64_spill]] %s9598_s6 }
   0x8   :  { %9681 = sst [smem:[#allocation65_spill]] %s9599_s7 }
   0x9   :  { %9682 = sst [smem:[#allocation66_spill]] %s9600_s8 }
   0xa   :  { %9683 = sst [smem:[#allocation67_spill]] %s9601_s9 }
   0xb   :  { %9684 = sst [smem:[#allocation68_spill]] %s9602_s10 }
   0xc   :  { %9685 = sst [smem:[#allocation69_spill]] %s9603_s11 }
   0xd   :  { %9686 = sst [smem:[#allocation70_spill]] %s9604_s12 }
   0xe   :  { %9687 = sst [smem:[#allocation71_spill]] %s9605_s13 }
   0xf   :  { %9688 = sst [smem:[#allocation72_spill]] %s9606_s14 }
  0x10   :  { %9689 = sst [smem:[#allocation73_spill]] %s9607_s15 }
  0x11   :  { %9690 = sst [smem:[#allocation74_spill]] %s9608_s16 }
  0x12   :  { %9691 = sst [smem:[#allocation75_spill]] %s9609_s17 }
  0x13   :  { %9692 = sst [smem:[#allocation76_spill]] %s9610_s18 }
  0x14   :  { %9693 = sst [smem:[#allocation77_spill]] %s9611_s19 }
  0x15   :  { %9694 = sst [smem:[#allocation78_spill]] %s9612_s20 }
  0x16   :  { %9695 = sst [smem:[#allocation79_spill]] %s9613_s21 }
  0x17   :  { %9696 = sst [smem:[#allocation80_spill]] %s9614_s22 }
  0x18   :  { %27 = vsyncpa [#allocation3], 0 }
  0x19   :  { %29 = vsyncpa [#allocation3 + $0x1], 0 }
  0x1a   :  { %30 = vsyncpa [#allocation6], 0 }
  0x1b   :  { %32 = vsyncpa [#allocation6 + $0x1], 0 }
  0x1c   :  { %33 = vsyncpa [#allocation9], 0 }
  0x1d   :  { %35 = vsyncpa [#allocation9 + $0x1], 0 }
  0x1e   :  { %36 = vsyncpa [#allocation12], 0 }
  0x1f   :  { %38 = vsyncpa [#allocation12 + $0x1], 0 }
  0x20   :  { %39 = vsyncpa [#allocation15], 0 }
  0x21   :  { %41 = vsyncpa [#allocation15 + $0x1], 0 }
  0x22   :  { %42 = vsyncpa [#allocation18], 0 }
  0x23   :  { %44 = vsyncpa [#allocation18 + $0x1], 0 }
  0x24   :  { %45 = vsyncpa [#allocation21], 0 }
  0x25   :  { %47 = vsyncpa [#allocation21 + $0x1], 0 }
  0x26   :  { %48 = vsyncpa [#allocation4], 0 }
  0x27   :  { %50 = vsyncpa [#allocation4 + $0x1], 0  ;;  %s8011_s3 = smov 0   ;;  %s8013_s28 = smov 0  }
  0x28   :  { %s8015_s29 = smov 0   ;;  %s8017_s30 = smov 0  }
  0x29   :  { %s8019_s4 = smov 0   ;;  %s8021_s0 = smov 0  }
  0x2a   :  { %s8023_s23 = smov 0   ;;  %s8025_s1 = smov 0  }
  0x2b   :  { %s8027_s5 = smov 0   ;;  %s8029_s24 = smov 0  }
  0x2c   :  { %s8031_s6 = smov 0  }
  0x2d LB: > { %9697 = sst [smem:[#allocation32_spill]] %s7834_s28  ;;  %s8067_s25 = sadd.s32 4294967295, %s7870_s6   ;;  %s7870_s6 = sphi %s8031_s6, %s56_s6   ;;  %s7866_s24 = sphi %s8029_s24, %s9822_s24   ;;  %s7862_s5 = sphi %s8027_s5, %s9821_s5   ;;  %s7858_s1 = sphi %s8025_s1, %s9820_s1   ;;  %s7854_s23 = sphi %s8023_s23, %s9819_s23   ;;  %s7850_s0 = sphi %s8021_s0, %s9818_s0   ;;  %s7846_s4 = sphi %s8019_s4, %s9817_s4   ;;  %s7842_s30 = sphi %s8017_s30, %s9816_s30   ;;  %s7838_s29 = sphi %s8015_s29, %s9815_s29   ;;  %s7834_s28 = sphi %s8013_s28, %s9814_s28   ;;  %s7830_s3 = sphi %s8011_s3, %s9813_s3  }
  0x2e   : > { %9698 = sst [smem:[#allocation33_spill]] %s7838_s29  ;;  %s5832_s26 = sadd.s32 4294967294, %s7870_s6  }
  0x2f   : > { %9699 = sst [smem:[#allocation34_spill]] %s7842_s30  ;;  %s65_s2 = sadd.s32 1, %s7862_s5 }
  0x30   : > { %9700 = sst [smem:[#allocation35_spill]] %s7846_s4  ;;  %s68_s27 = sadd.s32 1, %s7866_s24 }
  0x31   : > { %9701 = sst [smem:[#allocation36_spill]] %s7850_s0  ;;  %p66_p0 = scmp.ge.s32.totalorder %s65_s2, 2 }
  0x32   : > { %9702 = sst [smem:[#allocation37_spill]] %s7854_s23  ;;  %s75_s22 = sadd.s32 1, %s7850_s0 }
  0x33   : > { %9703 = sst [smem:[#allocation38_spill]] %s7858_s1  ;;  %p82_p1 = scmp.ne.s32.totalorder %s7850_s0, %s7846_s4 }
  0x34   : > { %9704 = sst [smem:[#allocation39_spill]] %s7862_s5  ;;  %p83_p2 = scmp.eq.s32.totalorder %s7870_s6, 0 }
  0x35   : > { %9705 = sst [smem:[#allocation40_spill]] %s7866_s24  ;;  %s9824_s2 = smov (%p66_p0, %s65_s2), 0 }
  0x36   : > { %9706 = sst [smem:[#allocation41_spill]] %s7870_s6  ;;  %s9826_s27 = smov (!%p66_p0, %s68_s27), %s7866_s24 }
  0x37   : > { %9707 = sst [smem:[#allocation42_spill]] %s8067_s25  ;;  %p8084_p3 = por %p83_p2, %p82_p1 }
  0x38   : > { %9708 = sst [smem:[#allocation43_spill]] %s9824_s2  ;;  %p9623_p4 = scmp.ne.s32.totalorder %s7846_s4, %s7842_s30 }
  0x39   : > { %p70_p5 = scmp.ge.s32.totalorder %s9826_s27, 2  ;;  %p89_p6 = scmp.eq.s32.totalorder %s8067_s25, 0 }
  0x3a   : > { %s124_s21 = ssub.s32 %s7862_s5, %s9824_s2  ;;  %s127_s20 = sadd.s32 1, %s7838_s29 }
  0x3b   : > { %s9828_s27 = smov (%p70_p5, %s9826_s27), 0  ;;  %p8101_p7 = por %p89_p6, %p9623_p4 }
  0x3c   : > { %9710 = sst [smem:[#allocation44_spill]] %s9828_s27  ;;  %p125_p8 = scmp.eq.s32.totalorder %s124_s21, 0 }
  0x3d   : > { %s9711_s19 = scalar_select %p8101_p7, 1, 0 }
  0x3e   : > { %s72_s18 = ssub.s32 %s7866_s24, %s9828_s27  ;;  %p134_p9 = scmp.ne.s32.totalorder %s7838_s29, %s7834_s28 }
  0x3f   : > { %9712 = sst [smem:[#allocation45_spill]] %s9711_s19  ;;  %p73_p10 = scmp.eq.s32.totalorder %s72_s18, 0 }
  0x40   : > { %p140_p11 = scmp.ne.s32.totalorder %s7834_s28, %s7830_s3  ;;  %p8119_p12 = por %p134_p9, %p83_p2 }
  0x41   : > { %s8112_s2 = scalar_select %p125_p8, %s7838_s29, %s127_s20  }
  0x42   : > { %s8115_s17 = scalar_select %p73_p10, %s7850_s0, %s75_s22  }
  0x43   : > { %9713 = sst [smem:[#allocation46_spill]] %s8112_s2  ;;  %p8125_p13 = por %p140_p11, %p89_p6 }
  0x44   : > { %9714 = sst [smem:[#allocation47_spill]] %s8115_s17  ;;  %p658_p0 = scmp.eq.s32.totalorder %s8067_s25, 3 }
  0x45   : > { %s9716_s21 = scalar_select %p8125_p13, 1, 0 }
  0x46   : > { %p664_p5 = scmp.eq.s32.totalorder %s5832_s26, 3  ;;  %p7137_p4 = scmp.lt.s32.totalorder %s7870_s6, 4 }
  0x47   : > { %9717 = sst [smem:[#allocation48_spill]] %s9716_s21  ;;  %p8134_p7 = por %p658_p0, %p82_p1 }
  0x48   : > { %p9720_p8 = scmp.ne.s32.totalorder %s7846_s4, %s7842_s30  ;;  %s9630_s22 = sand.u32 1, %s7850_s0  }
  0x49   : > { %s9718_s18 = scalar_select %p8134_p7, 1, 0 }
  0x4a   : > { %p8141_p10 = por %p664_p5, %p9720_p8  ;;  %s9631_s3 = sshll.u32 %s7866_s24, 8 }
  0x4b   : > { %9719 = sst [smem:[#allocation49_spill]] %s9718_s18  ;;  %s8149_s27 = sshll.u32 %s9630_s22, 4 }
  0x4c   : > { %s9721_s20 = scalar_select %p8141_p10, 1, 0 }
  0x4d   : > { %p8153_p2 = pnand %p7137_p4, %p8084_p3  ;;  %s8158_s17 = sand.u32 1, %s7870_s6  }
  0x4e   : > { %9722 = sst [smem:[#allocation50_spill]] %s9721_s20  ;;  %s709_s1 = scalar_lea.vmem [#allocation5], %s8149_s27 }
  0x4f   : > { %s9723_s26 = scalar_select %p8153_p2, 1, 0 }
  0x50   : > { %s9724_s18 = sld [smem:[#allocation59_spill]]  ;;  %s716_s22 = sshll.u32 %s709_s1, 4  ;;  %s8168_s22 = int_to_ptr.vmem [resolvable:$true] %s716_s22 }
  0x51   : > { %p8172_p1 = pnand %p7137_p4, %p8119_p12  ;;  %s9639_s15 = scalar_lea.sflag [#allocation6], %s8158_s17 }
  0x52   : > { %p9647_p6 = pneg %p8153_p2 }
  0x53   : > { %s9725_s13 = scalar_select %p8172_p1, 1, 0 }
  0x56   : > { %s8165_s20 = scalar_lea.hbm %s9724_s18, %s9631_s3  ;;  %s7365_s1 = scalar_lea.hbm %s9724_s18, 512 }
  0x57   : > { %s7360_s11 = scalar_lea.hbm %s8165_s20, 256  ;;  %p7366_p4 = scmp.lt.u32.totalorder %s8165_s20, %s9724_s18 }
  0x58   : > { %p7361_p3 = scmp.ne.s32.totalorder %s8165_s20, %s7360_s11  ;;  %p7367_p12 = scmp.lt.u32.totalorder %s7365_s1, %s7360_s11 }
  0x59   : > { %p7369_p5 = scmp.lt.u32.totalorder %s7360_s11, %s8165_s20 }
  0x5a   : > { %p7363_p9 = pnand %p9647_p6, %p7361_p3  ;;  %p7368_p0 = por %p7367_p12, %p7366_p4 }
  0x5c   : > { %p7364_p11 = pneg %p7363_p9  ;;  %p7370_p8 = por %p7369_p5, %p7368_p0 }
  0x5e   : > { %p7371_p10 = pnand %p7370_p8, %p7364_p11 }
  0x60   : > { %7374 = shalt.err (!%p7371_p10)
}
  0x61   : > { %s7375_s16 = scalar_lea.vmem %s8168_s22, 256  ;;  %s7872_s30 = smov [#allocation5]  }
  0x62   : > { %p7376_p3 = scmp.ne.s32.totalorder %s8168_s22, %s7375_s16  ;;  %s7380_s2 = sshll.u32 %s7872_s30, 4  ;;  %s7381_s2 = int_to_ptr.vmem [resolvable:$false] %s7380_s2 }
  0x63   : > { %s7382_s23 = scalar_lea.vmem %s7381_s2, 512  ;;  %p7383_p13 = scmp.lt.s32.totalorder %s8168_s22, %s7381_s2 }
  0x64   : > { %p7378_p9 = pnand %p7376_p3, %p9647_p6  ;;  %p7384_p4 = scmp.lt.s32.totalorder %s7382_s23, %s7375_s16 }
  0x66   : > { %p7379_p7 = pneg %p7378_p9  ;;  %p7385_p12 = por %p7384_p4, %p7383_p13 }
  0x68   : > { %p7386_p0 = pnand %p7385_p12, %p7379_p7 }
  0x6a   : > { %7389 = shalt.err (!%p7386_p0)
}
  0x6b   : > { %s9640_s11 = smov 128   ;;  %s9642_s3 = smov 8  }
  0x6c   : > { %7102 = dma.hbm_to_vmem [thread:$0]  (!%p8153_p2), %s8165_s20, 256, %s8168_s22, %s9639_s15, %s9640_s11, %s9640_s11, %s9642_s3  }
  0x6d   : > { %p5871_p7 = scmp.ge.s32.totalorder %s7870_s6, 1  ;;  %p995_p13 = scmp.lt.s32.totalorder %s7870_s6, 5 }
  0x6e   : > { %s8210_s1 = sand.u32 1, %s7838_s29   ;;  %s8216_s30 = sshll.u32 %s7862_s5, 11 }
  0x6f   : > { %s8213_s16 = sshll.u32 %s8210_s1, 7  ;;  %p8218_p10 = pnand %p5871_p7, %p995_p13 }
  0x70   : > { %s9728_s21 = sld [smem:[#allocation61_spill]]  ;;  %s751_s20 = scalar_lea.vmem [#allocation8], %s8213_s16 }
  0x71   : > { %s9726_s2 = scalar_select %p8218_p10, 1, 0 }
  0x72   : > { %s758_s22 = sshll.u32 %s751_s20, 4  ;;  %p8236_p5 = pneg %p8172_p1  ;;  %s8229_s22 = int_to_ptr.vmem [resolvable:$true] %s758_s22 }
  0x73   : > { %9727 = sst [smem:[#allocation51_spill]] %s9726_s2 }
  0x76   : > { %s8226_s28 = scalar_lea.hbm %s9728_s21, %s8216_s30  ;;  %s7395_s29 = scalar_lea.hbm %s9728_s21, 4096 }
  0x77   : > { %s7390_s11 = scalar_lea.hbm %s8226_s28, 2048  ;;  %p7396_p9 = scmp.lt.u32.totalorder %s8226_s28, %s9728_s21 }
  0x78   : > { %p7391_p11 = scmp.ne.s32.totalorder %s8226_s28, %s7390_s11  ;;  %p7397_p4 = scmp.lt.u32.totalorder %s7395_s29, %s7390_s11 }
  0x79   : > { %p7399_p0 = scmp.lt.u32.totalorder %s7390_s11, %s8226_s28 }
  0x7a   : > { %p7393_p8 = pnand %p8236_p5, %p7391_p11  ;;  %p7398_p12 = por %p7397_p4, %p7396_p9 }
  0x7c   : > { %p7394_p3 = pneg %p7393_p8  ;;  %p7400_p7 = por %p7399_p0, %p7398_p12 }
  0x7e   : > { %p7401_p13 = pnand %p7400_p7, %p7394_p3 }
  0x80   : > { %7404 = shalt.err (!%p7401_p13)
}
  0x81   : > { %s7405_s15 = scalar_lea.vmem %s8229_s22, 2048  ;;  %s7875_s18 = smov [#allocation8]  }
  0x82   : > { %p7406_p11 = scmp.ne.s32.totalorder %s8229_s22, %s7405_s15  ;;  %s7410_s23 = sshll.u32 %s7875_s18, 4  ;;  %s7411_s23 = int_to_ptr.vmem [resolvable:$false] %s7410_s23 }
  0x83   : > { %s7412_s6 = scalar_lea.vmem %s7411_s23, 4096  ;;  %p7413_p10 = scmp.lt.s32.totalorder %s8229_s22, %s7411_s23 }
  0x84   : > { %p7408_p8 = pnand %p7406_p11, %p8236_p5  ;;  %p7414_p2 = scmp.lt.s32.totalorder %s7412_s6, %s7405_s15 }
  0x86   : > { %p7409_p6 = pneg %p7408_p8  ;;  %p7415_p9 = por %p7414_p2, %p7413_p10 }
  0x88   : > { %p7416_p4 = pnand %p7415_p9, %p7409_p6 }
  0x8a   : > { %7419 = shalt.err (!%p7416_p4)
}
  0x8b   : > { %s9730_s29 = smov 8   ;;  %s9731_s11 = smov 128  }
  0x8c   : > { %s9732_s20 = scalar_lea.sflag [#allocation9], %s8158_s17  ;;  %s9733_s15 = sld [smem:[#allocation63_spill]] }
  0x8d   : > { %7108 = dma.hbm_to_vmem [thread:$0]  (!%p8172_p1), %s8226_s28, 2048, %s8229_s22, %s9732_s20, %s9731_s11, %s9731_s11, %s9730_s29  }
  0x8e   : > { %s793_s21 = scalar_lea.vmem [#allocation11], %s8213_s16  ;;  %s9655_s19 = scalar_lea.sflag [#allocation12], %s8158_s17 }
  0x8f   : > { %s800_s25 = sshll.u32 %s793_s21, 4  ;;  %s8271_s25 = int_to_ptr.vmem [resolvable:$true] %s800_s25 }
  0x92   : > { %s8268_s6 = scalar_lea.hbm %s9733_s15, %s8216_s30  ;;  %s7425_s20 = scalar_lea.hbm %s9733_s15, 4096 }
  0x93   : > { %s7420_s4 = scalar_lea.hbm %s8268_s6, 2048  ;;  %p7426_p3 = scmp.lt.u32.totalorder %s8268_s6, %s9733_s15 }
  0x94   : > { %p7421_p2 = scmp.ne.s32.totalorder %s8268_s6, %s7420_s4  ;;  %p7427_p12 = scmp.lt.u32.totalorder %s7425_s20, %s7420_s4 }
  0x95   : > { %p7429_p7 = scmp.lt.u32.totalorder %s7420_s4, %s8268_s6 }
  0x96   : > { %p7423_p6 = pnand %p7421_p2, %p8236_p5  ;;  %p7428_p0 = por %p7427_p12, %p7426_p3 }
  0x98   : > { %p7424_p10 = pneg %p7423_p6  ;;  %p7430_p13 = por %p7429_p7, %p7428_p0 }
  0x9a   : > { %p7431_p11 = pnand %p7430_p13, %p7424_p10 }
  0x9c   : > { %7434 = shalt.err (!%p7431_p11)
}
  0x9d   : > { %s7435_s21 = scalar_lea.vmem %s8271_s25, 2048  ;;  %s7876_s28 = smov [#allocation11]  }
  0x9e   : > { %p7436_p8 = scmp.ne.s32.totalorder %s8271_s25, %s7435_s21  ;;  %s7440_s22 = sshll.u32 %s7876_s28, 4  ;;  %s7441_s22 = int_to_ptr.vmem [resolvable:$false] %s7440_s22 }
  0x9f   : > { %s7442_s18 = scalar_lea.vmem %s7441_s22, 4096  ;;  %p7443_p2 = scmp.lt.s32.totalorder %s8271_s25, %s7441_s22 }
  0xa0   : > { %p7438_p9 = pnand %p7436_p8, %p8236_p5  ;;  %p7444_p6 = scmp.lt.s32.totalorder %s7442_s18, %s7435_s21 }
  0xa2   : > { %p7439_p4 = pneg %p7438_p9  ;;  %p7445_p3 = por %p7444_p6, %p7443_p2 }
  0xa4   : > { %p7446_p12 = pnand %p7445_p3, %p7439_p4 }
  0xa6   : > { %7449 = shalt.err (!%p7446_p12)
}
  0xa7   : > { %7114 = dma.hbm_to_vmem [thread:$0]  (!%p8172_p1), %s8268_s6, 2048, %s8271_s25, %s9655_s19, %s9731_s11, %s9731_s11, %s9730_s29  }
  0xa8   : > { %s9734_s8 = sld [smem:[#allocation66_spill]]  ;;  %s841_s21 = scalar_lea.vmem [#allocation14], %s8213_s16 }
  0xa9   : > { %s848_s28 = sshll.u32 %s841_s21, 4  ;;  %s9656_s22 = scalar_lea.sflag [#allocation15], %s8158_s17  ;;  %s8307_s28 = int_to_ptr.vmem [resolvable:$true] %s848_s28 }
  0xae   : > { %s8304_s23 = scalar_lea.hbm %s9734_s8, %s8216_s30  ;;  %s7455_s4 = scalar_lea.hbm %s9734_s8, 4096 }
  0xaf   : > { %s7450_s18 = scalar_lea.hbm %s8304_s23, 2048  ;;  %p7456_p13 = scmp.lt.u32.totalorder %s8304_s23, %s9734_s8 }
  0xb0   : > { %p7451_p10 = scmp.ne.s32.totalorder %s8304_s23, %s7450_s18  ;;  %p7457_p11 = scmp.lt.u32.totalorder %s7455_s4, %s7450_s18 }
  0xb1   : > { %p7459_p9 = scmp.lt.u32.totalorder %s7450_s18, %s8304_s23 }
  0xb2   : > { %p7453_p0 = pnand %p7451_p10, %p8236_p5  ;;  %p7458_p8 = por %p7457_p11, %p7456_p13 }
  0xb4   : > { %p7454_p7 = pneg %p7453_p0  ;;  %p7460_p4 = por %p7459_p9, %p7458_p8 }
  0xb6   : > { %p7461_p2 = pnand %p7460_p4, %p7454_p7 }
  0xb8   : > { %7464 = shalt.err (!%p7461_p2)
}
  0xb9   : > { %s7465_s21 = scalar_lea.vmem %s8307_s28, 2048  ;;  %s7877_s25 = smov [#allocation14]  }
  0xba   : > { %p7466_p6 = scmp.ne.s32.totalorder %s8307_s28, %s7465_s21  ;;  %s7470_s6 = sshll.u32 %s7877_s25, 4  ;;  %s7471_s6 = int_to_ptr.vmem [resolvable:$false] %s7470_s6 }
  0xbb   : > { %s7472_s19 = scalar_lea.vmem %s7471_s6, 4096  ;;  %p7473_p10 = scmp.lt.s32.totalorder %s8307_s28, %s7471_s6 }
  0xbc   : > { %p7468_p3 = pnand %p7466_p6, %p8236_p5  ;;  %p7474_p0 = scmp.lt.s32.totalorder %s7472_s19, %s7465_s21 }
  0xbe   : > { %p7469_p12 = pneg %p7468_p3  ;;  %p7475_p13 = por %p7474_p0, %p7473_p10 }
  0xc0   : > { %p7476_p11 = pnand %p7475_p13, %p7469_p12 }
  0xc2   : > { %7479 = shalt.err (!%p7476_p11)
}
  0xc3   : > { %7120 = dma.hbm_to_vmem [thread:$0]  (!%p8172_p1), %s8304_s23, 2048, %s8307_s28, %s9656_s22, %s9731_s11, %s9731_s11, %s9730_s29  }
  0xc4   : > { %s9735_s10 = sld [smem:[#allocation68_spill]]  ;;  %s883_s21 = scalar_lea.vmem [#allocation17], %s8213_s16 }
  0xc5   : > { %s890_s25 = sshll.u32 %s883_s21, 4  ;;  %s9659_s6 = scalar_lea.sflag [#allocation18], %s8158_s17  ;;  %s8343_s25 = int_to_ptr.vmem [resolvable:$true] %s890_s25 }
  0xca   : > { %s8340_s20 = scalar_lea.hbm %s9735_s10, %s8216_s30  ;;  %s7485_s18 = scalar_lea.hbm %s9735_s10, 4096 }
  0xcb   : > { %s7480_s19 = scalar_lea.hbm %s8340_s20, 2048  ;;  %p7486_p4 = scmp.lt.u32.totalorder %s8340_s20, %s9735_s10 }
  0xcc   : > { %p7481_p7 = scmp.ne.s32.totalorder %s8340_s20, %s7480_s19  ;;  %p7487_p2 = scmp.lt.u32.totalorder %s7485_s18, %s7480_s19 }
  0xcd   : > { %p7489_p3 = scmp.lt.u32.totalorder %s7480_s19, %s8340_s20 }
  0xce   : > { %p7483_p8 = pnand %p7481_p7, %p8236_p5  ;;  %p7488_p6 = por %p7487_p2, %p7486_p4 }
  0xd0   : > { %p7484_p9 = pneg %p7483_p8  ;;  %p7490_p12 = por %p7489_p3, %p7488_p6 }
  0xd2   : > { %p7491_p10 = pnand %p7490_p12, %p7484_p9 }
  0xd4   : > { %7494 = shalt.err (!%p7491_p10)
}
  0xd5   : > { %s7495_s21 = scalar_lea.vmem %s8343_s25, 2048  ;;  %s7878_s23 = smov [#allocation17]  }
  0xd6   : > { %p7496_p0 = scmp.ne.s32.totalorder %s8343_s25, %s7495_s21  ;;  %s7500_s28 = sshll.u32 %s7878_s23, 4  ;;  %s7501_s28 = int_to_ptr.vmem [resolvable:$false] %s7500_s28 }
  0xd7   : > { %s7502_s22 = scalar_lea.vmem %s7501_s28, 4096  ;;  %p7503_p7 = scmp.lt.s32.totalorder %s8343_s25, %s7501_s28 }
  0xd8   : > { %p7498_p13 = pnand %p7496_p0, %p8236_p5  ;;  %p7504_p8 = scmp.lt.s32.totalorder %s7502_s22, %s7495_s21 }
  0xda   : > { %p7499_p11 = pneg %p7498_p13  ;;  %p7505_p4 = por %p7504_p8, %p7503_p7 }
  0xdc   : > { %p7506_p2 = pnand %p7505_p4, %p7499_p11 }
  0xde   : > { %7509 = shalt.err (!%p7506_p2)
}
  0xdf   : > { %7126 = dma.hbm_to_vmem [thread:$0]  (!%p8172_p1), %s8340_s20, 2048, %s8343_s25, %s9659_s6, %s9731_s11, %s9731_s11, %s9730_s29  }
  0xe0   : > { %s9736_s19 = sshll.u32 %s7866_s24, 8  ;;  %s9737_s21 = sld [smem:[#allocation58_spill]] }
  0xe1   : > { %s688_s28 = scalar_lea.vmem [#allocation2], %s8149_s27  ;;  %s9738_s15 = sld [smem:[#allocation60_spill]] }
  0xe2   : > { %s695_s22 = sshll.u32 %s688_s28, 4  ;;  %s9739_s20 = sand.u32 1, %s7850_s0   ;;  %s8380_s22 = int_to_ptr.vmem [resolvable:$true] %s695_s22 }
  0xe3   : > { %s8390_s25 = scalar_lea.sflag [#allocation3], %s9739_s20  ;;  %p9740_p6 = scmp.ne.s32.totalorder %s9723_s26, 0 }
  0xe5   : > { %p9741_p3 = pneg %p9740_p6 }
  0xe6   : > { %s8377_s23 = scalar_lea.hbm %s9737_s21, %s9736_s19  ;;  %s7515_s27 = scalar_lea.hbm %s9737_s21, 512 }
  0xe7   : > { %s8386_s2 = scalar_lea.hbm %s9738_s15, %s8216_s30  ;;  %s7510_s6 = scalar_lea.hbm %s8377_s23, 256 }
  0xe8   : > { %p7511_p9 = scmp.ne.s32.totalorder %s8377_s23, %s7510_s6  ;;  %p7516_p0 = scmp.lt.u32.totalorder %s8377_s23, %s9737_s21 }
  0xe9   : > { %p7517_p13 = scmp.lt.u32.totalorder %s7515_s27, %s7510_s6  ;;  %p7519_p7 = scmp.lt.u32.totalorder %s7510_s6, %s8377_s23 }
  0xea   : > { %p7513_p12 = pnand %p7511_p9, %p9741_p3 }
  0xeb   : > { %p7518_p11 = por %p7517_p13, %p7516_p0 }
  0xec   : > { %p7514_p10 = pneg %p7513_p12 }
  0xed   : > { %p7520_p8 = por %p7519_p7, %p7518_p11 }
  0xef   : > { %p7521_p4 = pnand %p7520_p8, %p7514_p10 }
  0xf1   : > { %7524 = shalt.err (!%p7521_p4)
}
  0xf2   : > { %s7525_s8 = scalar_lea.vmem %s8380_s22, 256  ;;  %p9742_p9 = pmov %p9741_p3 }
  0xf3   : > { %p7526_p2 = scmp.ne.s32.totalorder %s8380_s22, %s7525_s8  ;;  %s7879_s10 = smov [#allocation2]  }
  0xf4   : > { %s7530_s20 = sshll.u32 %s7879_s10, 4  ;;  %s7531_s20 = int_to_ptr.vmem [resolvable:$false] %s7530_s20 }
  0xf5   : > { %p7528_p3 = pnand %p7526_p2, %p9742_p9  ;;  %s7532_s19 = scalar_lea.vmem %s7531_s20, 512 }
  0xf6   : > { %p7533_p1 = scmp.lt.s32.totalorder %s8380_s22, %s7531_s20  ;;  %p7534_p0 = scmp.lt.s32.totalorder %s7532_s19, %s7525_s8 }
  0xf7   : > { %p7529_p12 = pneg %p7528_p3 }
  0xf8   : > { %p7535_p13 = por %p7534_p0, %p7533_p1 }
  0xfa   : > { %p7536_p11 = pnand %p7535_p13, %p7529_p12 }
  0xfc   : > { %7539 = shalt.err (!%p7536_p11)
}
  0xfd   : > { %7099 = dma.hbm_to_vmem [thread:$0]  (!%p9740_p6), %s8377_s23, 256, %s8380_s22, %s8390_s25, %s9731_s11, %s9731_s11, %s9730_s29  }
  0xfe   : > { %s730_s6 = scalar_lea.vmem [#allocation7], %s8213_s16  ;;  %s9743_s4 = sld [smem:[#allocation62_spill]] }
  0xff   : > { %s737_s18 = sshll.u32 %s730_s6, 4  ;;  %s7540_s10 = scalar_lea.hbm %s8386_s2, 2048  ;;  %s8420_s18 = int_to_ptr.vmem [resolvable:$true] %s737_s18 }
 0x100   : > { %p7541_p1 = scmp.ne.s32.totalorder %s8386_s2, %s7540_s10  ;;  %s7545_s21 = scalar_lea.hbm %s9738_s15, 4096 }
 0x101   : > { %p7546_p6 = scmp.lt.u32.totalorder %s8386_s2, %s9738_s15  ;;  %p7547_p8 = scmp.lt.u32.totalorder %s7545_s21, %s7540_s10 }
 0x102   : > { %p7543_p10 = pnand %p7541_p1, %p8236_p5  ;;  %p7549_p2 = scmp.lt.u32.totalorder %s7540_s10, %s8386_s2 }
 0x103   : > { %p7548_p4 = por %p7547_p8, %p7546_p6 }
 0x104   : > { %s9744_s8 = smov %s9743_s4  ;;  %s8426_s28 = scalar_lea.hbm %s9743_s4, %s8216_s30 }
 0x105   : > { %p7544_p7 = pneg %p7543_p10  ;;  %p7550_p9 = por %p7549_p2, %p7548_p4 }
 0x107   : > { %p7551_p3 = pnand %p7550_p9, %p7544_p7 }
 0x109   : > { %7554 = shalt.err (!%p7551_p3)
}
 0x10a   : > { %s7555_s22 = scalar_lea.vmem %s8420_s18, 2048  ;;  %s7880_s25 = smov [#allocation7]  }
 0x10b   : > { %p7556_p12 = scmp.ne.s32.totalorder %s8420_s18, %s7555_s22  ;;  %s7560_s6 = sshll.u32 %s7880_s25, 4  ;;  %s7561_s6 = int_to_ptr.vmem [resolvable:$false] %s7560_s6 }
 0x10c   : > { %s7562_s24 = scalar_lea.vmem %s7561_s6, 4096  ;;  %p7563_p11 = scmp.lt.s32.totalorder %s8420_s18, %s7561_s6 }
 0x10d   : > { %p7558_p0 = pnand %p7556_p12, %p8236_p5  ;;  %p7564_p1 = scmp.lt.s32.totalorder %s7562_s24, %s7555_s22 }
 0x10f   : > { %p7559_p13 = pneg %p7558_p0  ;;  %p7565_p10 = por %p7564_p1, %p7563_p11 }
 0x111   : > { %p7566_p6 = pnand %p7565_p10, %p7559_p13 }
 0x113   : > { %7569 = shalt.err (!%p7566_p6)
}
 0x114   : > { %p9745_p7 = scmp.ne.s32.totalorder %s9725_s13, 0  ;;  %s9746_s21 = scalar_lea.sflag [#allocation6], %s8158_s17 }
 0x115   : > { %s772_s27 = scalar_lea.vmem [#allocation10], %s8213_s16  ;;  %s9747_s7 = sld [smem:[#allocation65_spill]] }
 0x116   : > { %7105 = dma.hbm_to_vmem [thread:$0]  (!%p9745_p7), %s8386_s2, 2048, %s8420_s18, %s9746_s21, %s9731_s11, %s9731_s11, %s9730_s29  }
 0x117   : > { %s779_s26 = sshll.u32 %s772_s27, 4  ;;  %s7570_s19 = scalar_lea.hbm %s8426_s28, 2048  ;;  %s8455_s26 = int_to_ptr.vmem [resolvable:$true] %s779_s26 }
 0x118   : > { %p7571_p8 = scmp.ne.s32.totalorder %s8426_s28, %s7570_s19  ;;  %s7575_s25 = scalar_lea.hbm %s9744_s8, 4096 }
 0x119   : > { %p7576_p9 = scmp.lt.u32.totalorder %s8426_s28, %s9744_s8  ;;  %p7577_p3 = scmp.lt.u32.totalorder %s7575_s25, %s7570_s19 }
 0x11a   : > { %p7573_p4 = pnand %p7571_p8, %p8236_p5  ;;  %p7579_p0 = scmp.lt.u32.totalorder %s7570_s19, %s8426_s28 }
 0x11b   : > { %s8461_s20 = scalar_lea.hbm %s9747_s7, %s8216_s30  ;;  %p7578_p12 = por %p7577_p3, %p7576_p9 }
 0x11c   : > { %p7574_p2 = pneg %p7573_p4 }
 0x11d   : > { %p7580_p13 = por %p7579_p0, %p7578_p12 }
 0x11f   : > { %p7581_p11 = pnand %p7580_p13, %p7574_p2 }
 0x121   : > { %7584 = shalt.err (!%p7581_p11)
}
 0x122   : > { %s7585_s18 = scalar_lea.vmem %s8455_s26, 2048  ;;  %s7881_s24 = smov [#allocation10]  }
 0x123   : > { %p7586_p1 = scmp.ne.s32.totalorder %s8455_s26, %s7585_s18  ;;  %s7590_s21 = sshll.u32 %s7881_s24, 4  ;;  %s7591_s21 = int_to_ptr.vmem [resolvable:$false] %s7590_s21 }
 0x124   : > { %s7592_s27 = scalar_lea.vmem %s7591_s21, 4096  ;;  %p7593_p8 = scmp.lt.s32.totalorder %s8455_s26, %s7591_s21 }
 0x125   : > { %p7588_p10 = pnand %p7586_p1, %p8236_p5  ;;  %p7594_p4 = scmp.lt.s32.totalorder %s7592_s27, %s7585_s18 }
 0x127   : > { %p7589_p6 = pneg %p7588_p10  ;;  %p7595_p9 = por %p7594_p4, %p7593_p8 }
 0x129   : > { %p7596_p3 = pnand %p7595_p9, %p7589_p6 }
 0x12b   : > { %7599 = shalt.err (!%p7596_p3)
}
 0x12c   : > { %s9748_s4 = scalar_lea.sflag [#allocation9], %s8158_s17  ;;  %s820_s10 = scalar_lea.vmem [#allocation13], %s8213_s16 }
 0x12d   : > { %7111 = dma.hbm_to_vmem [thread:$0]  (!%p9745_p7), %s8426_s28, 2048, %s8455_s26, %s9748_s4, %s9731_s11, %s9731_s11, %s9730_s29  }
 0x12e   : > { %s827_s19 = sshll.u32 %s820_s10, 4  ;;  %s9749_s9 = sld [smem:[#allocation67_spill]]  ;;  %s8490_s19 = int_to_ptr.vmem [resolvable:$true] %s827_s19 }
 0x12f   : > { %s7600_s6 = scalar_lea.hbm %s8461_s20, 2048  ;;  %s7605_s24 = scalar_lea.hbm %s9747_s7, 4096 }
 0x130   : > { %p7601_p2 = scmp.ne.s32.totalorder %s8461_s20, %s7600_s6  ;;  %p7606_p13 = scmp.lt.u32.totalorder %s8461_s20, %s9747_s7 }
 0x131   : > { %p7607_p11 = scmp.lt.u32.totalorder %s7605_s24, %s7600_s6  ;;  %p7609_p10 = scmp.lt.u32.totalorder %s7600_s6, %s8461_s20 }
 0x132   : > { %p7603_p12 = pnand %p7601_p2, %p8236_p5 }
 0x133   : > { %p7608_p1 = por %p7607_p11, %p7606_p13 }
 0x134   : > { %s8496_s25 = scalar_lea.hbm %s9749_s9, %s8216_s30  ;;  %p7604_p0 = pneg %p7603_p12 }
 0x135   : > { %p7610_p6 = por %p7609_p10, %p7608_p1 }
 0x137   : > { %p7611_p8 = pnand %p7610_p6, %p7604_p0 }
 0x139   : > { %7614 = shalt.err (!%p7611_p8)
}
 0x13a   : > { %s7615_s30 = scalar_lea.vmem %s8490_s19, 2048  ;;  %s7882_s26 = smov [#allocation13]  }
 0x13b   : > { %p7616_p4 = scmp.ne.s32.totalorder %s8490_s19, %s7615_s30  ;;  %s7620_s27 = sshll.u32 %s7882_s26, 4  ;;  %s7621_s27 = int_to_ptr.vmem [resolvable:$false] %s7620_s27 }
 0x13c   : > { %s7622_s4 = scalar_lea.vmem %s7621_s27, 4096  ;;  %p7623_p2 = scmp.lt.s32.totalorder %s8490_s19, %s7621_s27 }
 0x13d   : > { %p7618_p9 = pnand %p7616_p4, %p8236_p5  ;;  %p7624_p12 = scmp.lt.s32.totalorder %s7622_s4, %s7615_s30 }
 0x13f   : > { %p7619_p3 = pneg %p7618_p9  ;;  %p7625_p13 = por %p7624_p12, %p7623_p2 }
 0x141   : > { %p7626_p11 = pnand %p7625_p13, %p7619_p3 }
 0x143   : > { %7629 = shalt.err (!%p7626_p11)
}
 0x144   : > { %s9750_s10 = scalar_lea.sflag [#allocation12], %s8158_s17  ;;  %s862_s23 = scalar_lea.vmem [#allocation16], %s8213_s16 }
 0x145   : > { %7117 = dma.hbm_to_vmem [thread:$0]  (!%p9745_p7), %s8461_s20, 2048, %s8490_s19, %s9750_s10, %s9731_s11, %s9731_s11, %s9730_s29  }
 0x146   : > { %s869_s22 = sshll.u32 %s862_s23, 4  ;;  %s5865_s6 = sshll.u32 %s8210_s1, 9  ;;  %s8526_s22 = int_to_ptr.vmem [resolvable:$true] %s869_s22 }
 0x147   : > { %s7630_s2 = scalar_lea.hbm %s8496_s25, 2048  ;;  %s7635_s21 = scalar_lea.hbm %s9749_s9, 4096 }
 0x148   : > { %p7631_p0 = scmp.ne.s32.totalorder %s8496_s25, %s7630_s2  ;;  %p7636_p6 = scmp.lt.u32.totalorder %s8496_s25, %s9749_s9 }
 0x149   : > { %p7637_p8 = scmp.lt.u32.totalorder %s7635_s21, %s7630_s2  ;;  %p7639_p9 = scmp.lt.u32.totalorder %s7630_s2, %s8496_s25 }
 0x14a   : > { %p7633_p1 = pnand %p7631_p0, %p8236_p5 }
 0x14b   : > { %p7638_p4 = por %p7637_p8, %p7636_p6 }
 0x14c   : > { %p7634_p10 = pneg %p7633_p1 }
 0x14d   : > { %p7640_p3 = por %p7639_p9, %p7638_p4 }
 0x14f   : > { %p7641_p2 = pnand %p7640_p3, %p7634_p10 }
 0x151   : > { %7644 = shalt.err (!%p7641_p2)
}
 0x152   : > { %s7645_s16 = scalar_lea.vmem %s8526_s22, 2048  ;;  %s7883_s20 = smov [#allocation16]  }
 0x153   : > { %p7646_p12 = scmp.ne.s32.totalorder %s8526_s22, %s7645_s16  ;;  %s7650_s19 = sshll.u32 %s7883_s20, 4  ;;  %s7651_s19 = int_to_ptr.vmem [resolvable:$false] %s7650_s19 }
 0x154   : > { %s7652_s26 = scalar_lea.vmem %s7651_s19, 4096  ;;  %p7653_p0 = scmp.lt.s32.totalorder %s8526_s22, %s7651_s19 }
 0x155   : > { %p7648_p13 = pnand %p7646_p12, %p8236_p5  ;;  %p7654_p1 = scmp.lt.s32.totalorder %s7652_s26, %s7645_s16 }
 0x157   : > { %p7649_p11 = pneg %p7648_p13  ;;  %p7655_p6 = por %p7654_p1, %p7653_p0 }
 0x159   : > { %p7656_p8 = pnand %p7655_p6, %p7649_p11 }
 0x15b   : > { %7659 = shalt.err (!%p7656_p8)
}
 0x15c   : > { %s9751_s27 = scalar_lea.sflag [#allocation15], %s8158_s17  ;;  %s5959_s4 = sshll.u32 %s7862_s5, 13 }
 0x15d   : > { %7123 = dma.hbm_to_vmem [thread:$0]  (!%p9745_p7), %s8496_s25, 2048, %s8526_s22, %s9751_s27, %s9731_s11, %s9731_s11, %s9730_s29  }
 0x15e   : > { %s910_s10 = scalar_lea.vmem [#allocation19], %s5865_s6  ;;  %s9752_s12 = sld [smem:[#allocation70_spill]] }
 0x15f   : > { %s917_s23 = sshll.u32 %s910_s10, 4  ;;  %s8564_s23 = int_to_ptr.vmem [resolvable:$true] %s917_s23 }
 0x164   : > { %s8562_s24 = scalar_lea.hbm %s9752_s12, %s5959_s4  ;;  %s7665_s28 = scalar_lea.hbm %s9752_s12, 16384 }
 0x165   : > { %s7660_s21 = scalar_lea.hbm %s8562_s24, 8192  ;;  %p7666_p3 = scmp.lt.u32.totalorder %s8562_s24, %s9752_s12 }
 0x166   : > { %p7661_p10 = scmp.ne.s32.totalorder %s8562_s24, %s7660_s21  ;;  %p7667_p2 = scmp.lt.u32.totalorder %s7665_s28, %s7660_s21 }
 0x167   : > { %p7669_p13 = scmp.lt.u32.totalorder %s7660_s21, %s8562_s24 }
 0x168   : > { %p7663_p4 = pnand %p7661_p10, %p8236_p5  ;;  %p7668_p12 = por %p7667_p2, %p7666_p3 }
 0x16a   : > { %p7664_p9 = pneg %p7663_p4  ;;  %p7670_p11 = por %p7669_p13, %p7668_p12 }
 0x16c   : > { %p7671_p0 = pnand %p7670_p11, %p7664_p9 }
 0x16e   : > { %7674 = shalt.err (!%p7671_p0)
}
 0x16f   : > { %s7675_s20 = scalar_lea.vmem %s8564_s23, 8192  ;;  %s7884_s19 = smov [#allocation19]  }
 0x170   : > { %p7676_p1 = scmp.ne.s32.totalorder %s8564_s23, %s7675_s20  ;;  %s7680_s26 = sshll.u32 %s7884_s19, 4  ;;  %s7681_s26 = int_to_ptr.vmem [resolvable:$false] %s7680_s26 }
 0x171   : > { %s7682_s27 = scalar_lea.vmem %s7681_s26, 16384  ;;  %p7683_p10 = scmp.lt.s32.totalorder %s8564_s23, %s7681_s26 }
 0x172   : > { %p7678_p6 = pnand %p7676_p1, %p8236_p5  ;;  %p7684_p4 = scmp.lt.s32.totalorder %s7682_s27, %s7675_s20 }
 0x174   : > { %p7679_p8 = pneg %p7678_p6  ;;  %p7685_p3 = por %p7684_p4, %p7683_p10 }
 0x176   : > { %p7686_p2 = pnand %p7685_p3, %p7679_p8 }
 0x178   : > { %7689 = shalt.err (!%p7686_p2)
}
 0x179   : > { %s7885_s10 = smov 512   ;;  %s7886_s2 = smov 32  }
 0x17a   : > { %s9753_s18 = scalar_lea.sflag [#allocation18], %s8158_s17  ;;  %s9754_s14 = sld [smem:[#allocation72_spill]] }
 0x17b   : > { %7129 = dma.hbm_to_vmem [thread:$0]  (!%p9745_p7), %s8562_s24, 8192, %s8564_s23, %s9753_s18, %s7885_s10, %s7885_s10, %s7886_s2  }
 0x17c   : > { %s938_s28 = scalar_lea.vmem [#allocation20], %s5865_s6  ;;  %s935_s16 = scalar_lea.sflag [#allocation21], %s8210_s1 }
 0x17d   : > { %s945_s30 = sshll.u32 %s938_s28, 4  ;;  %s8598_s30 = int_to_ptr.vmem [resolvable:$true] %s945_s30 }
 0x180   : > { %s8594_s22 = scalar_lea.hbm %s9754_s14, %s5959_s4  ;;  %s7695_s4 = scalar_lea.hbm %s9754_s14, 16384 }
 0x181   : > { %s7690_s20 = scalar_lea.hbm %s8594_s22, 8192  ;;  %p7696_p11 = scmp.lt.u32.totalorder %s8594_s22, %s9754_s14 }
 0x182   : > { %p7691_p9 = scmp.ne.s32.totalorder %s8594_s22, %s7690_s20  ;;  %p7697_p0 = scmp.lt.u32.totalorder %s7695_s4, %s7690_s20 }
 0x183   : > { %p7699_p6 = scmp.lt.u32.totalorder %s7690_s20, %s8594_s22 }
 0x184   : > { %p7693_p12 = pnand %p7691_p9, %p8236_p5  ;;  %p7698_p1 = por %p7697_p0, %p7696_p11 }
 0x186   : > { %p7694_p13 = pneg %p7693_p12  ;;  %p7700_p8 = por %p7699_p6, %p7698_p1 }
 0x188   : > { %p7701_p10 = pnand %p7700_p8, %p7694_p13 }
 0x18a   : > { %7704 = shalt.err (!%p7701_p10)
}
 0x18b   : > { %s7705_s6 = scalar_lea.vmem %s8598_s30, 8192  ;;  %s7887_s26 = smov [#allocation20]  }
 0x18c   : > { %p7706_p4 = scmp.ne.s32.totalorder %s8598_s30, %s7705_s6  ;;  %s7710_s27 = sshll.u32 %s7887_s26, 4  ;;  %s7711_s27 = int_to_ptr.vmem [resolvable:$false] %s7710_s27 }
 0x18d   : > { %s7712_s10 = scalar_lea.vmem %s7711_s27, 16384  ;;  %p7713_p9 = scmp.lt.s32.totalorder %s8598_s30, %s7711_s27 }
 0x18e   : > { %p7708_p3 = pnand %p7706_p4, %p8236_p5  ;;  %p7714_p12 = scmp.lt.s32.totalorder %s7712_s10, %s7705_s6 }
 0x190   : > { %p7709_p2 = pneg %p7708_p3  ;;  %p7715_p11 = por %p7714_p12, %p7713_p9 }
 0x192   : > { %p7716_p0 = pnand %p7715_p11, %p7709_p2 }
 0x194   : > { %7719 = shalt.err (!%p7716_p0)
}
 0x195   : > { %7132 = dma.hbm_to_vmem [thread:$0]  (!%p9745_p7), %s8594_s22, 8192, %s8598_s30, %s935_s16, %s9731_s11, %s9731_s11, %s9730_s29  }
 0x196   : > { %s9755_s3 = sld [smem:[#allocation51_spill]] }
 0x19c   : > { %p9756_p5 = scmp.ne.s32.totalorder %s9755_s3, 0 }
 0x19e   : > { %999 = sbr.rel (%p9756_p5) target bundleno = 8425 (0x20e9), region = 108 }
 0x1a5   : > { %s9757_s2 = sld [smem:[#allocation35_spill]]  ;;  %s9758_s18 = sld [smem:[#allocation45_spill]] }
 0x1ab   : > { %s8630_s21 = sand.u32 1, %s9757_s2   ;;  %p9760_p13 = scmp.ne.s32.totalorder %s9758_s18, 0 }
 0x1ac   : > { %9759 = sst [smem:[#allocation52_spill]] %s8630_s21  ;;  %s8633_s25 = sshll.u32 %s8630_s21, 4 }
 0x1ad   : > { %s1002_s13 = scalar_lea.sflag [#allocation3], %s8630_s21 }
 0x1ae   : > { %7793 = dma.done.wait (%p9760_p13), %s1002_s13, 256  }
 0x1af   : > { %7795 = vsyncadd (%p9760_p13), %s1002_s13, 4294967040  ;;  %s9761_s1 = sld [smem:[#allocation42_spill]] }
 0x1b5   : > { %s1010_s29 = sand.u32 1, %s9761_s1  }
 0x1b6   : > { %s1011_s11 = scalar_lea.sflag [#allocation6], %s1010_s29 }
 0x1b7   : > { %7797 = dma.done.wait (%p9760_p13), %s1011_s11, 256  }
 0x1b8   : > { %7799 = vsyncadd (%p9760_p13), %s1011_s11, 4294967040  ;;  %s9762_s30 = sld [smem:[#allocation32_spill]] }
 0x1b9   : > { %s9763_s16 = sld [smem:[#allocation48_spill]] }
 0x1be   : > { %s8648_s20 = sand.u32 1, %s9762_s30  }
 0x1bf   : > { %s5874_s17 = sshll.u32 %s8648_s20, 7  ;;  %p9764_p7 = scmp.ne.s32.totalorder %s9763_s16, 0 }
 0x1c0   : > { %s8651_s23 = scalar_lea.vmem [#allocation7], %s5874_s17 }
 0x1c1   : > { %7801 = dma.done.wait (%p9764_p7), %s1011_s11, 2048  }
 0x1c2   : > { %7803 = vsyncadd (%p9764_p7), %s1011_s11, 4294965248  ;;  %s1029_s4 = scalar_lea.sflag [#allocation9], %s1010_s29  ;;  %s8657_s24 = scalar_lea.vmem [#allocation8], %s5874_s17 }
 0x1c3   : > { %7805 = dma.done.wait (%p9764_p7), %s1029_s4, 4096  }
 0x1c4   : > { %7807 = vsyncadd (%p9764_p7), %s1029_s4, 4294963200  ;;  %s8663_s19 = scalar_lea.vmem [#allocation10], %s5874_s17  ;;  %s1047_s6 = scalar_lea.sflag [#allocation12], %s1010_s29 }
 0x1c5   : > { %s8665_s26 = scalar_lea.vmem [#allocation11], %s5874_s17 }
 0x1c6   : > { %7809 = dma.done.wait (%p9764_p7), %s1047_s6, 4096  }
 0x1c7   : > { %7811 = vsyncadd (%p9764_p7), %s1047_s6, 4294963200  ;;  %s8671_s27 = scalar_lea.vmem [#allocation13], %s5874_s17  ;;  %s1065_s10 = scalar_lea.sflag [#allocation15], %s1010_s29 }
 0x1c8   : > { %s8673_s3 = scalar_lea.vmem [#allocation14], %s5874_s17 }
 0x1c9   : > { %7813 = dma.done.wait (%p9764_p7), %s1065_s10, 4096  }
 0x1ca   : > { %7815 = vsyncadd (%p9764_p7), %s1065_s10, 4294963200  ;;  %s8679_s2 = scalar_lea.vmem [#allocation16], %s5874_s17  ;;  %s1083_s18 = scalar_lea.sflag [#allocation18], %s1010_s29 }
 0x1cb   : > { %9765 = sst [smem:[#allocation53_spill]] %s8679_s2  ;;  %s8681_s13 = scalar_lea.vmem [#allocation17], %s5874_s17 }
 0x1cc   : > { %9766 = sst [smem:[#allocation54_spill]] %s8681_s13 }
 0x1cd   : > { %7817 = dma.done.wait (%p9764_p7), %s1083_s18, 10240  }
 0x1ce   : > { %7819 = vsyncadd (%p9764_p7), %s1083_s18, 4294957056  ;;  %s5882_s1 = sshll.u32 %s8648_s20, 9  ;;  %s1101_s30 = scalar_lea.sflag [#allocation21], %s8648_s20 }
 0x1cf   : > { %s8688_s11 = scalar_lea.vmem [#allocation19], %s5882_s1  ;;  %s8691_s4 = scalar_lea.vmem [#allocation20], %s5882_s1 }
 0x1d0   : > { %9767 = sst [smem:[#allocation55_spill]] %s8688_s11 }
 0x1d1   : > { %9768 = sst [smem:[#allocation56_spill]] %s8691_s4 }
 0x1d2   : > { %7821 = dma.done.wait (%p9764_p7), %s1101_s30, 8192  }
 0x1d3   : > { %7823 = vsyncadd (%p9764_p7), %s1101_s30, 4294959104  ;;  %s9769_s29 = sld [smem:[#allocation37_spill]]  ;;  %s9773_s14 = sld [smem:[#allocation71_spill]] }
 0x1d4   : > { %s9775_s21 = sld [smem:[#allocation74_spill]]  ;;  %s9776_s16 = sld [smem:[#allocation75_spill]] }
 0x1d5   : > { %s9777_s30 = sld [smem:[#allocation76_spill]]  ;;  %s9778_s9 = sld [smem:[#allocation77_spill]] }
 0x1d6   : > { %s9780_s0 = sld [smem:[#allocation79_spill]] }
 0x1d9   : > { %p1253_p1 = scmp.lt.s32.totalorder %s9769_s29, 1  ;;  %p5886_p6 = scmp.ne.s32.totalorder %s9769_s29, 0 }
 0x1da   : > { %s9781_s11 = scalar_lea.vmem (!%p5886_p6), [#allocation2], %s8633_s25 }
 0x1db   : > { %s8699_s17 = scalar_select %p1253_p1, %s9769_s29, 1 }
 0x1dc   : > { %v1289_v0 = vld [vmem:[%s9781_s11] sm:$0xff] (!%p5886_p6)  ;;  %s9782_s2 = smov (!%p5886_p6), %s9781_s11 }
 0x1dd   : > { %s5885_s28 = sshll.u32 %s8699_s17, 2  ;;  %s1268_s4 = scalar_lea.vmem %s9775_s21, %s8699_s17  ;;  %v1290_v1 = vld [vmem:[%s9782_s2 + $0x8] sm:$0xff] (!%p5886_p6) }
 0x1de   : > { %s8717_s15 = scalar_lea.vmem %s9773_s14, %s5885_s28  ;;  %s1271_s13 = scalar_lea.vmem %s9776_s16, %s8699_s17 }
 0x1df   : > { %9774 = sst [smem:[#allocation57_spill]] %s8717_s15  ;;  %s1274_s22 = scalar_lea.vmem %s9777_s30, %s8699_s17 }
 0x1e0   : > { %s1277_s8 = scalar_lea.vmem %s9778_s9, %s8699_s17  ;;  %s9779_s14 = sld [smem:[#allocation78_spill]] }
 0x1e1   : > { %s1283_s5 = scalar_lea.vmem %s9780_s0, %s8699_s17  ;;  %s8744_s21 = scalar_lea.vmem [#allocation22], %s8633_s25 }
 0x1e2   : > { %1288 = sbr.rel (%p5886_p6) target bundleno = 489 (0x1e9), region = 160  ;;  %1291 = vst [vmem:[%s8744_s21] sm:$0xff] (!%p5886_p6), %v1289_v0  ;;  %1292 = vst [vmem:[%s8744_s21 + $0x8] sm:$0xff] (!%p5886_p6), %v1290_v1 }
 0x1e6   : > { %s1280_s28 = scalar_lea.vmem %s9779_s14, %s8699_s17 }
 0x1e9 PF: > { %v1311_v2 = vld [vmem:[%s8657_s24] sm:$0xff]  ;;  %v1312_v3 = vld [vmem:[%s8657_s24 + $0x8] sm:$0xff]  ;;  %v1313_v7 = vld [vmem:[%s8657_s24 + $0x10] sm:$0xff]  ;;  %v7888_v52 = vmov 0.0   ;;  %vm7889_vm0 = vmmov 0   ;;  %vm1590_vm1 = vcmask 261120  }
 0x1ea   : > { %v1295_v4 = vld [vmem:[%s8651_s23] sm:$0xff]  ;;  %v6718_v5 = vpack.c.bf16 %v1312_v3, %v1311_v2  ;;  %v1296_v6 = vld [vmem:[%s8651_s23 + $0x8] sm:$0xff]  ;;  %v1314_v8 = vld [vmem:[%s8657_s24 + $0x18] sm:$0xff]  ;;  %s7890_s12 = smov 96   ;;  %vm1668_vm3 = vcmask 64512   ;;  %s7891_s15 = smov 64  }
 0x1eb   : > { %v6686_v9 = vpack.c.bf16 %v1296_v6, %v1295_v4  ;;  %v6722_v10 = vpack.c.bf16 %v1314_v8, %v1313_v7  ;;  %v1297_v11 = vld [vmem:[%s8651_s23 + $0x10] sm:$0xff]  ;;  %v1298_v12 = vld [vmem:[%s8651_s23 + $0x18] sm:$0xff]  ;;  %v1315_v13 = vld [vmem:[%s8657_s24 + $0x20] sm:$0xff]  ;;  %vm2265_vm4 = vcmask 523264   ;;  %vm2267_vm5 = vcmask 785408   ;;  %s9787_s16 = scalar_lea.vmem [#allocation5], %s8633_s25 }
 0x1ec   : > { %6719 = vmatprep.subr.bf16.mxu1 %v6718_v5  ;;  %v6690_v14 = vpack.c.bf16 %v1298_v12, %v1297_v11  ;;  %v1316_v15 = vld [vmem:[%s8657_s24 + $0x28] sm:$0xff]  ;;  %v1299_v16 = vld [vmem:[%s8651_s23 + $0x20] sm:$0xff]  ;;  %v1317_v20 = vld [vmem:[%s8657_s24 + $0x30] sm:$0xff]  ;;  %s9788_s18 = smov %s9787_s16  ;;  %s9790_s20 = sld [smem:[#allocation53_spill]] }
 0x1ed   : > { %v1300_v17 = vld [vmem:[%s8651_s23 + $0x28] sm:$0xff]  ;;  %6721 = vmatpush3.bf16.msra.mxu1 %v6718_v5  ;;  %6687 = vmatprep.subr.bf16.mxu0 %v6686_v9  ;;  %v6726_v18 = vpack.c.bf16 %v1316_v15, %v1315_v13  ;;  %v1318_v21 = vld [vmem:[%s8657_s24 + $0x38] sm:$0xff]  ;;  %v1301_v22 = vld [vmem:[%s8651_s23 + $0x30] sm:$0xff]  ;;  %s9794_s14 = sld [smem:[#allocation69_spill]]  ;;  %s9796_s0 = sld [smem:[#allocation56_spill]] }
 0x1ee   : > { %6689 = vmatpush3.bf16.msra.mxu0 %v6686_v9  ;;  %6723 = vmatprep.subr.bf16.mxu1 %v6722_v10  ;;  %v6694_v19 = vpack.c.bf16 %v1300_v17, %v1299_v16  ;;  %v1302_v23 = vld [vmem:[%s8651_s23 + $0x38] sm:$0xff]  ;;  %v6730_v24 = vpack.c.bf16 %v1318_v21, %v1317_v20  ;;  %v1319_v26 = vld [vmem:[%s8657_s24 + $0x40] sm:$0xff]  ;;  %v1320_v27 = vld [vmem:[%s8657_s24 + $0x48] sm:$0xff]  ;;  %v1585_v17 = vlaneseq  ;;  %s9806_s7 = sld [smem:[#allocation49_spill]] }
 0x1ef   : > { %6691 = vmatprep.subr.bf16.mxu0 %v6690_v14  ;;  %v6698_v25 = vpack.c.bf16 %v1302_v23, %v1301_v22  ;;  %v8772_v28 = vld [vmem:[%s8744_s21] sm:$0xff]  ;;  %v1304_v30 = vld [vmem:[%s8651_s23 + $0x48] sm:$0xff]  ;;  %v6734_v31 = vpack.c.bf16 %v1320_v27, %v1319_v26  ;;  %v1322_v34 = vld [vmem:[%s8657_s24 + $0x58] sm:$0xff] }
 0x1f0   : > { %v1303_v29 = vld [vmem:[%s8651_s23 + $0x40] sm:$0xff]  ;;  %6313 = vmatprep.mubr.f32.mxu1 %v8772_v28  ;;  %6278 = vmatprep.mubr.f32.mxu0 %v8772_v28  ;;  %v1321_v33 = vld [vmem:[%s8657_s24 + $0x50] sm:$0xff]  ;;  %v1306_v36 = vld [vmem:[%s8651_s23 + $0x58] sm:$0xff] }
 0x1f1   : > { %6725 = vmatpush3.bf16.msra.mxu1 %v6722_v10  ;;  %v6702_v32 = vpack.c.bf16 %v1304_v30, %v1303_v29  ;;  %v1305_v35 = vld [vmem:[%s8651_s23 + $0x50] sm:$0xff]  ;;  %v6738_v37 = vpack.c.bf16 %v1322_v34, %v1321_v33  ;;  %v1323_v39 = vld [vmem:[%s8657_s24 + $0x60] sm:$0xff]  ;;  %v1324_v40 = vld [vmem:[%s8657_s24 + $0x68] sm:$0xff] }
 0x1f2   : > { %6693 = vmatpush3.bf16.msra.mxu0 %v6690_v14  ;;  %6727 = vmatprep.subr.bf16.mxu1 %v6726_v18  ;;  %v6706_v38 = vpack.c.bf16 %v1306_v36, %v1305_v35  ;;  %v1307_v41 = vld [vmem:[%s8651_s23 + $0x60] sm:$0xff]  ;;  %v1308_v42 = vld [vmem:[%s8651_s23 + $0x68] sm:$0xff]  ;;  %v6742_v43 = vpack.c.bf16 %v1324_v40, %v1323_v39  ;;  %v1325_v45 = vld [vmem:[%s8657_s24 + $0x70] sm:$0xff] }
 0x1f3   : > { %6695 = vmatprep.subr.bf16.mxu0 %v6694_v19  ;;  %v6710_v44 = vpack.c.bf16 %v1308_v42, %v1307_v41  ;;  %v1326_v46 = vld [vmem:[%s8657_s24 + $0x78] sm:$0xff]  ;;  %v1309_v47 = vld [vmem:[%s8651_s23 + $0x70] sm:$0xff]  ;;  %v1327_v57 = vld [vmem:[%s8663_s19] sm:$0xff]  ;;  %s9795_s10 = scalar_lea.vmem %s9794_s14, %s8699_s17  ;;  %s9807_s14 = sld [smem:[#allocation80_spill]] }
 0x1f4   : > { %v1310_v48 = vld [vmem:[%s8651_s23 + $0x78] sm:$0xff]  ;;  %v6746_v49 = vpack.c.bf16 %v1326_v46, %v1325_v45  ;;  %v1328_v58 = vld [vmem:[%s8663_s19 + $0x8] sm:$0xff]  ;;  %v1329_v59 = vld [vmem:[%s8663_s19 + $0x10] sm:$0xff]  ;;  %s7892_s23 = smov 32   ;;  %p9808_p10 = scmp.ne.s32.totalorder %s9806_s7, 0 }
 0x1f5   : > { %6729 = vmatpush3.bf16.msra.mxu1 %v6726_v18  ;;  %v6714_v50 = vpack.c.bf16 %v1310_v48, %v1309_v47  ;;  %v8791_v51 = vld [vmem:[%s8744_s21 + $0x8] sm:$0xff]  ;;  %v6750_v60 = vpack.c.bf16 %v1328_v58, %v1327_v57  ;;  %v1331_v63 = vld [vmem:[%s8663_s19 + $0x20] sm:$0xff]  ;;  %v1333_v2 = vld [vmem:[%s8663_s19 + $0x30] sm:$0xff]  ;;  %v8835_v18 = vshrl.u32 %v1585_v17, 7 }
 0x1f6   : > { %6697 = vmatpush3.bf16.msra.mxu0 %v6694_v19  ;;  %6731 = vmatprep.subr.bf16.mxu1 %v6730_v24  ;;  %v1330_v61 = vld [vmem:[%s8663_s19 + $0x18] sm:$0xff]  ;;  %v1332_v0 = vld [vmem:[%s8663_s19 + $0x28] sm:$0xff]  ;;  %v1335_v5 = vld [vmem:[%s8663_s19 + $0x40] sm:$0xff]  ;;  %v1588_v19 = vand.u32 127, %v1585_v17 }
 0x1f7   : > { %6699 = vmatprep.subr.bf16.mxu0 %v6698_v25  ;;  %v6754_v62 = vpack.c.bf16 %v1330_v61, %v1329_v59  ;;  %v6758_v1 = vpack.c.bf16 %v1332_v0, %v1331_v63  ;;  %v1334_v3 = vld [vmem:[%s8663_s19 + $0x38] sm:$0xff]  ;;  %v1336_v6 = vld [vmem:[%s8663_s19 + $0x48] sm:$0xff]  ;;  %v1337_v8 = vld [vmem:[%s8663_s19 + $0x50] sm:$0xff] }
 0x1f8   : > { %v6762_v4 = vpack.c.bf16 %v1334_v3, %v1333_v2  ;;  %v6766_v7 = vpack.c.bf16 %v1336_v6, %v1335_v5  ;;  %v1338_v9 = vld [vmem:[%s8663_s19 + $0x58] sm:$0xff]  ;;  %v1339_v11 = vld [vmem:[%s8663_s19 + $0x60] sm:$0xff]  ;;  %v1340_v12 = vld [vmem:[%s8663_s19 + $0x68] sm:$0xff]  ;;  %vm8838_vm2 = vcmp.ge.s32.totalorder %v8835_v18, %v1588_v19 }
 0x1f9   : > { %6733 = vmatpush3.bf16.msra.mxu1 %v6730_v24  ;;  %v6770_v10 = vpack.c.bf16 %v1338_v9, %v1337_v8  ;;  %v6774_v13 = vpack.c.bf16 %v1340_v12, %v1339_v11  ;;  %v1341_v14 = vld [vmem:[%s8663_s19 + $0x70] sm:$0xff]  ;;  %v1342_v15 = vld [vmem:[%s8663_s19 + $0x78] sm:$0xff] }
 0x1fa   : > { %6701 = vmatpush3.bf16.msra.mxu0 %v6698_v25  ;;  %6735 = vmatprep.subr.bf16.mxu1 %v6734_v31  ;;  %v6778_v16 = vpack.c.bf16 %v1342_v15, %v1341_v14 }
 0x1fb   : > { %6703 = vmatprep.subr.bf16.mxu0 %v6702_v32 }
 0x1fd   : > { %6737 = vmatpush3.bf16.msra.mxu1 %v6734_v31 }
 0x1fe   : > { %6705 = vmatpush3.bf16.msra.mxu0 %v6702_v32  ;;  %6739 = vmatprep.subr.bf16.mxu1 %v6738_v37 }
 0x1ff   : > { %6707 = vmatprep.subr.bf16.mxu0 %v6706_v38 }
 0x201   : > { %6741 = vmatpush3.bf16.msra.mxu1 %v6738_v37 }
 0x202   : > { %6709 = vmatpush3.bf16.msra.mxu0 %v6706_v38  ;;  %6743 = vmatprep.subr.bf16.mxu1 %v6742_v43 }
 0x203   : > { %6711 = vmatprep.subr.bf16.mxu0 %v6710_v44 }
 0x205   : > { %6745 = vmatpush3.bf16.msra.mxu1 %v6742_v43 }
 0x206   : > { %6713 = vmatpush3.bf16.msra.mxu0 %v6710_v44  ;;  %6747 = vmatprep.subr.bf16.mxu1 %v6746_v49 }
 0x207   : > { %6715 = vmatprep.subr.bf16.mxu0 %v6714_v50 }
 0x209   : > { %6749 = vmatpush3.bf16.msra.mxu1 %v6746_v49 }
 0x20a   : > { %6717 = vmatpush3.bf16.msra.mxu0 %v6714_v50  ;;  %6351 = vmatprep.subr.mxu1 %v7888_v52 }
 0x20b   : > { %6751 = vmatprep.subr.bf16.mxu0 %v6750_v60 }
 0x20c   : > { %6314 = vmatmul.mubr.f32.vlgmr.msra.gmra.mrb[0].mxu1 %v8791_v51 }
 0x20d   : > { %6279 = vmatmul.mubr.f32.vlgmr.msra.gmra.mrb[0].mxu0 %v8791_v51  ;;  %6353 = vmatprep.mubr.msk.f32.mxu1 %vm7889_vm0, %v7888_v52 }
 0x20e   : > { %6348 = vmatprep.mubr.f32.mxu0 %v8772_v28  ;;  %6753 = vmatpush3.bf16.msra.mxu0 %v6750_v60 }
 0x20f   : > { %6755 = vmatprep.subr.bf16.mxu0 %v6754_v62 }
 0x212   : > { %6757 = vmatpush3.bf16.msra.mxu0 %v6754_v62 }
 0x213   : > { %6759 = vmatprep.subr.bf16.mxu0 %v6758_v1 }
 0x216   : > { %6761 = vmatpush3.bf16.msra.mxu0 %v6758_v1 }
 0x217   : > { %6763 = vmatprep.subr.bf16.mxu0 %v6762_v4 }
 0x21a   : > { %6765 = vmatpush3.bf16.msra.mxu0 %v6762_v4 }
 0x21b   : > { %6767 = vmatprep.subr.bf16.mxu0 %v6766_v7 }
 0x21e   : > { %6769 = vmatpush3.bf16.msra.mxu0 %v6766_v7 }
 0x21f   : > { %6771 = vmatprep.subr.bf16.mxu0 %v6770_v10 }
 0x222   : > { %6773 = vmatpush3.bf16.msra.mxu0 %v6770_v10 }
 0x223   : > { %6775 = vmatprep.subr.bf16.mxu0 %v6774_v13 }
 0x226   : > { %6777 = vmatpush3.bf16.msra.mxu0 %v6774_v13 }
 0x227   : > { %6779 = vmatprep.subr.bf16.mxu0 %v6778_v16 }
 0x22a   : > { %6781 = vmatpush3.bf16.msra.mxu0 %v6778_v16 }
 0x22d   : > { %6349 = vmatmul.mubr.f32.vlgmr.msra.gmra.mrb[2].mxu0 %v8791_v51 }
 0x2df   : > { %v8799_v53 = vpop.f32.mrb[0].mxu1 }
 0x2e0   : > { %v8801_v54 = vpop.f32.mrb[1].mxu1  ;;  %v8803_v55 = vpop.f32.mrb[0].mxu0 }
 0x2e1   : > { %1755 = vrot.lane.b32.xlu1 %v8801_v54, %s7890_s12  ;;  %6352 = vmatpush3.xpose.msk.msra.mxu1 %vm1590_vm1, %v8801_v54  ;;  %v8809_v56 = vpop.f32.mrb[1].mxu0 }
 0x2e2   : > { %6356 = vmatprep.subr.mxu1 %v7888_v52 }
 0x2e4   : > { %6354 = vmatmul.mubr.msk.f32.vlgmr.msra.gmra.mrb[2].mxu1 %vm1590_vm1, %v8809_v56 }
 0x2e5   : > { %1753 = vrot.lane.b32.xlu1 %v8809_v56, %s7890_s12  ;;  %6358 = vmatprep.mubr.msk.f32.mxu1 %vm7889_vm0, %v7888_v52 }
 0x300   : > { %v8846_v31 = vpop.f32.mrb[2].mxu0 }
 0x301   : > { %v8848_v32 = vpop.f32.mrb[3].mxu0 }
 0x302   : > { %6357 = vmatpush3.msra.mxu1 %v8848_v32 }
 0x303   : > { %6361 = vmatprep.subr.mxu1 %v7888_v52 }
 0x353   : > { %v1756_v35 = vpop.permute.xlu1 %1755 }
 0x357   : > { %v1754_v37 = vpop.permute.xlu1 %1753 }
 0x3b7   : > { %v1663_v21 = vpop.f32.mrb[2].mxu1 }
 0x3b8   : > { %v1667_v22 = vsel %vm8838_vm2, %v1663_v21, -1e+30  ;;  %v6355_v23 = vpop.f32.mrb[3].mxu1 }
 0x3b9   : > { %v1669_v24 = vsel %vm1668_vm3, %v1667_v22, -inf }
 0x3ba   : > { %1670 = vmax.xlane.f32.xlu0 %v1669_v24 }
 0x447   : > { %v1671_v25 = vpop.xlane.xlu0 %1670 }
 0x448   : > { %v1672_v26 = vsub.f32 %v1667_v22, %v1671_v25 }
 0x44a   : > { %v1673_v27 = vmul.f32 1.442695, %v1672_v26 }
 0x44c   : > { %7268 = vpow2.f32 %v1673_v27 }
 0x456   : > { %v7269_v29 = vpop.eup %7268 }
 0x457   : > { %v1675_v30 = vsel %vm1668_vm3, %v7269_v29, 0.0 }
 0x458   : > { %1676 = vadd.xlane.f32.xlu0 %v1675_v30 }
 0x4e5   : > { %v1677_v33 = vpop.xlane.xlu0 %1676 }
 0x4e6   : > { %7270 = vrcp.f32 %v1677_v33 }
 0x4f0   : > { %v7271_v34 = vpop.eup %7270 }
 0x4f1   : > { %v1679_v36 = vmul.f32 %v7271_v34, %v7269_v29 }
 0x4f3   : > { %6359 = vmatmul.mubr.msk.f32.vlgmr.msra.gmra.mrb[4].mxu1 %vm1668_vm3, %v1679_v36 }
 0x4f4   : > { %6362 = vmatpush3.xpose.msk.msra.mxu1 %vm1590_vm1, %v1756_v35  ;;  %6363 = vmatprep.mubr.msk.f32.mxu1 %vm7889_vm0, %v7888_v52 }
 0x4f5   : > { %6366 = vmatprep.subr.mxu1 %v7888_v52 }
 0x4f7   : > { %6364 = vmatmul.mubr.msk.f32.vlgmr.msra.gmra.mrb[6].mxu1 %vm1590_vm1, %v1754_v37 }
 0x4f8   : > { %6368 = vmatprep.mubr.msk.f32.mxu1 %vm7889_vm0, %v7888_v52 }
 0x5c6   : > { %v8860_v38 = vpop.f32.mrb[4].mxu1 }
 0x5c7   : > { %v6360_v39 = vpop.f32.mrb[5].mxu1 }
 0x5ca   : > { %v1827_v40 = vpop.f32.mrb[6].mxu1 }
 0x5cb   : > { %v1831_v41 = vsel %vm8838_vm2, %v1827_v40, -1e+30  ;;  %v6365_v42 = vpop.f32.mrb[7].mxu1 }
 0x5cc   : > { %v1832_v43 = vsel %vm1668_vm3, %v1831_v41, -inf }
 0x5cd   : > { %1833 = vmax.xlane.f32.xlu0 %v1832_v43 }
 0x5e3   : > { %1844 = vrot.lane.b32.xlu0 %v8848_v32, %s7890_s12 }
 0x5e7   : > { %1922 = vrot.lane.b32.xlu0 %v8801_v54, %s7891_s15 }
 0x5eb   : > { %1920 = vrot.lane.b32.xlu0 %v8809_v56, %s7891_s15 }
 0x65a   : > { %v1834_v44 = vpop.xlane.xlu0 %1833 }
 0x65b   : > { %v1835_v45 = vsub.f32 %v1831_v41, %v1834_v44 }
 0x65d   : > { %v1836_v46 = vmul.f32 1.442695, %v1835_v45 }
 0x65e   : > { %v1845_v47 = vpop.permute.xlu0 %1844 }
 0x65f   : > { %7272 = vpow2.f32 %v1836_v46  ;;  %6367 = vmatpush3.msra.mxu1 %v1845_v47 }
 0x660   : > { %6371 = vmatprep.subr.mxu1 %v7888_v52 }
 0x662   : > { %v1923_v58 = vpop.permute.xlu0 %1922 }
 0x666   : > { %v1921_v60 = vpop.permute.xlu0 %1920 }
 0x669   : > { %v7273_v48 = vpop.eup %7272 }
 0x66a   : > { %v1838_v49 = vsel %vm1668_vm3, %v7273_v48, 0.0 }
 0x66b   : > { %1839 = vadd.xlane.f32.xlu1 %v1838_v49 }
 0x67c   : > { %2010 = vrot.lane.b32.xlu1 %v8848_v32, %s7891_s15 }
 0x680   : > { %2088 = vrot.lane.b32.xlu1 %v8801_v54, %s7892_s23 }
 0x6f8   : > { %v1840_v50 = vpop.xlane.xlu1 %1839 }
 0x6f9   : > { %7274 = vrcp.f32 %v1840_v50 }
 0x6fc   : > { %v2011_v61 = vpop.permute.xlu1 %2010 }
 0x700   : > { %v2089_v8 = vpop.permute.xlu1 %2088 }
 0x703   : > { %v7275_v57 = vpop.eup %7274 }
 0x704   : > { %v1842_v59 = vmul.f32 %v7275_v57, %v7273_v48 }
 0x706   : > { %6369 = vmatmul.mubr.msk.f32.vlgmr.msra.gmra.mrb[8].mxu1 %vm1668_vm3, %v1842_v59 }
 0x707   : > { %6372 = vmatpush3.xpose.msk.msra.mxu1 %vm1590_vm1, %v1923_v58  ;;  %6373 = vmatprep.mubr.msk.f32.mxu1 %vm7889_vm0, %v7888_v52 }
 0x708   : > { %6376 = vmatprep.subr.mxu1 %v7888_v52 }
 0x70a   : > { %6374 = vmatmul.mubr.msk.f32.vlgmr.msra.gmra.mrb[10].mxu1 %vm1590_vm1, %v1921_v60 }
 0x70b   : > { %6377 = vmatpush3.msra.mxu1 %v2011_v61  ;;  %6378 = vmatprep.mubr.msk.f32.mxu1 %vm7889_vm0, %v7888_v52 }
 0x70c   : > { %6381 = vmatprep.subr.mxu1 %v7888_v52 }
 0x7d9   : > { %v8886_v54 = vpop.f32.mrb[8].mxu1 }
 0x7da   : > { %v6370_v62 = vpop.f32.mrb[9].mxu1 }
 0x7dd   : > { %v1994_v63 = vpop.f32.mrb[10].mxu1 }
 0x7de   : > { %v1998_v0 = vsel %vm8838_vm2, %v1994_v63, -1e+30  ;;  %v6375_v1 = vpop.f32.mrb[11].mxu1 }
 0x7df   : > { %v1999_v2 = vsel %vm1668_vm3, %v1998_v0, -inf }
 0x7e0   : > { %2000 = vmax.xlane.f32.xlu0 %v1999_v2 }
 0x86d   : > { %v2001_v3 = vpop.xlane.xlu0 %2000 }
 0x86e   : > { %v2002_v4 = vsub.f32 %v1998_v0, %v2001_v3 }
 0x870   : > { %v2003_v5 = vmul.f32 1.442695, %v2002_v4 }
 0x872   : > { %7276 = vpow2.f32 %v2003_v5 }
 0x87c   : > { %v7277_v6 = vpop.eup %7276 }
 0x87d   : > { %v2005_v7 = vsel %vm1668_vm3, %v7277_v6, 0.0 }
 0x87e   : > { %2006 = vadd.xlane.f32.xlu1 %v2005_v7 }
 0x88f   : > { %2086 = vrot.lane.b32.xlu1 %v8809_v56, %s7892_s23 }
 0x90b   : > { %v2007_v9 = vpop.xlane.xlu1 %2006 }
 0x90c   : > { %7278 = vrcp.f32 %v2007_v9 }
 0x90f   : > { %v2087_v12 = vpop.permute.xlu1 %2086 }
 0x916   : > { %v7279_v10 = vpop.eup %7278 }
 0x917   : > { %v2009_v11 = vmul.f32 %v7279_v10, %v7277_v6 }
 0x919   : > { %6379 = vmatmul.mubr.msk.f32.vlgmr.msra.gmra.mrb[12].mxu1 %vm1668_vm3, %v2009_v11 }
 0x91a   : > { %6382 = vmatpush3.xpose.msk.msra.mxu1 %vm1590_vm1, %v2089_v8  ;;  %6383 = vmatprep.mubr.msk.f32.mxu1 %vm7889_vm0, %v7888_v52 }
 0x91b   : > { %6386 = vmatprep.subr.mxu1 %v7888_v52 }
 0x91d   : > { %6384 = vmatmul.mubr.msk.f32.vlgmr.msra.gmra.mrb[14].mxu1 %vm1590_vm1, %v2087_v12 }
 0x91e   : > { %6388 = vmatprep.mubr.msk.f32.mxu1 %vm7889_vm0, %v7888_v52 }
 0x9ec   : > { %v8902_v56 = vpop.f32.mrb[12].mxu1 }
 0x9ed   : > { %v6380_v13 = vpop.f32.mrb[13].mxu1 }
 0x9f0   : > { %v2160_v14 = vpop.f32.mrb[14].mxu1 }
 0x9f1   : > { %v2164_v15 = vsel %vm8838_vm2, %v2160_v14, -1e+30  ;;  %v6385_v16 = vpop.f32.mrb[15].mxu1 }
 0x9f2   : > { %v2165_v17 = vsel %vm1668_vm3, %v2164_v15, -inf }
 0x9f3   : > { %2166 = vmax.xlane.f32.xlu0 %v2165_v17 }
 0xa09   : > { %2176 = vrot.lane.b32.xlu0 %v8848_v32, %s7892_s23 }
 0xa80   : > { %v2167_v19 = vpop.xlane.xlu0 %2166 }
 0xa81   : > { %v2168_v21 = vsub.f32 %v2164_v15, %v2167_v19 }
 0xa83   : > { %v2169_v22 = vmul.f32 1.442695, %v2168_v21 }
 0xa84   : > { %v2177_v23 = vpop.permute.xlu0 %2176 }
 0xa85   : > { %7280 = vpow2.f32 %v2169_v22  ;;  %6387 = vmatpush3.msra.mxu1 %v2177_v23 }
 0xa86   : > { %6391 = vmatprep.subr.mxu1 %v7888_v52 }
 0xa8f   : > { %v7281_v24 = vpop.eup %7280 }
 0xa90   : > { %v2171_v25 = vsel %vm1668_vm3, %v7281_v24, 0.0 }
 0xa91   : > { %2172 = vadd.xlane.f32.xlu1 %v2171_v25 }
 0xb1e   : > { %v2173_v26 = vpop.xlane.xlu1 %2172 }
 0xb1f   : > { %7282 = vrcp.f32 %v2173_v26 }
 0xb29   : > { %v7283_v27 = vpop.eup %7282 }
 0xb2a   : > { %v2175_v29 = vmul.f32 %v7283_v27, %v7281_v24 }
 0xb2c   : > { %6389 = vmatmul.mubr.msk.f32.vlgmr.msra.gmra.mrb[16].mxu1 %vm1668_vm3, %v2175_v29 }
 0xb2d   : > { %6392 = vmatpush3.xpose.msk.msra.mxu1 %vm1590_vm1, %v8799_v53  ;;  %6393 = vmatprep.mubr.msk.f32.mxu1 %vm7889_vm0, %v7888_v52 }
 0xb2e   : > { %6396 = vmatprep.subr.mxu1 %v7888_v52 }
 0xb30   : > { %6394 = vmatmul.mubr.msk.f32.vlgmr.msra.gmra.mrb[18].mxu1 %vm1590_vm1, %v8803_v55 }
 0xb31   : > { %6397 = vmatpush3.msra.mxu1 %v8846_v31  ;;  %6398 = vmatprep.mubr.msk.f32.mxu1 %vm7889_vm0, %v7888_v52 }
 0xb32   : > { %6401 = vmatprep.subr.mxu1 %v7888_v52 }
 0xbff   : > { %v8923_v30 = vpop.f32.mrb[16].mxu1 }
 0xc00   : > { %v6390_v32 = vpop.f32.mrb[17].mxu1 }
 0xc03   : > { %v2341_v33 = vpop.f32.mrb[18].mxu1 }
 0xc04   : > { %v2345_v34 = vsel %vm8838_vm2, %v2341_v33, -1e+30  ;;  %v6395_v35 = vpop.f32.mrb[19].mxu1 }
 0xc05   : > { %v2346_v36 = vsel %vm1668_vm3, %v2345_v34, -inf }
 0xc06   : > { %2347 = vmax.xlane.f32.xlu0 %v2346_v36 }
 0xc1c   : > { %2430 = vrot.lane.b32.xlu0 %v8803_v55, %s7890_s12 }
 0xc93   : > { %v2348_v37 = vpop.xlane.xlu0 %2347 }
 0xc94   : > { %v2349_v39 = vsub.f32 %v2345_v34, %v2348_v37 }
 0xc96   : > { %v2350_v40 = vmul.f32 1.442695, %v2349_v39 }
 0xc97   : > { %v2431_v47 = vpop.permute.xlu0 %2430 }
 0xc98   : > { %7284 = vpow2.f32 %v2350_v40 }
 0xca2   : > { %v7285_v41 = vpop.eup %7284 }
 0xca3   : > { %v2352_v42 = vsel %vm1668_vm3, %v7285_v41, 0.0 }
 0xca4   : > { %2353 = vadd.xlane.f32.xlu1 %v2352_v42  ;;  %v1344_v42 = vld [vmem:[%s8665_s26 + $0x8] sm:$0xff] }
 0xcb5   : > { %2432 = vrot.lane.b32.xlu1 %v8799_v53, %s7890_s12 }
 0xd31   : > { %v2354_v43 = vpop.xlane.xlu1 %2353 }
 0xd32   : > { %7286 = vrcp.f32 %v2354_v43  ;;  %v1345_v43 = vld [vmem:[%s8665_s26 + $0x10] sm:$0xff] }
 0xd35   : > { %v2433_v46 = vpop.permute.xlu1 %2432 }
 0xd3c   : > { %v7287_v44 = vpop.eup %7286 }
 0xd3d   : > { %v2356_v45 = vmul.f32 %v7287_v44, %v7285_v41  ;;  %v1343_v41 = vld [vmem:[%s8665_s26] sm:$0xff] }
 0xd3e   : > { %v6782_v44 = vpack.c.bf16 %v1344_v42, %v1343_v41  ;;  %v3074_v42 = vld [vmem:[%s8671_s27 + $0x20] sm:$0xff] }
 0xd3f   : > { %6399 = vmatmul.mubr.msk.f32.vlgmr.msra.gmra.mrb[20].mxu1 %vm1668_vm3, %v2356_v45  ;;  %v1346_v45 = vld [vmem:[%s8665_s26 + $0x18] sm:$0xff] }
 0xd40   : > { %6402 = vmatpush3.xpose.msk.msra.mxu1 %vm1590_vm1, %v2433_v46  ;;  %6403 = vmatprep.mubr.msk.f32.mxu1 %vm7889_vm0, %v7888_v52  ;;  %v6786_v46 = vpack.c.bf16 %v1346_v45, %v1345_v43  ;;  %v3075_v43 = vld [vmem:[%s8671_s27 + $0x28] sm:$0xff]  ;;  %v3092_v45 = vld [vmem:[%s8673_s3 + $0x30] sm:$0xff] }
 0xd41   : > { %6406 = vmatprep.subr.mxu1 %v7888_v52  ;;  %6783 = vmatprep.subr.bf16.mxu0 %v6782_v44 }
 0xd42   : > { %6785 = vmatpush3.bf16.msra.mxu0 %v6782_v44 }
 0xd43   : > { %6404 = vmatmul.mubr.msk.f32.vlgmr.msra.gmra.mrb[22].mxu1 %vm1590_vm1, %v2431_v47  ;;  %v1347_v47 = vld [vmem:[%s8665_s26 + $0x20] sm:$0xff]  ;;  %6787 = vmatprep.subr.bf16.mxu0 %v6786_v46 }
 0xd44   : > { %6408 = vmatprep.mubr.msk.f32.mxu1 %vm7889_vm0, %v7888_v52 }
 0xd46   : > { %6789 = vmatpush3.bf16.msra.mxu0 %v6786_v46  ;;  %v3093_v46 = vld [vmem:[%s8673_s3 + $0x38] sm:$0xff] }
 0xe12   : > { %v8941_v48 = vpop.f32.mrb[20].mxu1 }
 0xe13   : > { %v6400_v49 = vpop.f32.mrb[21].mxu1 }
 0xe14   : > { %v1348_v49 = vld [vmem:[%s8665_s26 + $0x28] sm:$0xff] }
 0xe16   : > { %v2504_v50 = vpop.f32.mrb[22].mxu1 }
 0xe17   : > { %v2508_v57 = vsel %vm8838_vm2, %v2504_v50, -1e+30  ;;  %v6405_v58 = vpop.f32.mrb[23].mxu1  ;;  %v6790_v50 = vpack.c.bf16 %v1348_v49, %v1347_v47  ;;  %v6822_v47 = vpack.c.bf16 %v3075_v43, %v3074_v42  ;;  %v6858_v49 = vpack.c.bf16 %v3093_v46, %v3092_v45  ;;  %v3102_v42 = vld [vmem:[%s9790_s20] sm:$0xff]  ;;  %v3103_v43 = vld [vmem:[%s9790_s20 + $0x8] sm:$0xff]  ;;  %v3104_v45 = vld [vmem:[%s9790_s20 + $0x10] sm:$0xff] }
 0xe18   : > { %v2509_v59 = vsel %vm1668_vm3, %v2508_v57, -inf  ;;  %v1350_v58 = vld [vmem:[%s8665_s26 + $0x38] sm:$0xff] }
 0xe19   : > { %2510 = vmax.xlane.f32.xlu1 %v2509_v59  ;;  %6791 = vmatprep.subr.bf16.mxu0 %v6790_v50  ;;  %v3105_v46 = vld [vmem:[%s9790_s20 + $0x18] sm:$0xff] }
 0xe1a   : > { %6793 = vmatpush3.bf16.msra.mxu0 %v6790_v50  ;;  %v3094_v50 = vld [vmem:[%s8673_s3 + $0x40] sm:$0xff] }
 0xe2a   : > { %2521 = vrot.lane.b32.xlu1 %v8846_v31, %s7890_s12 }
 0xe2e   : > { %2597 = vrot.lane.b32.xlu1 %v8803_v55, %s7891_s15 }
 0xea6   : > { %v2511_v60 = vpop.xlane.xlu1 %2510 }
 0xea7   : > { %v2512_v61 = vsub.f32 %v2508_v57, %v2511_v60  ;;  %v1349_v57 = vld [vmem:[%s8665_s26 + $0x30] sm:$0xff]  ;;  %v1351_v60 = vld [vmem:[%s8665_s26 + $0x40] sm:$0xff] }
 0xea8   : > { %v6794_v59 = vpack.c.bf16 %v1350_v58, %v1349_v57  ;;  %v3095_v57 = vld [vmem:[%s8673_s3 + $0x48] sm:$0xff] }
 0xea9   : > { %v2513_v62 = vmul.f32 1.442695, %v2512_v61  ;;  %v1352_v61 = vld [vmem:[%s8665_s26 + $0x48] sm:$0xff]  ;;  %v6862_v58 = vpack.c.bf16 %v3095_v57, %v3094_v50  ;;  %v3106_v50 = vld [vmem:[%s9790_s20 + $0x20] sm:$0xff] }
 0xeaa   : > { %v2522_v63 = vpop.permute.xlu1 %2521  ;;  %6795 = vmatprep.subr.bf16.mxu0 %v6794_v59  ;;  %v3107_v57 = vld [vmem:[%s9790_s20 + $0x28] sm:$0xff] }
 0xeab   : > { %7288 = vpow2.f32 %v2513_v62  ;;  %6407 = vmatpush3.msra.mxu1 %v2522_v63  ;;  %v6798_v62 = vpack.c.bf16 %v1352_v61, %v1351_v60  ;;  %v1353_v63 = vld [vmem:[%s8665_s26 + $0x50] sm:$0xff]  ;;  %6797 = vmatpush3.bf16.msra.mxu0 %v6794_v59 }
 0xeac   : > { %6411 = vmatprep.subr.mxu1 %v7888_v52 }
 0xead   : > { %6799 = vmatprep.subr.bf16.mxu0 %v6798_v62 }
 0xeae   : > { %v2598_v6 = vpop.permute.xlu1 %2597 }
 0xeaf   : > { %6801 = vmatpush3.bf16.msra.mxu0 %v6798_v62 }
 0xeb5   : > { %v7289_v0 = vpop.eup %7288 }
 0xeb6   : > { %v2515_v1 = vsel %vm1668_vm3, %v7289_v0, 0.0 }
 0xeb7   : > { %2516 = vadd.xlane.f32.xlu0 %v2515_v1 }
 0xecd   : > { %2599 = vrot.lane.b32.xlu0 %v8799_v53, %s7891_s15 }
 0xf44   : > { %v2517_v2 = vpop.xlane.xlu0 %2516 }
 0xf45   : > { %7290 = vrcp.f32 %v2517_v2  ;;  %v1355_v2 = vld [vmem:[%s8665_s26 + $0x60] sm:$0xff] }
 0xf48   : > { %v2600_v5 = vpop.permute.xlu0 %2599 }
 0xf4f   : > { %v7291_v3 = vpop.eup %7290 }
 0xf50   : > { %v2519_v4 = vmul.f32 %v7291_v3, %v7289_v0  ;;  %v1354_v0 = vld [vmem:[%s8665_s26 + $0x58] sm:$0xff]  ;;  %v1356_v3 = vld [vmem:[%s8665_s26 + $0x68] sm:$0xff] }
 0xf51   : > { %v6802_v1 = vpack.c.bf16 %v1354_v0, %v1353_v63 }
 0xf52   : > { %6409 = vmatmul.mubr.msk.f32.vlgmr.msra.gmra.mrb[24].mxu1 %vm1668_vm3, %v2519_v4  ;;  %v6806_v4 = vpack.c.bf16 %v1356_v3, %v1355_v2  ;;  %v3096_v3 = vld [vmem:[%s8673_s3 + $0x50] sm:$0xff] }
 0xf53   : > { %6412 = vmatpush3.xpose.msk.msra.mxu1 %vm1590_vm1, %v2600_v5  ;;  %6413 = vmatprep.mubr.msk.f32.mxu1 %vm7889_vm0, %v7888_v52  ;;  %v1357_v5 = vld [vmem:[%s8665_s26 + $0x70] sm:$0xff] }
 0xf54   : > { %6416 = vmatprep.subr.mxu1 %v7888_v52  ;;  %6803 = vmatprep.subr.bf16.mxu0 %v6802_v1 }
 0xf55   : > { %6805 = vmatpush3.bf16.msra.mxu0 %v6802_v1 }
 0xf56   : > { %6414 = vmatmul.mubr.msk.f32.vlgmr.msra.gmra.mrb[26].mxu1 %vm1590_vm1, %v2598_v6  ;;  %6807 = vmatprep.subr.bf16.mxu0 %v6806_v4  ;;  %v1358_v6 = vld [vmem:[%s8665_s26 + $0x78] sm:$0xff]  ;;  %s9785_s26 = sld [smem:[#allocation64_spill]] }
 0xf57   : > { %6418 = vmatprep.mubr.msk.f32.mxu1 %vm7889_vm0, %v7888_v52 }
 0xf59   : > { %6809 = vmatpush3.bf16.msra.mxu0 %v6806_v4  ;;  %v3097_v4 = vld [vmem:[%s8673_s3 + $0x58] sm:$0xff] }
 0xf5c   : > { %s9786_s29 = scalar_lea.vmem %s9785_s26, %s8699_s17  ;;  %s9800_s26 = sld [smem:[#allocation73_spill]] }
0x1025   : > { %v2593_v7 = vpop.f32.mrb[24].mxu1 }
0x1026   : > { %v7238_v8 = vpack.i.bf16 %v2593_v7, %v8886_v54  ;;  %v6410_v9 = vpop.f32.mrb[25].mxu1  ;;  %v6810_v7 = vpack.c.bf16 %v1358_v6, %v1357_v5  ;;  %v3076_v5 = vld [vmem:[%s8671_s27 + $0x30] sm:$0xff]  ;;  %v3077_v6 = vld [vmem:[%s8671_s27 + $0x38] sm:$0xff] }
0x1028   : > { %6811 = vmatprep.subr.bf16.mxu0 %v6810_v7 }
0x1029   : > { %v2671_v10 = vpop.f32.mrb[26].mxu1  ;;  %6813 = vmatpush3.bf16.msra.mxu0 %v6810_v7  ;;  %v6866_v7 = vpack.c.bf16 %v3097_v4, %v3096_v3  ;;  %v3112_v3 = vld [vmem:[%s9790_s20 + $0x50] sm:$0xff]  ;;  %v3113_v4 = vld [vmem:[%s9790_s20 + $0x58] sm:$0xff] }
0x102a   : > { %v2675_v11 = vsel %vm8838_vm2, %v2671_v10, -1e+30  ;;  %v6415_v12 = vpop.f32.mrb[27].mxu1 }
0x102b   : > { %v2676_v13 = vsel %vm1668_vm3, %v2675_v11, -inf }
0x102c   : > { %2677 = vmax.xlane.f32.xlu1 %v2676_v13 }
0x103d   : > { %2687 = vrot.lane.b32.xlu1 %v8846_v31, %s7891_s15 }
0x1041   : > { %2763 = vrot.lane.b32.xlu1 %v8803_v55, %s7892_s23 }
0x10b9   : > { %v2678_v14 = vpop.xlane.xlu1 %2677 }
0x10ba   : > { %v2679_v15 = vsub.f32 %v2675_v11, %v2678_v14 }
0x10bc   : > { %v2680_v16 = vmul.f32 1.442695, %v2679_v15 }
0x10bd   : > { %v2688_v17 = vpop.permute.xlu1 %2687 }
0x10be   : > { %7292 = vpow2.f32 %v2680_v16  ;;  %6417 = vmatpush3.msra.mxu1 %v2688_v17 }
0x10bf   : > { %6421 = vmatprep.subr.mxu1 %v7888_v52 }
0x10c1   : > { %v2764_v24 = vpop.permute.xlu1 %2763 }
0x10c8   : > { %v7293_v54 = vpop.eup %7292 }
0x10c9   : > { %v2682_v19 = vsel %vm1668_vm3, %v7293_v54, 0.0 }
0x10ca   : > { %2683 = vadd.xlane.f32.xlu0 %v2682_v19 }
0x10e0   : > { %2765 = vrot.lane.b32.xlu0 %v8799_v53, %s7892_s23 }
0x1157   : > { %v2684_v21 = vpop.xlane.xlu0 %2683 }
0x1158   : > { %7294 = vrcp.f32 %v2684_v21 }
0x115b   : > { %v2766_v55 = vpop.permute.xlu0 %2765 }
0x1162   : > { %v7295_v22 = vpop.eup %7294 }
0x1163   : > { %v2686_v23 = vmul.f32 %v7295_v22, %v7293_v54 }
0x1165   : > { %6419 = vmatmul.mubr.msk.f32.vlgmr.msra.gmra.mrb[28].mxu1 %vm1668_vm3, %v2686_v23 }
0x1166   : > { %6422 = vmatpush3.xpose.msk.msra.mxu1 %vm1590_vm1, %v2766_v55  ;;  %6423 = vmatprep.mubr.msk.f32.mxu1 %vm7889_vm0, %v7888_v52 }
0x1167   : > { %6426 = vmatprep.subr.mxu1 %v7888_v52 }
0x1169   : > { %6424 = vmatmul.mubr.msk.f32.vlgmr.msra.gmra.mrb[30].mxu1 %vm1590_vm1, %v2764_v24 }
0x116a   : > { %6428 = vmatprep.mubr.msk.f32.mxu1 %vm7889_vm0, %v7888_v52 }
0x1238   : > { %v2759_v53 = vpop.f32.mrb[28].mxu1 }
0x1239   : > { %v7243_v25 = vpack.i.bf16 %v2759_v53, %v8902_v56  ;;  %v6420_v26 = vpop.f32.mrb[29].mxu1 }
0x123c   : > { %v2837_v27 = vpop.f32.mrb[30].mxu1 }
0x123d   : > { %v2841_v29 = vsel %vm8838_vm2, %v2837_v27, -1e+30  ;;  %v6425_v32 = vpop.f32.mrb[31].mxu1 }
0x123e   : > { %v2842_v33 = vsel %vm1668_vm3, %v2841_v29, -inf  ;;  %v3086_v32 = vld [vmem:[%s8673_s3] sm:$0xff] }
0x123f   : > { %2843 = vmax.xlane.f32.xlu1 %v2842_v33  ;;  %v3087_v33 = vld [vmem:[%s8673_s3 + $0x8] sm:$0xff] }
0x1250   : > { %2853 = vrot.lane.b32.xlu1 %v8846_v31, %s7892_s23 }
0x1254   : > { %7244 = vrot.lane.b32.xlu1 %v7243_v25, %s7891_s15 }
0x12cc   : > { %v2844_v34 = vpop.xlane.xlu1 %2843 }
0x12cd   : > { %v2845_v35 = vsub.f32 %v2841_v29, %v2844_v34  ;;  %v3088_v34 = vld [vmem:[%s8673_s3 + $0x10] sm:$0xff] }
0x12cf   : > { %v2846_v56 = vmul.f32 1.442695, %v2845_v35  ;;  %v6846_v35 = vpack.c.bf16 %v3087_v33, %v3086_v32 }
0x12d0   : > { %v2854_v36 = vpop.permute.xlu1 %2853 }
0x12d1   : > { %7296 = vpow2.f32 %v2846_v56  ;;  %6427 = vmatpush3.msra.mxu1 %v2854_v36  ;;  %v3089_v56 = vld [vmem:[%s8673_s3 + $0x18] sm:$0xff]  ;;  %v3070_v36 = vld [vmem:[%s8671_s27] sm:$0xff]  ;;  %6847 = vmatprep.subr.bf16.mxu0 %v6846_v35 }
0x12d4   : > { %v7245_v14 = vpop.permute.xlu1 %7244 }
0x12d5   : > { %v7247_v17 = vunpack.i.h.bf16 %v7245_v14  ;;  %v7246_v54 = vunpack.i.l.bf16 %v7245_v14  ;;  %v3080_v14 = vld [vmem:[%s8671_s27 + $0x50] sm:$0xff] }
0x12db   : > { %v7297_v20 = vpop.eup %7296 }
0x12dc   : > { %v2848_v37 = vsel %vm1668_vm3, %v7297_v20, 0.0 }
0x12dd   : > { %2849 = vadd.xlane.f32.xlu0 %v2848_v37  ;;  %v6850_v37 = vpack.c.bf16 %v3089_v56, %v3088_v34 }
0x12f3   : > { %7239 = vrot.lane.b32.xlu0 %v7238_v8, %s7892_s23 }
0x136a   : > { %v2850_v31 = vpop.xlane.xlu0 %2849 }
0x136b   : > { %7298 = vrcp.f32 %v2850_v31 }
0x136e   : > { %v7240_v11 = vpop.permute.xlu0 %7239 }
0x136f   : > { %v7242_v12 = vunpack.i.h.bf16 %v7240_v11  ;;  %v7241_v13 = vunpack.i.l.bf16 %v7240_v11  ;;  %v3078_v11 = vld [vmem:[%s8671_s27 + $0x40] sm:$0xff] }
0x1371   : > { %v2941_v15 = vsel %vm1590_vm1, %v8941_v48, %v7242_v12  ;;  %v2264_v16 = vsel %vm1590_vm1, %v8860_v38, %v7241_v13  ;;  %v5911_v38 = vld [vmem:[%s9786_s29] ss:$0 sm:$0xff]  ;;  %v3079_v12 = vld [vmem:[%s8671_s27 + $0x48] sm:$0xff]  ;;  %s9801_s29 = scalar_lea.vmem %s9800_s26, %s8699_s17 }
0x1372   : > { %v2266_v22 = vsel %vm2265_vm4, %v2264_v16, %v7246_v54  ;;  %v2942_v23 = vsel %vm2265_vm4, %v2941_v15, %v7247_v17  ;;  %v6830_v15 = vpack.c.bf16 %v3079_v12, %v3078_v11  ;;  %v3081_v16 = vld [vmem:[%s8671_s27 + $0x58] sm:$0xff]  ;;  %v3100_v17 = vld [vmem:[%s8673_s3 + $0x70] sm:$0xff] }
0x1373   : > { %v3101_v54 = vld [vmem:[%s8673_s3 + $0x78] sm:$0xff] }
0x1375   : > { %v7299_v39 = vpop.eup %7298 }
0x1376   : > { %v2852_v40 = vmul.f32 %v7299_v39, %v7297_v20  ;;  %v3071_v20 = vld [vmem:[%s8671_s27 + $0x8] sm:$0xff]  ;;  %v3090_v39 = vld [vmem:[%s8673_s3 + $0x20] sm:$0xff] }
0x1377   : > { %v6814_v31 = vpack.c.bf16 %v3071_v20, %v3070_v36 }
0x1378   : > { %6429 = vmatmul.mubr.msk.f32.vlgmr.msra.gmra.mrb[32].mxu1 %vm1668_vm3, %v2852_v40  ;;  %v3072_v40 = vld [vmem:[%s8671_s27 + $0x10] sm:$0xff] }
0x1379   : > { %6815 = vmatprep.subr.bf16.mxu1 %v6814_v31 }
0x137a   : > { %6817 = vmatpush3.bf16.msra.mxu1 %v6814_v31 }
0x144b   : > { %v2925_v8 = vpop.f32.mrb[32].mxu1 }
0x144c   : > { %v7248_v9 = vpack.i.bf16 %v2925_v8, %v8923_v30  ;;  %v6430_v10 = vpop.f32.mrb[33].mxu1  ;;  %v6826_v8 = vpack.c.bf16 %v3077_v6, %v3076_v5  ;;  %v6898_v5 = vpack.c.bf16 %v3113_v4, %v3112_v3  ;;  %v3114_v6 = vld [vmem:[%s9790_s20 + $0x60] sm:$0xff] }
0x144d   : > { %v3099_v10 = vld [vmem:[%s8673_s3 + $0x68] sm:$0xff] }
0x144e   : > { %7249 = vrot.lane.b32.xlu1 %v7248_v9, %s7890_s12  ;;  %v3098_v9 = vld [vmem:[%s8673_s3 + $0x60] sm:$0xff] }
0x144f   : > { %v6870_v13 = vpack.c.bf16 %v3099_v10, %v3098_v9  ;;  %v3116_v9 = vld [vmem:[%s9790_s20 + $0x70] sm:$0xff]  ;;  %v3117_v10 = vld [vmem:[%s9790_s20 + $0x78] sm:$0xff] }
0x1450   : > { %v6906_v11 = vpack.c.bf16 %v3117_v10, %v3116_v9 }
0x14c0   : > { %v7250_v19 = vpop.permute.xlu1 %7249 }
0x14c1   : > { %v7252_v30 = vunpack.i.h.bf16 %v7250_v19  ;;  %v7251_v21 = vunpack.i.l.bf16 %v7250_v19  ;;  %v6834_v19 = vpack.c.bf16 %v3081_v16, %v3080_v14 }
0x14c3   : > { %v2268_v55 = vsel %vm2267_vm5, %v2266_v22, %v7251_v21  ;;  %v2943_v48 = vsel %vm2267_vm5, %v2942_v23, %v7252_v30  ;;  %v6874_v30 = vpack.c.bf16 %v3101_v54, %v3100_v17  ;;  %v3068_v21 = vld [vmem:[%s9787_s16] sm:$0xff]  ;;  %v3083_v23 = vld [vmem:[%s8671_s27 + $0x68] sm:$0xff]  ;;  %s9802_s16 = sld [smem:[#allocation38_spill]] }
0x14c4   : > { %6463 = vmatprep.mubr.f32.mxu0 %v2268_v55  ;;  %v3082_v22 = vld [vmem:[%s8671_s27 + $0x60] sm:$0xff] }
0x14c5   : > { %6464 = vmatmul.mubr.f32.vlgmr.msra.gmra.mrb[4].mxu0 %v2943_v48  ;;  %v6838_v55 = vpack.c.bf16 %v3083_v23, %v3082_v22  ;;  %v3084_v48 = vld [vmem:[%s8671_s27 + $0x70] sm:$0xff] }
0x14c6   : > { %6849 = vmatpush3.bf16.msra.mxu0 %v6846_v35  ;;  %6533 = vmatprep.mubr.f32.mxu0 %v3068_v21  ;;  %v5912_v35 = vld [vmem:[%s1268_s4] ss:$0 sm:$0xff]  ;;  %s9793_s4 = sld [smem:[#allocation55_spill]] }
0x14c7   : > { %6851 = vmatprep.subr.bf16.mxu0 %v6850_v37 }
0x14ca   : > { %6853 = vmatpush3.bf16.msra.mxu0 %v6850_v37  ;;  %v5913_v37 = vld [vmem:[%s1271_s13] ss:$0 sm:$0xff]  ;;  %s9792_s13 = sld [smem:[#allocation54_spill]] }
0x1598   : > { %v6465_v24 = vpop.f32.mrb[4].mxu0 }
0x1599   : > { %v3022_v53 = vadd.f32 %v6465_v24, %v5911_v38  ;;  %v3016_v25 = vpop.f32.mrb[5].mxu0  ;;  %v9069_v24 = vld [vmem:[%s9788_s18 + $0x8] sm:$0xff] }
0x159a   : > { %v3017_v26 = vadd.f32 %v5911_v38, %v3016_v25  ;;  %v3085_v38 = vld [vmem:[%s8671_s27 + $0x78] sm:$0xff] }
0x159b   : > { %v3026_v27 = vadd.f32 %v3022_v53, %v8791_v51  ;;  %v3091_v51 = vld [vmem:[%s8673_s3 + $0x28] sm:$0xff]  ;;  %v6842_v53 = vpack.c.bf16 %v3085_v38, %v3084_v48  ;;  %s9804_s3 = sld [smem:[#allocation52_spill]] }
0x159c   : > { %v3025_v29 = vadd.f32 %v3017_v26, %v8772_v28  ;;  %v3073_v28 = vld [vmem:[%s8671_s27 + $0x18] sm:$0xff]  ;;  %v6854_v44 = vpack.c.bf16 %v3091_v51, %v3090_v39 }
0x159d   : > { %3031 = vadd.xlane.f32.xlu0 %v3026_v27  ;;  %v6818_v41 = vpack.c.bf16 %v3073_v28, %v3072_v40 }
0x159e   : > { %3029 = vadd.xlane.f32.xlu1 %v3025_v29  ;;  %6855 = vmatprep.subr.bf16.mxu0 %v6854_v44 }
0x159f   : > { %6819 = vmatprep.subr.bf16.mxu1 %v6818_v41  ;;  %6857 = vmatpush3.bf16.msra.mxu0 %v6854_v44  ;;  %v6878_v44 = vpack.c.bf16 %v3103_v43, %v3102_v42 }
0x15a0   : > { %6821 = vmatpush3.bf16.msra.mxu1 %v6818_v41  ;;  %6859 = vmatprep.subr.bf16.mxu0 %v6858_v49 }
0x15a1   : > { %6823 = vmatprep.subr.bf16.mxu1 %v6822_v47  ;;  %s5403_s17 = scalar_lea.sflag [#allocation4], %s9804_s3 }
0x15a3   : > { %6861 = vmatpush3.bf16.msra.mxu0 %v6858_v49 }
0x15a4   : > { %6825 = vmatpush3.bf16.msra.mxu1 %v6822_v47  ;;  %6863 = vmatprep.subr.bf16.mxu0 %v6862_v58  ;;  %v6882_v47 = vpack.c.bf16 %v3105_v46, %v3104_v45 }
0x15a5   : > { %6827 = vmatprep.subr.bf16.mxu1 %v6826_v8 }
0x15a7   : > { %6865 = vmatpush3.bf16.msra.mxu0 %v6862_v58 }
0x15a8   : > { %6867 = vmatprep.subr.bf16.mxu0 %v6866_v7  ;;  %6829 = vmatpush3.bf16.msra.mxu1 %v6826_v8 }
0x15a9   : > { %6831 = vmatprep.subr.bf16.mxu1 %v6830_v15 }
0x15ab   : > { %6869 = vmatpush3.bf16.msra.mxu0 %v6866_v7  ;;  %v3115_v7 = vld [vmem:[%s9790_s20 + $0x68] sm:$0xff] }
0x15ac   : > { %6871 = vmatprep.subr.bf16.mxu0 %v6870_v13  ;;  %6833 = vmatpush3.bf16.msra.mxu1 %v6830_v15  ;;  %v6902_v8 = vpack.c.bf16 %v3115_v7, %v3114_v6 }
0x15ad   : > { %6835 = vmatprep.subr.bf16.mxu1 %v6834_v19 }
0x15af   : > { %6873 = vmatpush3.bf16.msra.mxu0 %v6870_v13 }
0x15b0   : > { %6875 = vmatprep.subr.bf16.mxu0 %v6874_v30  ;;  %6837 = vmatpush3.bf16.msra.mxu1 %v6834_v19 }
0x15b1   : > { %6839 = vmatprep.subr.bf16.mxu1 %v6838_v55 }
0x15b3   : > { %6877 = vmatpush3.bf16.msra.mxu0 %v6874_v30 }
0x15b4   : > { %6571 = vmatprep.subr.mxu0 %v7888_v52  ;;  %6841 = vmatpush3.bf16.msra.mxu1 %v6838_v55 }
0x15b5   : > { %6843 = vmatprep.subr.bf16.mxu1 %v6842_v53 }
0x15b6   : > { %6534 = vmatmul.mubr.f32.vlgmr.msra.gmra.mrb[6].mxu0 %v9069_v24 }
0x15b7   : > { %6573 = vmatprep.mubr.msk.f32.mxu0 %vm7889_vm0, %v7888_v52 }
0x15b8   : > { %6845 = vmatpush3.bf16.msra.mxu1 %v6842_v53 }
0x15b9   : > { %6879 = vmatprep.subr.bf16.mxu1 %v6878_v44 }
0x162a   : > { %v3032_v59 = vpop.xlane.xlu0 %3031 }
0x162b   : > { %v3035_v60 = vmul.f32 0.0078125, %v3032_v59  ;;  %v3030_v61 = vpop.xlane.xlu1 %3029  ;;  %v6886_v59 = vpack.c.bf16 %v3107_v57, %v3106_v50 }
0x162c   : > { %v3034_v62 = vmul.f32 0.0078125, %v3030_v61  ;;  %v3108_v61 = vld [vmem:[%s9790_s20 + $0x30] sm:$0xff] }
0x162d   : > { %v9041_v63 = vsub.f32 %v3026_v27, %v3035_v60 }
0x162e   : > { %v9043_v0 = vsub.f32 %v3025_v29, %v3034_v62  ;;  %v3109_v62 = vld [vmem:[%s9790_s20 + $0x38] sm:$0xff] }
0x162f   : > { %v3039_v1 = vmul.f32 %v9041_v63, %v9041_v63 }
0x1630   : > { %v3038_v2 = vmul.f32 %v9043_v0, %v9043_v0 }
0x1631   : > { %3042 = vadd.xlane.f32.xlu0 %v3039_v1  ;;  %v3111_v1 = vld [vmem:[%s9790_s20 + $0x48] sm:$0xff] }
0x1632   : > { %3040 = vadd.xlane.f32.xlu1 %v3038_v2 }
0x1689   : > { %v9093_v28 = vpop.f32.mrb[6].mxu0 }
0x168a   : > { %v3276_v41 = vpop.f32.mrb[7].mxu0 }
0x168b   : > { %3522 = vrot.lane.b32.xlu1 %v3276_v41, %s7890_s12  ;;  %6572 = vmatpush3.xpose.msk.msra.mxu0 %vm1590_vm1, %v3276_v41 }
0x168c   : > { %6581 = vmatprep.subr.mxu0 %v7888_v52 }
0x168f   : > { %3688 = vrot.lane.b32.xlu1 %v3276_v41, %s7891_s15 }
0x16be   : > { %v3043_v25 = vpop.xlane.xlu0 %3042 }
0x16bf   : > { %v3045_v26 = vmul.f32 0.0078125, %v3043_v25  ;;  %v3041_v27 = vpop.xlane.xlu1 %3040 }
0x16c0   : > { %v3044_v29 = vmul.f32 0.0078125, %v3041_v27 }
0x16c1   : > { %v3047_v32 = vadd.f32 1e-05, %v3045_v26 }
0x16c2   : > { %v3046_v33 = vadd.f32 1e-05, %v3044_v29 }
0x16c3   : > { %7300 = vrsqrt.f32 %v3047_v32 }
0x16c4   : > { %7302 = vrsqrt.f32 %v3046_v33 }
0x16cd   : > { %v7301_v34 = vpop.eup %7300 }
0x16ce   : > { %v7303_v56 = vpop.eup %7302  ;;  %v3051_v36 = vmul.f32 %v7301_v34, %v9041_v63  ;;  %v6890_v63 = vpack.c.bf16 %v3109_v62, %v3108_v61 }
0x16cf   : > { %v3050_v20 = vmul.f32 %v7303_v56, %v9043_v0  ;;  %v3110_v0 = vld [vmem:[%s9790_s20 + $0x40] sm:$0xff] }
0x16d0   : > { %v3059_v31 = vmul.f32 %v5912_v35, %v3051_v36  ;;  %v6894_v2 = vpack.c.bf16 %v3111_v1, %v3110_v0 }
0x16d1   : > { %v3058_v39 = vmul.f32 %v5912_v35, %v3050_v20 }
0x16d2   : > { %v9089_v40 = vadd.f32 %v5913_v37, %v3059_v31 }
0x16d3   : > { %v9087_v51 = vadd.f32 %v5913_v37, %v3058_v39 }
0x16d5   : > { %6498 = vmatprep.mubr.f32.mxu1 %v9087_v51 }
0x16d6   : > { %6499 = vmatmul.mubr.f32.vlgmr.msra.gmra.mrb[34].mxu1 %v9089_v40 }
0x16d7   : > { %6568 = vmatprep.mubr.f32.mxu1 %v3068_v21  ;;  %6881 = vmatpush3.bf16.msra.mxu1 %v6878_v44 }
0x16d8   : > { %6883 = vmatprep.subr.bf16.mxu1 %v6882_v47 }
0x16db   : > { %6885 = vmatpush3.bf16.msra.mxu1 %v6882_v47 }
0x16dc   : > { %6887 = vmatprep.subr.bf16.mxu1 %v6886_v59 }
0x16df   : > { %6889 = vmatpush3.bf16.msra.mxu1 %v6886_v59 }
0x16e0   : > { %6891 = vmatprep.subr.bf16.mxu1 %v6890_v63 }
0x16e3   : > { %6893 = vmatpush3.bf16.msra.mxu1 %v6890_v63 }
0x16e4   : > { %6895 = vmatprep.subr.bf16.mxu1 %v6894_v2 }
0x16e7   : > { %6897 = vmatpush3.bf16.msra.mxu1 %v6894_v2 }
0x16e8   : > { %6899 = vmatprep.subr.bf16.mxu1 %v6898_v5 }
0x16eb   : > { %6901 = vmatpush3.bf16.msra.mxu1 %v6898_v5 }
0x16ec   : > { %6903 = vmatprep.subr.bf16.mxu1 %v6902_v8 }
0x16ef   : > { %6905 = vmatpush3.bf16.msra.mxu1 %v6902_v8 }
0x16f0   : > { %6907 = vmatprep.subr.bf16.mxu1 %v6906_v11 }
0x16f3   : > { %6909 = vmatpush3.bf16.msra.mxu1 %v6906_v11 }
0x16f4   : > { %6576 = vmatprep.subr.mxu1 %v7888_v52 }
0x16f6   : > { %6569 = vmatmul.mubr.f32.vlgmr.msra.gmra.mrb[36].mxu1 %v9069_v24 }
0x16f7   : > { %6578 = vmatprep.mubr.msk.f32.mxu1 %vm7889_vm0, %v7888_v52 }
0x16fd   : > { %v3523_v60 = vpop.permute.xlu1 %3522 }
0x1701   : > { %v3689_v12 = vpop.permute.xlu1 %3688 }
0x17a9   : > { %v9103_v49 = vpop.f32.mrb[34].mxu1 }
0x17aa   : > { %v3201_v58 = vpop.f32.mrb[35].mxu1 }
0x17ab   : > { %3686 = vrot.lane.b32.xlu1 %v3201_v58, %s7891_s15  ;;  %3520 = vrot.lane.b32.xlu0 %v3201_v58, %s7890_s12 }
0x17ac   : > { %6574 = vmatmul.mubr.msk.f32.vlgmr.msra.gmra.mrb[8].mxu0 %vm1590_vm1, %v3201_v58 }
0x17ad   : > { %6582 = vmatpush3.xpose.msk.msra.mxu0 %vm1590_vm1, %v3523_v60  ;;  %6583 = vmatprep.mubr.msk.f32.mxu0 %vm7889_vm0, %v7888_v52 }
0x17ae   : > { %6591 = vmatprep.subr.mxu0 %v7888_v52 }
0x17af   : > { %3851 = vrot.lane.b32.xlu1 %v3201_v58, %s7892_s23  ;;  %3853 = vrot.lane.b32.xlu0 %v3276_v41, %s7892_s23 }
0x17b3   : > { %4191 = vrot.lane.b32.xlu1 %v9103_v49, %s7890_s12  ;;  %4193 = vrot.lane.b32.xlu0 %v9093_v28, %s7890_s12 }
0x17b7   : > { %4357 = vrot.lane.b32.xlu1 %v9103_v49, %s7891_s15  ;;  %4359 = vrot.lane.b32.xlu0 %v9093_v28, %s7891_s15 }
0x17bb   : > { %4522 = vrot.lane.b32.xlu1 %v9103_v49, %s7892_s23  ;;  %4524 = vrot.lane.b32.xlu0 %v9093_v28, %s7892_s23 }
0x17c9   : > { %v9175_v38 = vpop.f32.mrb[36].mxu1 }
0x17ca   : > { %v3351_v24 = vpop.f32.mrb[37].mxu1 }
0x17cb   : > { %6577 = vmatpush3.msra.mxu1 %v3351_v24 }
0x17cc   : > { %6586 = vmatprep.subr.mxu1 %v7888_v52 }
0x181d   : > { %v3687_v13 = vpop.permute.xlu1 %3686  ;;  %v3521_v14 = vpop.permute.xlu0 %3520 }
0x181e   : > { %6584 = vmatmul.mubr.msk.f32.vlgmr.msra.gmra.mrb[10].mxu0 %vm1590_vm1, %v3521_v14 }
0x181f   : > { %6592 = vmatpush3.xpose.msk.msra.mxu0 %vm1590_vm1, %v3689_v12  ;;  %6593 = vmatprep.mubr.msk.f32.mxu0 %vm7889_vm0, %v7888_v52 }
0x1820   : > { %6601 = vmatprep.subr.mxu0 %v7888_v52 }
0x1821   : > { %v3854_v15 = vpop.permute.xlu0 %3853  ;;  %v3852_v16 = vpop.permute.xlu1 %3851 }
0x1822   : > { %6594 = vmatmul.mubr.msk.f32.vlgmr.msra.gmra.mrb[12].mxu0 %vm1590_vm1, %v3687_v13 }
0x1823   : > { %6602 = vmatpush3.xpose.msk.msra.mxu0 %vm1590_vm1, %v3854_v15  ;;  %6603 = vmatprep.mubr.msk.f32.mxu0 %vm7889_vm0, %v7888_v52 }
0x1824   : > { %6611 = vmatprep.subr.mxu0 %v7888_v52 }
0x1825   : > { %v4194_v17 = vpop.permute.xlu0 %4193  ;;  %v4192_v54 = vpop.permute.xlu1 %4191 }
0x1826   : > { %6604 = vmatmul.mubr.msk.f32.vlgmr.msra.gmra.mrb[14].mxu0 %vm1590_vm1, %v3852_v16 }
0x1827   : > { %6612 = vmatpush3.xpose.msk.msra.mxu0 %vm1590_vm1, %v9093_v28  ;;  %6613 = vmatprep.mubr.msk.f32.mxu0 %vm7889_vm0, %v7888_v52 }
0x1828   : > { %6621 = vmatprep.subr.mxu0 %v7888_v52 }
0x1829   : > { %v4360_v19 = vpop.permute.xlu0 %4359  ;;  %v4358_v30 = vpop.permute.xlu1 %4357 }
0x182a   : > { %6614 = vmatmul.mubr.msk.f32.vlgmr.msra.gmra.mrb[16].mxu0 %vm1590_vm1, %v9103_v49 }
0x182b   : > { %6622 = vmatpush3.xpose.msk.msra.mxu0 %vm1590_vm1, %v4194_v17  ;;  %6623 = vmatprep.mubr.msk.f32.mxu0 %vm7889_vm0, %v7888_v52 }
0x182c   : > { %6631 = vmatprep.subr.mxu0 %v7888_v52 }
0x182d   : > { %v4525_v21 = vpop.permute.xlu0 %4524  ;;  %v4523_v22 = vpop.permute.xlu1 %4522 }
0x182e   : > { %6624 = vmatmul.mubr.msk.f32.vlgmr.msra.gmra.mrb[18].mxu0 %vm1590_vm1, %v4192_v54 }
0x182f   : > { %6632 = vmatpush3.xpose.msk.msra.mxu0 %vm1590_vm1, %v4360_v19  ;;  %6633 = vmatprep.mubr.msk.f32.mxu0 %vm7889_vm0, %v7888_v52 }
0x1830   : > { %6641 = vmatprep.subr.mxu0 %v7888_v52 }
0x1832   : > { %6634 = vmatmul.mubr.msk.f32.vlgmr.msra.gmra.mrb[20].mxu0 %vm1590_vm1, %v4358_v30 }
0x1833   : > { %6642 = vmatpush3.xpose.msk.msra.mxu0 %vm1590_vm1, %v4525_v21  ;;  %6643 = vmatprep.mubr.msk.f32.mxu0 %vm7889_vm0, %v7888_v52 }
0x1836   : > { %6644 = vmatmul.mubr.msk.f32.vlgmr.msra.gmra.mrb[22].mxu0 %vm1590_vm1, %v4523_v22 }
0x187f   : > { %v3432_v23 = vpop.f32.mrb[8].mxu0 }
0x1880   : > { %v6575_v55 = vpop.f32.mrb[9].mxu0  ;;  %v3436_v48 = vsel %vm1668_vm3, %v3432_v23, -inf }
0x1881   : > { %3437 = vmax.xlane.f32.xlu0 %v3436_v48 }
0x18f1   : > { %v3594_v53 = vpop.f32.mrb[10].mxu0 }
0x18f2   : > { %v6585_v25 = vpop.f32.mrb[11].mxu0  ;;  %v3598_v26 = vsel %vm1668_vm3, %v3594_v53, -inf }
0x18f3   : > { %3599 = vmax.xlane.f32.xlu1 %v3598_v26 }
0x18f5   : > { %v3760_v27 = vpop.f32.mrb[12].mxu0 }
0x18f6   : > { %v6595_v29 = vpop.f32.mrb[13].mxu0  ;;  %v3764_v32 = vsel %vm1668_vm3, %v3760_v27, -inf }
0x18f7   : > { %3765 = vmax.xlane.f32.xlu0 %v3764_v32 }
0x18f9   : > { %v3925_v33 = vpop.f32.mrb[14].mxu0 }
0x18fa   : > { %v6605_v34 = vpop.f32.mrb[15].mxu0  ;;  %v3929_v35 = vsel %vm1668_vm3, %v3925_v33, -inf }
0x18fb   : > { %3930 = vmax.xlane.f32.xlu0 %v3929_v35 }
0x18fd   : > { %v4103_v56 = vpop.f32.mrb[16].mxu0 }
0x18fe   : > { %v6615_v36 = vpop.f32.mrb[17].mxu0  ;;  %v4107_v20 = vsel %vm1668_vm3, %v4103_v56, -inf }
0x18ff   : > { %4108 = vmax.xlane.f32.xlu1 %v4107_v20 }
0x1901   : > { %v4265_v37 = vpop.f32.mrb[18].mxu0 }
0x1902   : > { %v6625_v31 = vpop.f32.mrb[19].mxu0  ;;  %v4269_v39 = vsel %vm1668_vm3, %v4265_v37, -inf }
0x1903   : > { %4270 = vmax.xlane.f32.xlu0 %v4269_v39 }
0x1905   : > { %v4431_v28 = vpop.f32.mrb[20].mxu0 }
0x1906   : > { %v6635_v41 = vpop.f32.mrb[21].mxu0  ;;  %v4435_v42 = vsel %vm1668_vm3, %v4431_v28, -inf }
0x1907   : > { %4436 = vmax.xlane.f32.xlu1 %v4435_v42 }
0x1909   : > { %v4596_v43 = vpop.f32.mrb[22].mxu0 }
0x190a   : > { %v6645_v44 = vpop.f32.mrb[23].mxu0  ;;  %v4600_v45 = vsel %vm1668_vm3, %v4596_v43, -inf }
0x190b   : > { %4601 = vmax.xlane.f32.xlu0 %v4600_v45 }
0x190e   : > { %v3438_v46 = vpop.xlane.xlu0 %3437 }
0x190f   : > { %v3439_v47 = vsub.f32 %v3432_v23, %v3438_v46 }
0x1911   : > { %v3440_v49 = vmul.f32 1.442695, %v3439_v47 }
0x1913   : > { %7304 = vpow2.f32 %v3440_v49 }
0x1918   : > { %3610 = vrot.lane.b32.xlu1 %v3351_v24, %s7890_s12 }
0x191d   : > { %v7305_v50 = vpop.eup %7304 }
0x191e   : > { %v3442_v57 = vsel %vm1668_vm3, %v7305_v50, 0.0 }
0x193c   : > { %3443 = vadd.xlane.f32.xlu1 %v3442_v57 }
0x194d   : > { %3940 = vrot.lane.b32.xlu1 %v3351_v24, %s7892_s23 }
0x1980   : > { %v3600_v58 = vpop.xlane.xlu1 %3599 }
0x1981   : > { %v3601_v59 = vsub.f32 %v3594_v53, %v3600_v58 }
0x1983   : > { %v3602_v60 = vmul.f32 1.442695, %v3601_v59 }
0x1984   : > { %v3766_v61 = vpop.xlane.xlu0 %3765 }
0x1985   : > { %7306 = vpow2.f32 %v3602_v60  ;;  %v3767_v62 = vsub.f32 %v3760_v27, %v3766_v61 }
0x1987   : > { %v3768_v63 = vmul.f32 1.442695, %v3767_v62 }
0x1988   : > { %v3931_v4 = vpop.xlane.xlu0 %3930 }
0x1989   : > { %7308 = vpow2.f32 %v3768_v63  ;;  %v3932_v5 = vsub.f32 %v3925_v33, %v3931_v4 }
0x198b   : > { %v3933_v9 = vmul.f32 1.442695, %v3932_v5  ;;  %v3121_v5 = vld [vmem:[%s9792_s13 + $0x18] sm:$0xff] }
0x198c   : > { %v4109_v6 = vpop.xlane.xlu1 %4108 }
0x198d   : > { %v4110_v8 = vsub.f32 %v4103_v56, %v4109_v6  ;;  %7310 = vpow2.f32 %v3933_v9 }
0x198f   : > { %v7307_v0 = vpop.eup %7306  ;;  %v4111_v13 = vmul.f32 1.442695, %v4110_v8  ;;  %v3123_v8 = vld [vmem:[%s9792_s13 + $0x28] sm:$0xff] }
0x1990   : > { %v3604_v1 = vsel %vm1668_vm3, %v7307_v0, 0.0  ;;  %v4271_v7 = vpop.xlane.xlu0 %4270 }
0x1991   : > { %3605 = vadd.xlane.f32.xlu0 %v3604_v1  ;;  %v4272_v10 = vsub.f32 %v4265_v37, %v4271_v7  ;;  %7312 = vpow2.f32 %v4111_v13  ;;  %v3118_v1 = vld [vmem:[%s9792_s13] sm:$0xff] }
0x1992   : > { %v3122_v7 = vld [vmem:[%s9792_s13 + $0x20] sm:$0xff] }
0x1993   : > { %v9189_v2 = vpop.eup %7308  ;;  %v4273_v15 = vmul.f32 1.442695, %v4272_v10  ;;  %v6918_v9 = vpack.c.bf16 %v3123_v8, %v3122_v7  ;;  %v3124_v10 = vld [vmem:[%s9792_s13 + $0x30] sm:$0xff]  ;;  %v3126_v13 = vld [vmem:[%s9792_s13 + $0x40] sm:$0xff]  ;;  %v4832_v8 = vld [vmem:[%s9793_s4 + $0x38] sm:$0xff] }
0x1994   : > { %v3770_v3 = vsel %vm1668_vm3, %v9189_v2, 0.0  ;;  %v4437_v11 = vpop.xlane.xlu1 %4436 }
0x1995   : > { %3771 = vadd.xlane.f32.xlu1 %v3770_v3  ;;  %v4438_v14 = vsub.f32 %v4431_v28, %v4437_v11  ;;  %7314 = vpow2.f32 %v4273_v15  ;;  %v3120_v3 = vld [vmem:[%s9792_s13 + $0x10] sm:$0xff]  ;;  %v3125_v11 = vld [vmem:[%s9792_s13 + $0x38] sm:$0xff] }
0x1996   : > { %v6914_v6 = vpack.c.bf16 %v3121_v5, %v3120_v3  ;;  %v4830_v5 = vld [vmem:[%s9793_s4 + $0x28] sm:$0xff] }
0x1997   : > { %v4439_v17 = vmul.f32 1.442695, %v4438_v14  ;;  %v7311_v19 = vpop.eup %7310  ;;  %v3127_v14 = vld [vmem:[%s9792_s13 + $0x48] sm:$0xff] }
0x1998   : > { %v4602_v12 = vpop.xlane.xlu0 %4601  ;;  %v3611_v21 = vpop.permute.xlu1 %3610  ;;  %v3935_v22 = vsel %vm1668_vm3, %v7311_v19, 0.0  ;;  %v6926_v15 = vpack.c.bf16 %v3127_v14, %v3126_v13  ;;  %v4831_v13 = vld [vmem:[%s9793_s4 + $0x30] sm:$0xff] }
0x1999   : > { %v4603_v16 = vsub.f32 %v4596_v43, %v4602_v12  ;;  %7316 = vpow2.f32 %v4439_v17  ;;  %v6922_v12 = vpack.c.bf16 %v3125_v11, %v3124_v10  ;;  %v4829_v10 = vld [vmem:[%s9793_s4 + $0x20] sm:$0xff] }
0x199b   : > { %v4604_v54 = vmul.f32 1.442695, %v4603_v16  ;;  %v7313_v30 = vpop.eup %7312 }
0x199c   : > { %v4113_v53 = vsel %vm1668_vm3, %v7313_v30, 0.0 }
0x199d   : > { %7318 = vpow2.f32 %v4604_v54 }
0x199f   : > { %v9197_v23 = vpop.eup %7314 }
0x19a3   : > { %v9199_v55 = vpop.eup %7316 }
0x19a4   : > { %v4441_v27 = vsel %vm1668_vm3, %v9199_v55, 0.0 }
0x19a6   : > { %4281 = vrot.lane.b32.xlu1 %v9175_v38, %s7890_s12 }
0x19a7   : > { %3775 = vrot.lane.b32.xlu0 %v3351_v24, %s7891_s15  ;;  %v4275_v24 = vsel %vm1668_vm3, %v9197_v23, 0.0  ;;  %v9204_v25 = vpop.eup %7318 }
0x19a8   : > { %v4606_v26 = vsel %vm1668_vm3, %v9204_v25, 0.0 }
0x19c6   : > { %3936 = vadd.xlane.f32.xlu0 %v3935_v22 }
0x19c9   : > { %v3444_v48 = vpop.xlane.xlu1 %3443 }
0x19ca   : > { %7320 = vrcp.f32 %v3444_v48  ;;  %4276 = vadd.xlane.f32.xlu0 %v4275_v24  ;;  %4114 = vadd.xlane.f32.xlu1 %v4113_v53  ;;  %v3130_v48 = vld [vmem:[%s9792_s13 + $0x60] sm:$0xff]  ;;  %v3131_v24 = vld [vmem:[%s9792_s13 + $0x68] sm:$0xff] }
0x19cb   : > { %v6934_v53 = vpack.c.bf16 %v3131_v24, %v3130_v48  ;;  %v4842_v48 = vld [vmem:[%s9793_s4 + $0x88] sm:$0xff] }
0x19cc   : > { %v4846_v24 = vld [vmem:[%s9793_s4 + $0xa8] sm:$0xff] }
0x19cd   : > { %v3941_v33 = vpop.permute.xlu1 %3940 }
0x19ce   : > { %4607 = vadd.xlane.f32.xlu0 %v4606_v26  ;;  %4442 = vadd.xlane.f32.xlu1 %v4441_v27  ;;  %v3132_v26 = vld [vmem:[%s9792_s13 + $0x70] sm:$0xff]  ;;  %v3133_v27 = vld [vmem:[%s9792_s13 + $0x78] sm:$0xff] }
0x19d4   : > { %v7321_v29 = vpop.eup %7320 }
0x19d5   : > { %v3446_v32 = vmul.f32 %v7321_v29, %v7305_v50 }
0x19d7   : > { %6579 = vmatmul.mubr.msk.f32.vlgmr.msra.gmra.mrb[38].mxu1 %vm1668_vm3, %v3446_v32  ;;  %v6938_v32 = vpack.c.bf16 %v3133_v27, %v3132_v26  ;;  %v4844_v26 = vld [vmem:[%s9793_s4 + $0x98] sm:$0xff] }
0x19d8   : > { %6587 = vmatpush3.msra.mxu1 %v3611_v21  ;;  %6588 = vmatprep.mubr.msk.f32.mxu1 %vm7889_vm0, %v7888_v52  ;;  %v3129_v21 = vld [vmem:[%s9792_s13 + $0x58] sm:$0xff] }
0x19d9   : > { %6596 = vmatprep.subr.mxu1 %v7888_v52  ;;  %v4848_v27 = vld [vmem:[%s9793_s4 + $0xb8] sm:$0xff] }
0x19df   : > { %4611 = vrot.lane.b32.xlu1 %v9175_v38, %s7892_s23 }
0x19e4   : > { %4446 = vrot.lane.b32.xlu0 %v9175_v38, %s7891_s15 }
0x1a1e   : > { %v3606_v34 = vpop.xlane.xlu0 %3605 }
0x1a1f   : > { %7322 = vrcp.f32 %v3606_v34 }
0x1a22   : > { %v3772_v35 = vpop.xlane.xlu1 %3771  ;;  %v3776_v20 = vpop.permute.xlu0 %3775 }
0x1a23   : > { %7324 = vrcp.f32 %v3772_v35 }
0x1a26   : > { %v4282_v39 = vpop.permute.xlu1 %4281 }
0x1a29   : > { %v7323_v56 = vpop.eup %7322 }
0x1a2a   : > { %v3608_v36 = vmul.f32 %v7323_v56, %v7307_v0 }
0x1a2c   : > { %6589 = vmatmul.mubr.msk.f32.vlgmr.msra.gmra.mrb[40].mxu1 %vm1668_vm3, %v3608_v36 }
0x1a2d   : > { %v7325_v37 = vpop.eup %7324  ;;  %6597 = vmatpush3.msra.mxu1 %v3776_v20  ;;  %6598 = vmatprep.mubr.msk.f32.mxu1 %vm7889_vm0, %v7888_v52 }
0x1a2e   : > { %v3774_v31 = vmul.f32 %v7325_v37, %v9189_v2  ;;  %6606 = vmatprep.subr.mxu1 %v7888_v52  ;;  %v3119_v2 = vld [vmem:[%s9792_s13 + $0x8] sm:$0xff] }
0x1a2f   : > { %v6910_v4 = vpack.c.bf16 %v3119_v2, %v3118_v1 }
0x1a30   : > { %6599 = vmatmul.mubr.msk.f32.vlgmr.msra.gmra.mrb[42].mxu1 %vm1668_vm3, %v3774_v31 }
0x1a31   : > { %6607 = vmatpush3.msra.mxu1 %v3941_v33  ;;  %6608 = vmatprep.mubr.msk.f32.mxu1 %vm7889_vm0, %v7888_v52 }
0x1a32   : > { %6616 = vmatprep.subr.mxu1 %v7888_v52  ;;  %6911 = vmatprep.subr.bf16.mxu0 %v6910_v4 }
0x1a33   : > { %6913 = vmatpush3.bf16.msra.mxu0 %v6910_v4  ;;  %v4826_v4 = vld [vmem:[%s9793_s4 + $0x8] sm:$0xff] }
0x1a34   : > { %6915 = vmatprep.subr.bf16.mxu0 %v6914_v6  ;;  %v6942_v7 = vpack.c.bf16 %v4830_v5, %v4826_v4  ;;  %v4861_v4 = vld [vmem:[%s9793_s4 + $0x120] sm:$0xff] }
0x1a37   : > { %6917 = vmatpush3.bf16.msra.mxu0 %v6914_v6  ;;  %v4828_v6 = vld [vmem:[%s9793_s4 + $0x18] sm:$0xff] }
0x1a38   : > { %6919 = vmatprep.subr.bf16.mxu0 %v6918_v9  ;;  %v6974_v11 = vpack.c.bf16 %v4832_v8, %v4828_v6  ;;  %v4863_v8 = vld [vmem:[%s9793_s4 + $0x130] sm:$0xff] }
0x1a3b   : > { %6921 = vmatpush3.bf16.msra.mxu0 %v6918_v9  ;;  %v4825_v9 = vld [vmem:[%s9793_s4] sm:$0xff] }
0x1a3c   : > { %6923 = vmatprep.subr.bf16.mxu0 %v6922_v12 }
0x1a3f   : > { %6925 = vmatpush3.bf16.msra.mxu0 %v6922_v12  ;;  %v6944_v12 = vpack.c.bf16 %v4829_v10, %v4825_v9  ;;  %v4866_v9 = vld [vmem:[%s9793_s4 + $0x148] sm:$0xff] }
0x1a40   : > { %6927 = vmatprep.subr.bf16.mxu0 %v6926_v15 }
0x1a43   : > { %6929 = vmatpush3.bf16.msra.mxu0 %v6926_v15  ;;  %v4838_v15 = vld [vmem:[%s9793_s4 + $0x68] sm:$0xff] }
0x1a53   : > { %v3937_v28 = vpop.xlane.xlu0 %3936 }
0x1a54   : > { %7326 = vrcp.f32 %v3937_v28 }
0x1a57   : > { %v4115_v41 = vpop.xlane.xlu1 %4114  ;;  %v4277_v42 = vpop.xlane.xlu0 %4276 }
0x1a58   : > { %7328 = vrcp.f32 %v4115_v41 }
0x1a59   : > { %7330 = vrcp.f32 %v4277_v42 }
0x1a5b   : > { %v4443_v43 = vpop.xlane.xlu1 %4442  ;;  %v4608_v46 = vpop.xlane.xlu0 %4607 }
0x1a5c   : > { %7332 = vrcp.f32 %v4443_v43 }
0x1a5d   : > { %7334 = vrcp.f32 %v4608_v46 }
0x1a5e   : > { %v7327_v44 = vpop.eup %7326 }
0x1a5f   : > { %v3939_v45 = vmul.f32 %v7327_v44, %v7311_v19  ;;  %v4447_v58 = vpop.permute.xlu0 %4446  ;;  %v4612_v61 = vpop.permute.xlu1 %4611 }
0x1a61   : > { %6609 = vmatmul.mubr.msk.f32.vlgmr.msra.gmra.mrb[44].mxu1 %vm1668_vm3, %v3939_v45 }
0x1a62   : > { %6617 = vmatpush3.msra.mxu1 %v9175_v38  ;;  %6618 = vmatprep.mubr.msk.f32.mxu1 %vm7889_vm0, %v7888_v52  ;;  %v7329_v47 = vpop.eup %7328 }
0x1a63   : > { %6626 = vmatprep.subr.mxu1 %v7888_v52  ;;  %v4117_v49 = vmul.f32 %v7329_v47, %v7313_v30  ;;  %v7331_v50 = vpop.eup %7330  ;;  %v3128_v30 = vld [vmem:[%s9792_s13 + $0x50] sm:$0xff]  ;;  %s5961_s13 = sshll.u32 %s9802_s16, 8 }
0x1a64   : > { %v4279_v57 = vmul.f32 %v7331_v50, %v9197_v23  ;;  %v6930_v22 = vpack.c.bf16 %v3129_v21, %v3128_v30  ;;  %v4833_v30 = vld [vmem:[%s9793_s4 + $0x40] sm:$0xff] }
0x1a65   : > { %6619 = vmatmul.mubr.msk.f32.vlgmr.msra.gmra.mrb[46].mxu1 %vm1668_vm3, %v4117_v49  ;;  %v4837_v21 = vld [vmem:[%s9793_s4 + $0x60] sm:$0xff] }
0x1a66   : > { %6627 = vmatpush3.msra.mxu1 %v4282_v39  ;;  %6628 = vmatprep.mubr.msk.f32.mxu1 %vm7889_vm0, %v7888_v52  ;;  %v7333_v38 = vpop.eup %7332 }
0x1a67   : > { %6636 = vmatprep.subr.mxu1 %v7888_v52  ;;  %v4445_v59 = vmul.f32 %v7333_v38, %v9199_v55  ;;  %v7335_v60 = vpop.eup %7334  ;;  %6931 = vmatprep.subr.bf16.mxu0 %v6930_v22 }
0x1a68   : > { %v4610_v62 = vmul.f32 %v7335_v60, %v9204_v25  ;;  %6933 = vmatpush3.bf16.msra.mxu0 %v6930_v22  ;;  %v4835_v22 = vld [vmem:[%s9793_s4 + $0x50] sm:$0xff] }
0x1a69   : > { %6629 = vmatmul.mubr.msk.f32.vlgmr.msra.gmra.mrb[48].mxu1 %vm1668_vm3, %v4279_v57  ;;  %6935 = vmatprep.subr.bf16.mxu0 %v6934_v53 }
0x1a6a   : > { %6637 = vmatpush3.msra.mxu1 %v4447_v58  ;;  %6638 = vmatprep.mubr.msk.f32.mxu1 %vm7889_vm0, %v7888_v52 }
0x1a6b   : > { %6646 = vmatprep.subr.mxu1 %v7888_v52 }
0x1a6c   : > { %6937 = vmatpush3.bf16.msra.mxu0 %v6934_v53 }
0x1a6d   : > { %6639 = vmatmul.mubr.msk.f32.vlgmr.msra.gmra.mrb[50].mxu1 %vm1668_vm3, %v4445_v59  ;;  %6939 = vmatprep.subr.bf16.mxu0 %v6938_v32 }
0x1a6e   : > { %6647 = vmatpush3.msra.mxu1 %v4612_v61  ;;  %6648 = vmatprep.mubr.msk.f32.mxu1 %vm7889_vm0, %v7888_v52  ;;  %v5938_v61 = vld [vmem:[%s9795_s10] ss:$0 sm:$0xff]  ;;  %s9526_s10 = scalar_lea.hbm %s9807_s14, %s5961_s13 }
0x1a6f   : > { %6943 = vmatprep.subr.bf16.mxu1 %v6942_v7  ;;  %v4859_v7 = vld [vmem:[%s9793_s4 + $0x110] sm:$0xff] }
0x1a70   : > { %6941 = vmatpush3.bf16.msra.mxu0 %v6938_v32  ;;  %v6982_v32 = vpack.c.bf16 %v4848_v27, %v4844_v26  ;;  %v6992_v10 = vpack.c.bf16 %v4863_v8, %v4859_v7  ;;  %v4879_v26 = vld [vmem:[%s9793_s4 + $0x1b0] sm:$0xff]  ;;  %v5169_v8 = vld [vmem:[%s9796_s0 + $0x100] sm:$0xff] }
0x1a71   : > { %6649 = vmatmul.mubr.msk.f32.vlgmr.msra.gmra.mrb[52].mxu1 %vm1668_vm3, %v4610_v62  ;;  %6975 = vmatprep.subr.bf16.mxu0 %v6974_v11  ;;  %v4870_v11 = vld [vmem:[%s9793_s4 + $0x168] sm:$0xff] }
0x1a72   : > { %4975 = vmatprep.mubr.f32.mxu1 %v7888_v52  ;;  %6945 = vmatpush1.bf16.msra.mxu1 %v6944_v12  ;;  %v4868_v12 = vld [vmem:[%s9793_s4 + $0x158] sm:$0xff] }
0x1aaa   : > { %v9248_v63 = vpop.f32.mrb[38].mxu1 }
0x1aab   : > { %v6580_v0 = vpop.f32.mrb[39].mxu1 }
0x1aff   : > { %v3682_v16 = vpop.f32.mrb[40].mxu1 }
0x1b00   : > { %v6590_v17 = vpop.f32.mrb[41].mxu1 }
0x1b01   : > { %v4840_v17 = vld [vmem:[%s9793_s4 + $0x78] sm:$0xff] }
0x1b03   : > { %v3847_v54 = vpop.f32.mrb[42].mxu1 }
0x1b04   : > { %v6600_v19 = vpop.f32.mrb[43].mxu1 }
0x1b34   : > { %v4012_v23 = vpop.f32.mrb[44].mxu1 }
0x1b35   : > { %v6610_v55 = vpop.f32.mrb[45].mxu1 }
0x1b36   : > { %v4839_v55 = vld [vmem:[%s9793_s4 + $0x70] sm:$0xff] }
0x1b37   : > { %v6980_v53 = vpack.c.bf16 %v4839_v55, %v4835_v22  ;;  %v4880_v55 = vld [vmem:[%s9793_s4 + $0x1b8] sm:$0xff] }
0x1b38   : > { %v4187_v25 = vpop.f32.mrb[46].mxu1 }
0x1b39   : > { %v6620_v29 = vpop.f32.mrb[47].mxu1 }
0x1b3a   : > { %v4841_v29 = vld [vmem:[%s9793_s4 + $0x80] sm:$0xff] }
0x1b3c   : > { %v4353_v33 = vpop.f32.mrb[48].mxu1 }
0x1b3d   : > { %v7253_v34 = vpack.i.bf16 %v4353_v33, %v3682_v16  ;;  %v6630_v35 = vpop.f32.mrb[49].mxu1  ;;  %v4836_v16 = vld [vmem:[%s9793_s4 + $0x58] sm:$0xff]  ;;  %v4845_v33 = vld [vmem:[%s9793_s4 + $0xa0] sm:$0xff] }
0x1b3e   : > { %v6978_v19 = vpack.c.bf16 %v4840_v17, %v4836_v16  ;;  %v4847_v35 = vld [vmem:[%s9793_s4 + $0xb0] sm:$0xff] }
0x1b3f   : > { %7254 = vrot.lane.b32.xlu0 %v7253_v34, %s7892_s23  ;;  %v4843_v34 = vld [vmem:[%s9793_s4 + $0x90] sm:$0xff] }
0x1b40   : > { %v4518_v56 = vpop.f32.mrb[50].mxu1  ;;  %v4867_v16 = vld [vmem:[%s9793_s4 + $0x150] sm:$0xff] }
0x1b41   : > { %v7258_v36 = vpack.i.bf16 %v4518_v56, %v3847_v54  ;;  %v6640_v20 = vpop.f32.mrb[51].mxu1  ;;  %v6952_v56 = vpack.c.bf16 %v4845_v33, %v4841_v29  ;;  %v4882_v29 = vld [vmem:[%s9793_s4 + $0x1c8] sm:$0xff]  ;;  %v4884_v33 = vld [vmem:[%s9793_s4 + $0x1d8] sm:$0xff] }
0x1b43   : > { %7259 = vrot.lane.b32.xlu1 %v7258_v36, %s7891_s15  ;;  %v6984_v36 = vpack.c.bf16 %v4847_v35, %v4843_v34 }
0x1b44   : > { %v4683_v37 = vpop.f32.mrb[52].mxu1 }
0x1b45   : > { %v7263_v31 = vpack.i.bf16 %v4683_v37, %v4012_v23  ;;  %v6650_v39 = vpop.f32.mrb[53].mxu1  ;;  %v6948_v23 = vpack.c.bf16 %v4837_v21, %v4833_v30  ;;  %v4878_v30 = vld [vmem:[%s9793_s4 + $0x1a8] sm:$0xff] }
0x1b47   : > { %7264 = vrot.lane.b32.xlu0 %v7263_v31, %s7890_s12 }
0x1bb1   : > { %v7255_v28 = vpop.permute.xlu0 %7254 }
0x1bb2   : > { %v7257_v42 = vunpack.i.h.bf16 %v7255_v28  ;;  %v7256_v43 = vunpack.i.l.bf16 %v7255_v28 }
0x1bb4   : > { %v4699_v47 = vsel %vm1590_vm1, %v4187_v25, %v7257_v42  ;;  %v4028_v57 = vsel %vm1590_vm1, %v9248_v63, %v7256_v43  ;;  %v6950_v25 = vpack.c.bf16 %v4846_v24, %v4842_v48  ;;  %v4873_v48 = vld [vmem:[%s9793_s4 + $0x180] sm:$0xff] }
0x1bb5   : > { %v7260_v41 = vpop.permute.xlu1 %7259 }
0x1bb6   : > { %v7262_v44 = vunpack.i.h.bf16 %v7260_v41  ;;  %v7261_v45 = vunpack.i.l.bf16 %v7260_v41 }
0x1bb8   : > { %v4029_v38 = vsel %vm2265_vm4, %v4028_v57, %v7261_v45  ;;  %v4700_v58 = vsel %vm2265_vm4, %v4699_v47, %v7262_v44  ;;  %v4850_v44 = vld [vmem:[%s9793_s4 + $0xc8] sm:$0xff]  ;;  %v4853_v57 = vld [vmem:[%s9793_s4 + $0xe0] sm:$0xff] }
0x1bb9   : > { %v7265_v46 = vpop.permute.xlu0 %7264  ;;  %v4854_v45 = vld [vmem:[%s9793_s4 + $0xe8] sm:$0xff] }
0x1bba   : > { %v7267_v49 = vunpack.i.h.bf16 %v7265_v46  ;;  %v7266_v50 = vunpack.i.l.bf16 %v7265_v46  ;;  %v4852_v46 = vld [vmem:[%s9793_s4 + $0xd8] sm:$0xff]  ;;  %v6954_v47 = vpack.c.bf16 %v4854_v45, %v4850_v44 }
0x1bbc   : > { %v4030_v59 = vsel %vm2267_vm5, %v4029_v38, %v7266_v50  ;;  %v4701_v60 = vsel %vm2267_vm5, %v4700_v58, %v7267_v49  ;;  %v4856_v49 = vld [vmem:[%s9793_s4 + $0xf8] sm:$0xff]  ;;  %v4849_v50 = vld [vmem:[%s9793_s4 + $0xc0] sm:$0xff] }
0x1bbd   : > { %6683 = vmatprep.mubr.f32.mxu0 %v4030_v59  ;;  %v6986_v38 = vpack.c.bf16 %v4856_v49, %v4852_v46  ;;  %v6956_v58 = vpack.c.bf16 %v4853_v57, %v4849_v50  ;;  %v4851_v59 = vld [vmem:[%s9793_s4 + $0xd0] sm:$0xff] }
0x1bbe   : > { %6684 = vmatmul.mubr.f32.vlgmr.msra.gmra.mrb[24].mxu0 %v4701_v60  ;;  %v4855_v60 = vld [vmem:[%s9793_s4 + $0xf0] sm:$0xff] }
0x1bbf   : > { %5052 = vmatprep.mubr.f32.mxu0 %v7888_v52 }
0x1c91   : > { %v6685_v62 = vpop.f32.mrb[24].mxu0 }
0x1c92   : > { %v4780_v63 = vadd.f32 %v6685_v62, %v5938_v61  ;;  %v4774_v0 = vpop.f32.mrb[25].mxu0  ;;  %v4858_v62 = vld [vmem:[%s9793_s4 + $0x108] sm:$0xff] }
0x1c93   : > { %v4775_v1 = vadd.f32 %v5938_v61, %v4774_v0  ;;  %v6988_v61 = vpack.c.bf16 %v4855_v60, %v4851_v59  ;;  %v4860_v0 = vld [vmem:[%s9793_s4 + $0x118] sm:$0xff] }
0x1c94   : > { %v4784_v2 = vadd.f32 %v4780_v63, %v9089_v40  ;;  %v4827_v40 = vld [vmem:[%s9793_s4 + $0x10] sm:$0xff]  ;;  %v4862_v63 = vld [vmem:[%s9793_s4 + $0x128] sm:$0xff] }
0x1c95   : > { %v4783_v3 = vadd.f32 %v4775_v1, %v9087_v51  ;;  %v4834_v51 = vld [vmem:[%s9793_s4 + $0x48] sm:$0xff]  ;;  %v6976_v14 = vpack.c.bf16 %v4831_v13, %v4827_v40  ;;  %v6958_v1 = vpack.c.bf16 %v4862_v63, %v4858_v62  ;;  %v4872_v40 = vld [vmem:[%s9793_s4 + $0x178] sm:$0xff]  ;;  %v6962_v13 = vpack.c.bf16 %v4870_v11, %v4866_v9  ;;  %v5155_v11 = vld [vmem:[%s9796_s0 + $0x90] sm:$0xff] }
0x1c96   : > { %4789 = vadd.xlane.f32.xlu0 %v4784_v2  ;;  %v6946_v54 = vpack.c.bf16 %v4838_v15, %v4834_v51  ;;  %v6994_v51 = vpack.c.bf16 %v4872_v40, %v4868_v12  ;;  %v4869_v15 = vld [vmem:[%s9793_s4 + $0x160] sm:$0xff]  ;;  %v5170_v9 = vld [vmem:[%s9796_s0 + $0x108] sm:$0xff]  ;;  %v5156_v12 = vld [vmem:[%s9796_s0 + $0x98] sm:$0xff] }
0x1c97   : > { %4787 = vadd.xlane.f32.xlu1 %v4783_v3  ;;  %6977 = vmatpush1.bf16.msra.mxu0 %v6976_v14  ;;  %v4865_v14 = vld [vmem:[%s9793_s4 + $0x140] sm:$0xff]  ;;  %v5187_v40 = vld [vmem:[%s9796_s0 + $0x190] sm:$0xff] }
0x1c98   : > { %6947 = vmatprep.subr.bf16.mxu1 %v6946_v54  ;;  %6979 = vmatprep.subr.bf16.mxu0 %v6978_v19  ;;  %v6964_v17 = vpack.c.bf16 %v4869_v15, %v4865_v14  ;;  %v4871_v54 = vld [vmem:[%s9793_s4 + $0x170] sm:$0xff]  ;;  %v4874_v19 = vld [vmem:[%s9793_s4 + $0x188] sm:$0xff]  ;;  %v5140_v15 = vld [vmem:[%s9796_s0 + $0x18] sm:$0xff] }
0x1c99   : > { %6949 = vmatpush1.bf16.msra.mxu1 %v6948_v23  ;;  %v6996_v21 = vpack.c.bf16 %v4871_v54, %v4867_v16  ;;  %v6966_v22 = vpack.c.bf16 %v4878_v30, %v4874_v19  ;;  %v4876_v23 = vld [vmem:[%s9793_s4 + $0x198] sm:$0xff]  ;;  %v5139_v14 = vld [vmem:[%s9796_s0 + $0x10] sm:$0xff] }
0x1c9a   : > { %6951 = vmatprep.subr.bf16.mxu1 %v6950_v25  ;;  %v6998_v24 = vpack.c.bf16 %v4880_v55, %v4876_v23  ;;  %v4875_v25 = vld [vmem:[%s9793_s4 + $0x190] sm:$0xff]  ;;  %v5172_v19 = vld [vmem:[%s9796_s0 + $0x118] sm:$0xff]  ;;  %v5189_v23 = vld [vmem:[%s9796_s0 + $0x1a0] sm:$0xff] }
0x1c9b   : > { %6981 = vmatpush1.bf16.msra.mxu0 %v6980_v53  ;;  %v4877_v53 = vld [vmem:[%s9793_s4 + $0x1a0] sm:$0xff]  ;;  %v7000_v34 = vpack.c.bf16 %v4879_v26, %v4875_v25  ;;  %v5171_v54 = vld [vmem:[%s9796_s0 + $0x110] sm:$0xff] }
0x1c9c   : > { %6983 = vmatprep.subr.bf16.mxu0 %v6982_v32  ;;  %v6968_v27 = vpack.c.bf16 %v4877_v53, %v4873_v48  ;;  %v4886_v32 = vld [vmem:[%s9793_s4 + $0x1e8] sm:$0xff]  ;;  %v7044_v30 = vpack.c.bf16 %v5172_v19, %v5171_v54 }
0x1c9d   : > { %6953 = vmatpush1.bf16.msra.mxu1 %v6952_v56  ;;  %v6970_v35 = vpack.c.bf16 %v4886_v32, %v4882_v29  ;;  %v4888_v56 = vld [vmem:[%s9793_s4 + $0x1f8] sm:$0xff]  ;;  %v5190_v48 = vld [vmem:[%s9796_s0 + $0x1a8] sm:$0xff] }
0x1c9e   : > { %6955 = vmatprep.subr.bf16.mxu1 %v6954_v47  ;;  %v5142_v53 = vld [vmem:[%s9796_s0 + $0x28] sm:$0xff]  ;;  %v7046_v25 = vpack.c.bf16 %v5190_v48, %v5189_v23  ;;  %v5151_v48 = vld [vmem:[%s9796_s0 + $0x70] sm:$0xff] }
0x1c9f   : > { %6985 = vmatpush1.bf16.msra.mxu0 %v6984_v36  ;;  %v4881_v36 = vld [vmem:[%s9793_s4 + $0x1c0] sm:$0xff]  ;;  %v5174_v29 = vld [vmem:[%s9796_s0 + $0x128] sm:$0xff] }
0x1ca0   : > { %6987 = vmatprep.subr.bf16.mxu0 %v6986_v38  ;;  %v5182_v54 = vld [vmem:[%s9796_s0 + $0x168] sm:$0xff] }
0x1ca1   : > { %6957 = vmatpush1.bf16.msra.mxu1 %v6956_v58  ;;  %v5939_v58 = vld [vmem:[%s1274_s22] ss:$0 sm:$0xff]  ;;  %s9799_s22 = sld [smem:[#allocation57_spill]] }
0x1ca2   : > { %6959 = vmatprep.subr.bf16.mxu1 %v6958_v1  ;;  %v5154_v1 = vld [vmem:[%s9796_s0 + $0x88] sm:$0xff] }
0x1ca3   : > { %6989 = vmatpush1.bf16.msra.mxu0 %v6988_v61  ;;  %v5940_v61 = vld [vmem:[%s1277_s8] ss:$0 sm:$0xff] }
0x1d23   : > { %v4790_v20 = vpop.xlane.xlu0 %4789 }
0x1d24   : > { %v4792_v37 = vmul.f32 0.0078125, %v4790_v20  ;;  %v4788_v31 = vpop.xlane.xlu1 %4787  ;;  %v4885_v20 = vld [vmem:[%s9793_s4 + $0x1e0] sm:$0xff] }
0x1d25   : > { %v4791_v39 = vmul.f32 0.0078125, %v4788_v31  ;;  %v4883_v31 = vld [vmem:[%s9793_s4 + $0x1d0] sm:$0xff] }
0x1d26   : > { %v9308_v28 = vsub.f32 %v4784_v2, %v4792_v37  ;;  %v4864_v2 = vld [vmem:[%s9793_s4 + $0x138] sm:$0xff]  ;;  %v7002_v37 = vpack.c.bf16 %v4888_v56, %v4884_v33  ;;  %v5159_v33 = vld [vmem:[%s9796_s0 + $0xb0] sm:$0xff] }
0x1d27   : > { %v9310_v41 = vsub.f32 %v4783_v3, %v4791_v39  ;;  %v4857_v3 = vld [vmem:[%s9793_s4 + $0x100] sm:$0xff]  ;;  %v6990_v5 = vpack.c.bf16 %v4864_v2, %v4860_v0  ;;  %v4887_v39 = vld [vmem:[%s9793_s4 + $0x1f0] sm:$0xff]  ;;  %s5416_s4 = sshll.u32 %s8744_s21, 4  ;;  %s9528_s4 = int_to_ptr.vmem [resolvable:$true] %s5416_s4 }
0x1d28   : > { %v4796_v42 = vmul.f32 %v9308_v28, %v9308_v28  ;;  %v6960_v6 = vpack.c.bf16 %v4861_v4, %v4857_v3  ;;  %v5185_v2 = vld [vmem:[%s9796_s0 + $0x180] sm:$0xff]  ;;  %v5186_v4 = vld [vmem:[%s9796_s0 + $0x188] sm:$0xff] }
0x1d29   : > { %v4795_v43 = vmul.f32 %v9310_v41, %v9310_v41  ;;  %6991 = vmatprep.subr.bf16.mxu0 %v6990_v5  ;;  %v5137_v5 = vld [vmem:[%s9796_s0] sm:$0xff] }
0x1d2a   : > { %4799 = vadd.xlane.f32.xlu1 %v4796_v42  ;;  %6961 = vmatpush1.bf16.msra.mxu1 %v6960_v6  ;;  %v6972_v42 = vpack.c.bf16 %v4885_v20, %v4881_v36  ;;  %v5138_v6 = vld [vmem:[%s9796_s0 + $0x8] sm:$0xff]  ;;  %v5192_v36 = vld [vmem:[%s9796_s0 + $0x1b8] sm:$0xff]  ;;  %v5143_v20 = vld [vmem:[%s9796_s0 + $0x30] sm:$0xff] }
0x1d2b   : > { %4797 = vadd.xlane.f32.xlu0 %v4795_v43  ;;  %6993 = vmatpush1.bf16.msra.mxu0 %v6992_v10  ;;  %v7004_v43 = vpack.c.bf16 %v4887_v39, %v4883_v31  ;;  %v7008_v7 = vpack.c.bf16 %v5138_v6, %v5137_v5  ;;  %v7040_v10 = vpack.c.bf16 %v5170_v9, %v5169_v8  ;;  %v5148_v5 = vld [vmem:[%s9796_s0 + $0x58] sm:$0xff] }
0x1d2c   : > { %6963 = vmatprep.subr.bf16.mxu1 %v6962_v13  ;;  %6995 = vmatprep.subr.bf16.mxu0 %v6994_v51  ;;  %v7010_v13 = vpack.c.bf16 %v5156_v12, %v5155_v11  ;;  %v5188_v51 = vld [vmem:[%s9796_s0 + $0x198] sm:$0xff]  ;;  %v5166_v11 = vld [vmem:[%s9796_s0 + $0xe8] sm:$0xff]  ;;  %v5197_v12 = vld [vmem:[%s9796_s0 + $0x1e0] sm:$0xff] }
0x1d2d   : > { %v7042_v16 = vpack.c.bf16 %v5188_v51, %v5187_v40  ;;  %v5180_v8 = vld [vmem:[%s9796_s0 + $0x158] sm:$0xff]  ;;  %v5149_v51 = vld [vmem:[%s9796_s0 + $0x60] sm:$0xff] }
0x1d2e   : > { %6965 = vmatpush1.bf16.msra.mxu1 %v6964_v17  ;;  %v7012_v17 = vpack.c.bf16 %v5140_v15, %v5139_v14  ;;  %v5150_v14 = vld [vmem:[%s9796_s0 + $0x68] sm:$0xff] }
0x1d2f   : > { %6997 = vmatpush1.bf16.msra.mxu0 %v6996_v21  ;;  %6967 = vmatprep.subr.bf16.mxu1 %v6966_v22  ;;  %v5157_v21 = vld [vmem:[%s9796_s0 + $0xa0] sm:$0xff]  ;;  %v5158_v22 = vld [vmem:[%s9796_s0 + $0xa8] sm:$0xff] }
0x1d30   : > { %6999 = vmatprep.subr.bf16.mxu0 %v6998_v24  ;;  %v7014_v55 = vpack.c.bf16 %v5158_v22, %v5157_v21  ;;  %v5141_v24 = vld [vmem:[%s9796_s0 + $0x20] sm:$0xff]  ;;  %v5168_v21 = vld [vmem:[%s9796_s0 + $0xf8] sm:$0xff]  ;;  %v5199_v22 = vld [vmem:[%s9796_s0 + $0x1f0] sm:$0xff] }
0x1d31   : > { %v7016_v26 = vpack.c.bf16 %v5142_v53, %v5141_v24  ;;  %v5152_v24 = vld [vmem:[%s9796_s0 + $0x78] sm:$0xff] }
0x1d32   : > { %6969 = vmatpush1.bf16.msra.mxu1 %v6968_v27  ;;  %v5173_v27 = vld [vmem:[%s9796_s0 + $0x120] sm:$0xff] }
0x1d33   : > { %7001 = vmatpush1.bf16.msra.mxu0 %v7000_v34  ;;  %6971 = vmatprep.subr.bf16.mxu1 %v6970_v35  ;;  %v7048_v32 = vpack.c.bf16 %v5174_v29, %v5173_v27  ;;  %v5160_v34 = vld [vmem:[%s9796_s0 + $0xb8] sm:$0xff]  ;;  %v5191_v35 = vld [vmem:[%s9796_s0 + $0x1b0] sm:$0xff] }
0x1d34   : > { %7003 = vmatprep.subr.bf16.mxu0 %v7002_v37  ;;  %v7018_v56 = vpack.c.bf16 %v5160_v34, %v5159_v33  ;;  %v5144_v37 = vld [vmem:[%s9796_s0 + $0x38] sm:$0xff]  ;;  %v7050_v31 = vpack.c.bf16 %v5192_v36, %v5191_v35  ;;  %v4901_v33 = vsub.s32 2, %v8835_v18  ;;  %v4889_v34 = vld [vmem:[%s9799_s22] sm:$0xf]  ;;  %v4897_v35 = vsub.s32 1, %v8835_v18 }
0x1d35   : > { %v7020_v39 = vpack.c.bf16 %v5144_v37, %v5143_v20  ;;  %v5184_v27 = vld [vmem:[%s9796_s0 + $0x178] sm:$0xff] }
0x1d36   : > { %6973 = vmatpush1.bf16.msra.mxu1 %v6972_v42  ;;  %v5175_v42 = vld [vmem:[%s9796_s0 + $0x130] sm:$0xff]  ;;  %v4902_v20 = vrot.slane %v4889_v34, %v4901_v33  ;;  %v4898_v37 = vrot.slane %v4889_v34, %v4897_v35 }
0x1d37   : > { %7005 = vmatpush1.bf16.msra.mxu0 %v7004_v43  ;;  %v5176_v43 = vld [vmem:[%s9796_s0 + $0x138] sm:$0xff] }
0x1db7   : > { %v4800_v44 = vpop.xlane.xlu1 %4799 }
0x1db8   : > { %v4802_v45 = vmul.f32 0.0078125, %v4800_v44  ;;  %v4798_v46 = vpop.xlane.xlu0 %4797  ;;  %v7052_v44 = vpack.c.bf16 %v5176_v43, %v5175_v42 }
0x1db9   : > { %v4801_v47 = vmul.f32 0.0078125, %v4798_v46  ;;  %v5162_v46 = vld [vmem:[%s9796_s0 + $0xc8] sm:$0xff] }
0x1dba   : > { %v4804_v49 = vadd.f32 1e-05, %v4802_v45  ;;  %v5161_v45 = vld [vmem:[%s9796_s0 + $0xc0] sm:$0xff] }
0x1dbb   : > { %v4803_v50 = vadd.f32 1e-05, %v4801_v47  ;;  %v5193_v47 = vld [vmem:[%s9796_s0 + $0x1c0] sm:$0xff] }
0x1dbc   : > { %7336 = vrsqrt.f32 %v4804_v49  ;;  %v7022_v49 = vpack.c.bf16 %v5162_v46, %v5161_v45 }
0x1dbd   : > { %7338 = vrsqrt.f32 %v4803_v50  ;;  %v5194_v50 = vld [vmem:[%s9796_s0 + $0x1c8] sm:$0xff] }
0x1dc6   : > { %v7337_v57 = vpop.eup %7336 }
0x1dc7   : > { %v7339_v38 = vpop.eup %7338  ;;  %v4808_v60 = vmul.f32 %v7337_v57, %v9308_v28  ;;  %v5145_v57 = vld [vmem:[%s9796_s0 + $0x40] sm:$0xff] }
0x1dc8   : > { %v4807_v59 = vmul.f32 %v7339_v38, %v9310_v41  ;;  %v5153_v41 = vld [vmem:[%s9796_s0 + $0x80] sm:$0xff]  ;;  %v5146_v38 = vld [vmem:[%s9796_s0 + $0x48] sm:$0xff] }
0x1dc9   : > { %v4816_v0 = vmul.f32 %v5939_v58, %v4808_v60  ;;  %v7006_v3 = vpack.c.bf16 %v5154_v1, %v5153_v41  ;;  %v5177_v60 = vld [vmem:[%s9796_s0 + $0x140] sm:$0xff]  ;;  %v5164_v41 = vld [vmem:[%s9796_s0 + $0xd8] sm:$0xff]  ;;  %v5195_v1 = vld [vmem:[%s9796_s0 + $0x1d0] sm:$0xff] }
0x1dca   : > { %v4815_v62 = vmul.f32 %v5939_v58, %v4807_v59  ;;  %v7054_v58 = vpack.c.bf16 %v5194_v50, %v5193_v47  ;;  %v7024_v59 = vpack.c.bf16 %v5146_v38, %v5145_v57 }
0x1dcb   : > { %v9374_v28 = vadd.f32 %v5940_v61, %v4816_v0  ;;  %7007 = vmatprep.subr.bf16.mxu1 %v7006_v3  ;;  %v5163_v0 = vld [vmem:[%s9796_s0 + $0xd0] sm:$0xff]  ;;  %v5196_v3 = vld [vmem:[%s9796_s0 + $0x1d8] sm:$0xff] }
0x1dcc   : > { %v9368_v63 = vadd.f32 %v5940_v61, %v4815_v62  ;;  %v5178_v61 = vld [vmem:[%s9796_s0 + $0x148] sm:$0xff]  ;;  %v7058_v6 = vpack.c.bf16 %v5196_v3, %v5195_v1 }
0x1dcd   : > { %v7056_v62 = vpack.c.bf16 %v5178_v61, %v5177_v60 }
0x1dce   : > { %4976 = vmatmul.mubr.f32.vlgmr.msra.gmra.mrb[54].mxu1 %v9368_v63  ;;  %5053 = vmatmul.mubr.f32.vlgmr.msra.gmra.mrb[26].mxu0 %v9368_v63 }
0x1dcf   : > { %4981 = vmatprep.mubr.f32.mxu1 %v7888_v52  ;;  %5058 = vmatprep.mubr.f32.mxu0 %v7888_v52  ;;  %v7038_v52 = vpack.c.bf16 %v5186_v4, %v5185_v2  ;;  %v7026_v2 = vpack.c.bf16 %v5164_v41, %v5163_v0  ;;  %v5147_v4 = vld [vmem:[%s9796_s0 + $0x50] sm:$0xff] }
0x1dd0   : > { %7009 = vmatpush3.bf16.msra.mxu1 %v7008_v7  ;;  %v5179_v7 = vld [vmem:[%s9796_s0 + $0x150] sm:$0xff] }
0x1dd1   : > { %7039 = vmatprep.subr.bf16.mxu0 %v7038_v52  ;;  %7011 = vmatprep.subr.bf16.mxu1 %v7010_v13  ;;  %v7028_v52 = vpack.c.bf16 %v5148_v5, %v5147_v4  ;;  %v7060_v9 = vpack.c.bf16 %v5180_v8, %v5179_v7  ;;  %v5198_v13 = vld [vmem:[%s9796_s0 + $0x1e8] sm:$0xff] }
0x1dd2   : > { %4982 = vmatmul.mubr.f32.gmra.mrb[56].mxu1 %v9374_v28  ;;  %5059 = vmatmul.mubr.f32.gmra.mrb[28].mxu0 %v9374_v28  ;;  %v7062_v15 = vpack.c.bf16 %v5198_v13, %v5197_v12 }
0x1dd3   : > { %7041 = vmatpush3.bf16.msra.mxu0 %v7040_v10  ;;  %v5165_v10 = vld [vmem:[%s9796_s0 + $0xe0] sm:$0xff] }
0x1dd4   : > { %7043 = vmatprep.subr.bf16.mxu0 %v7042_v16  ;;  %7013 = vmatpush3.bf16.msra.mxu1 %v7012_v17  ;;  %v7030_v40 = vpack.c.bf16 %v5166_v11, %v5165_v10  ;;  %v7032_v16 = vpack.c.bf16 %v5150_v14, %v5149_v51  ;;  %v5181_v17 = vld [vmem:[%s9796_s0 + $0x160] sm:$0xff] }
0x1dd5   : > { %7015 = vmatprep.subr.bf16.mxu1 %v7014_v55  ;;  %v7064_v19 = vpack.c.bf16 %v5182_v54, %v5181_v17  ;;  %v5200_v55 = vld [vmem:[%s9796_s0 + $0x1f8] sm:$0xff] }
0x1dd6   : > { %v7066_v53 = vpack.c.bf16 %v5200_v55, %v5199_v22 }
0x1dd7   : > { %7045 = vmatpush3.bf16.msra.mxu0 %v7044_v30  ;;  %v5167_v30 = vld [vmem:[%s9796_s0 + $0xf0] sm:$0xff] }
0x1dd8   : > { %7047 = vmatprep.subr.bf16.mxu0 %v7046_v25  ;;  %7017 = vmatpush3.bf16.msra.mxu1 %v7016_v26  ;;  %v7034_v23 = vpack.c.bf16 %v5168_v21, %v5167_v30  ;;  %v7036_v25 = vpack.c.bf16 %v5152_v24, %v5151_v48  ;;  %v5183_v26 = vld [vmem:[%s9796_s0 + $0x170] sm:$0xff] }
0x1dd9   : > { %7019 = vmatprep.subr.bf16.mxu1 %v7018_v56  ;;  %v7068_v29 = vpack.c.bf16 %v5184_v27, %v5183_v26  ;;  %v4905_v56 = vsub.s32 3, %v8835_v18 }
0x1ddb   : > { %7049 = vmatpush3.bf16.msra.mxu0 %v7048_v32  ;;  %v4893_v32 = vsub.s32 0, %v8835_v18 }
0x1ddc   : > { %7051 = vmatprep.subr.bf16.mxu0 %v7050_v31  ;;  %7021 = vmatpush3.bf16.msra.mxu1 %v7020_v39  ;;  %v4906_v31 = vrot.slane %v4889_v34, %v4905_v56 }
0x1ddd   : > { %7023 = vmatprep.subr.bf16.mxu1 %v7022_v49  ;;  %v4894_v36 = vrot.slane %v4889_v34, %v4893_v32 }
0x1ddf   : > { %7053 = vmatpush3.bf16.msra.mxu0 %v7052_v44 }
0x1de0   : > { %7055 = vmatprep.subr.bf16.mxu0 %v7054_v58  ;;  %7025 = vmatpush3.bf16.msra.mxu1 %v7024_v59 }
0x1de1   : > { %7027 = vmatprep.subr.bf16.mxu1 %v7026_v2 }
0x1de3   : > { %7057 = vmatpush3.bf16.msra.mxu0 %v7056_v62 }
0x1de4   : > { %7059 = vmatprep.subr.bf16.mxu0 %v7058_v6  ;;  %7029 = vmatpush3.bf16.msra.mxu1 %v7028_v52 }
0x1de5   : > { %7031 = vmatprep.subr.bf16.mxu1 %v7030_v40 }
0x1de7   : > { %7061 = vmatpush3.bf16.msra.mxu0 %v7060_v9 }
0x1de8   : > { %7063 = vmatprep.subr.bf16.mxu0 %v7062_v15  ;;  %7033 = vmatpush3.bf16.msra.mxu1 %v7032_v16 }
0x1de9   : > { %7035 = vmatprep.subr.bf16.mxu1 %v7034_v23 }
0x1deb   : > { %7065 = vmatpush3.bf16.msra.mxu0 %v7064_v19 }
0x1dec   : > { %7067 = vmatprep.subr.bf16.mxu0 %v7066_v53  ;;  %7037 = vmatpush3.bf16.msra.mxu1 %v7036_v25 }
0x1def   : > { %7069 = vmatpush3.bf16.msra.mxu0 %v7068_v29 }
0x1ea1   : > { %v4977_v39 = vpop.f32.mrb[54].mxu1  ;;  %v5054_v42 = vpop.f32.mrb[26].mxu0 }
0x1ea2   : > { %v9447_v43 = vadd.f32 %v4977_v39, %v4894_v36  ;;  %v9449_v44 = vadd.f32 %v5054_v42, %v4902_v20  ;;  %v4979_v45 = vpop.f32.mrb[55].mxu1  ;;  %v5056_v46 = vpop.f32.mrb[27].mxu0 }
0x1ea3   : > { %v9451_v47 = vadd.f32 %v4979_v45, %v4898_v37  ;;  %v9453_v49 = vadd.f32 %v5056_v46, %v4906_v31 }
0x1ea4   : > { %v5065_v50 = vmul.f32 %v9447_v43, %v9447_v43  ;;  %v5067_v18 = vmul.f32 %v9449_v44, %v9449_v44 }
0x1ea5   : > { %v5066_v57 = vmul.f32 %v9451_v47, %v9451_v47  ;;  %v5068_v38 = vmul.f32 %v9453_v49, %v9453_v49  ;;  %v4983_v58 = vpop.f32.mrb[56].mxu1  ;;  %v5060_v59 = vpop.f32.mrb[28].mxu0 }
0x1ea6   : > { %v5073_v60 = vmul.f32 %v5065_v50, %v9447_v43  ;;  %v5075_v61 = vmul.f32 %v5067_v18, %v9449_v44  ;;  %v9465_v62 = vadd.f32 %v4983_v58, %v4894_v36  ;;  %v9467_v0 = vadd.f32 %v5060_v59, %v4902_v20  ;;  %v4985_v41 = vpop.f32.mrb[57].mxu1  ;;  %v5062_v1 = vpop.f32.mrb[29].mxu0 }
0x1ea7   : > { %v5074_v2 = vmul.f32 %v5066_v57, %v9451_v47  ;;  %v5076_v3 = vmul.f32 %v5068_v38, %v9453_v49  ;;  %v9471_v4 = vadd.f32 %v4985_v41, %v4898_v37  ;;  %v9473_v5 = vadd.f32 %v5062_v1, %v4906_v31 }
0x1ea8   : > { %v5081_v6 = vmul.f32 0.044715, %v5073_v60  ;;  %v5083_v52 = vmul.f32 0.044715, %v5075_v61  ;;  %v5069_v7 = vmul.f32 %v9465_v62, %v9465_v62  ;;  %v5071_v8 = vmul.f32 %v9467_v0, %v9467_v0 }
0x1ea9   : > { %v5082_v9 = vmul.f32 0.044715, %v5074_v2  ;;  %v5084_v10 = vmul.f32 0.044715, %v5076_v3  ;;  %v5070_v11 = vmul.f32 %v9471_v4, %v9471_v4  ;;  %v5072_v12 = vmul.f32 %v9473_v5, %v9473_v5 }
0x1eaa   : > { %v5089_v40 = vadd.f32 %v5081_v6, %v9447_v43  ;;  %v5091_v13 = vadd.f32 %v5083_v52, %v9449_v44  ;;  %v5077_v51 = vmul.f32 %v5069_v7, %v9465_v62  ;;  %v5079_v14 = vmul.f32 %v5071_v8, %v9467_v0 }
0x1eab   : > { %v5090_v15 = vadd.f32 %v5082_v9, %v9451_v47  ;;  %v5092_v16 = vadd.f32 %v5084_v10, %v9453_v49  ;;  %v5078_v17 = vmul.f32 %v5070_v11, %v9471_v4  ;;  %v5080_v54 = vmul.f32 %v5072_v12, %v9473_v5 }
0x1eac   : > { %v5097_v19 = vmul.f32 0.7978846, %v5089_v40  ;;  %v5099_v30 = vmul.f32 0.7978846, %v5091_v13  ;;  %v5085_v21 = vmul.f32 0.044715, %v5077_v51 }
0x1ead   : > { %v5098_v22 = vmul.f32 0.7978846, %v5090_v15  ;;  %v5100_v23 = vmul.f32 0.7978846, %v5092_v16  ;;  %v5087_v55 = vmul.f32 0.044715, %v5079_v14 }
0x1eae   : > { %7340 = vtanh.f32 %v5097_v19  ;;  %v5093_v48 = vadd.f32 %v5085_v21, %v9465_v62  ;;  %v5086_v24 = vmul.f32 0.044715, %v5078_v17  ;;  %v5088_v53 = vmul.f32 0.044715, %v5080_v54  ;;  %v5941_v40 = vld [vmem:[%s9801_s29] ss:$0 sm:$0xff] }
0x1eaf   : > { %7342 = vtanh.f32 %v5099_v30  ;;  %v5095_v25 = vadd.f32 %v5087_v55, %v9467_v0 }
0x1eb0   : > { %v5101_v26 = vmul.f32 0.7978846, %v5093_v48  ;;  %v5094_v27 = vadd.f32 %v5086_v24, %v9471_v4  ;;  %v5096_v29 = vadd.f32 %v5088_v53, %v9473_v5  ;;  %7344 = vtanh.f32 %v5098_v22 }
0x1eb1   : > { %v5103_v32 = vmul.f32 0.7978846, %v5095_v25  ;;  %7346 = vtanh.f32 %v5100_v23 }
0x1eb2   : > { %v5102_v33 = vmul.f32 0.7978846, %v5094_v27  ;;  %v5104_v34 = vmul.f32 0.7978846, %v5096_v29  ;;  %7348 = vtanh.f32 %v5101_v26 }
0x1eb3   : > { %7350 = vtanh.f32 %v5103_v32 }
0x1eb4   : > { %7352 = vtanh.f32 %v5102_v33 }
0x1eb5   : > { %7354 = vtanh.f32 %v5104_v34 }
0x1eb8   : > { %v7341_v35 = vpop.eup %7340 }
0x1eb9   : > { %v7343_v56 = vpop.eup %7342  ;;  %v5113_v36 = vadd.f32 1.0, %v7341_v35 }
0x1eba   : > { %v7345_v20 = vpop.eup %7344  ;;  %v5115_v37 = vadd.f32 1.0, %v7343_v56 }
0x1ebb   : > { %v7347_v31 = vpop.eup %7346  ;;  %v5114_v39 = vadd.f32 1.0, %v7345_v20  ;;  %v5121_v45 = vmul.f32 0.5, %v5113_v36  ;;  %v5942_v36 = vld [vmem:[%s1280_s28] ss:$0 sm:$0xff]  ;;  %s7720_s28 = scalar_lea.vmem %s9528_s4, 256 }
0x1ebc   : > { %v7349_v42 = vpop.eup %7348  ;;  %v5116_v46 = vadd.f32 1.0, %v7347_v31  ;;  %v5123_v18 = vmul.f32 0.5, %v5115_v37  ;;  %v5943_v37 = vld [vmem:[%s1283_s5] ss:$0 sm:$0xff]  ;;  %p7721_p8 = scmp.ne.s32.totalorder %s9528_s4, %s7720_s28  ;;  %s7893_s5 = smov [#allocation22]  }
0x1ebd   : > { %v7351_v50 = vpop.eup %7350  ;;  %v5122_v57 = vmul.f32 0.5, %v5114_v39  ;;  %v5117_v38 = vadd.f32 1.0, %v7349_v42  ;;  %v5129_v2 = vmul.f32 %v5121_v45, %v9447_v43  ;;  %s7724_s0 = sshll.u32 %s7893_s5, 4  ;;  %s7725_s0 = int_to_ptr.vmem [resolvable:$false] %s7724_s0 }
0x1ebe   : > { %v7353_v58 = vpop.eup %7352  ;;  %v5124_v59 = vmul.f32 0.5, %v5116_v46  ;;  %v5119_v60 = vadd.f32 1.0, %v7351_v50  ;;  %v5131_v7 = vmul.f32 %v5123_v18, %v9449_v44  ;;  %p7722_p4 = pnand %p7721_p8, %p9808_p10  ;;  %s7726_s11 = scalar_lea.vmem %s7725_s0, 512 }
0x1ebf   : > { %v7355_v61 = vpop.eup %7354  ;;  %v5130_v41 = vmul.f32 %v5122_v57, %v9451_v47  ;;  %v5118_v1 = vadd.f32 1.0, %v7353_v58  ;;  %v5125_v52 = vmul.f32 0.5, %v5117_v38  ;;  %p7727_p2 = scmp.lt.s32.totalorder %s9528_s4, %s7725_s0  ;;  %p7728_p9 = scmp.lt.s32.totalorder %s7726_s11, %s7720_s28 }
0x1ec0   : > { %v5132_v3 = vmul.f32 %v5124_v59, %v9453_v49  ;;  %v5120_v6 = vadd.f32 1.0, %v7355_v61  ;;  %v5127_v9 = vmul.f32 0.5, %v5119_v60  ;;  %p7723_p3 = pneg %p7722_p4 }
0x1ec1   : > { %5272 = vmatprep.mubr.f32.mxu1 %v5130_v41  ;;  %v5126_v8 = vmul.f32 0.5, %v5118_v1  ;;  %v5133_v43 = vmul.f32 %v5125_v52, %v9465_v62  ;;  %p7729_p12 = por %p7728_p9, %p7727_p2 }
0x1ec2   : > { %5347 = vmatprep.mubr.f32.mxu0 %v5132_v3  ;;  %5273 = vmatmul.mubr.f32.vlgmr.msra.gmra.mrb[58].mxu1 %v5129_v2  ;;  %v5128_v10 = vmul.f32 0.5, %v5120_v6  ;;  %v5135_v49 = vmul.f32 %v5127_v9, %v9467_v0 }
0x1ec3   : > { %5348 = vmatmul.mubr.f32.vlgmr.msra.gmra.mrb[30].mxu0 %v5131_v7  ;;  %v5134_v11 = vmul.f32 %v5126_v8, %v9471_v4  ;;  %p7730_p11 = pnand %p7729_p12, %p7723_p3 }
0x1ec4   : > { %v5136_v47 = vmul.f32 %v5128_v10, %v9473_v5 }
0x1ec5   : > { %5277 = vmatprep.mubr.f32.mxu1 %v5134_v11 }
0x1ec6   : > { %5352 = vmatprep.mubr.f32.mxu0 %v5136_v47  ;;  %5278 = vmatmul.mubr.f32.gmra.mrb[60].mxu1 %v5133_v43 }
0x1ec7   : > { %5353 = vmatmul.mubr.f32.gmra.mrb[32].mxu0 %v5135_v49 }
0x1f95   : > { %v6202_v44 = vpop.f32.mrb[58].mxu1 }
0x1f96   : > { %v6240_v12 = vpop.f32.mrb[30].mxu0  ;;  %v6203_v13 = vpop.f32.mrb[59].mxu1 }
0x1f97   : > { %v6204_v51 = vadd.f32 %v6203_v13, %v6202_v44  ;;  %v6241_v4 = vpop.f32.mrb[31].mxu0 }
0x1f98   : > { %v6242_v14 = vadd.f32 %v6241_v4, %v6240_v12 }
0x1f99   : > { %v5275_v5 = vadd.f32 %v6204_v51, %v5941_v40  ;;  %v6205_v15 = vpop.f32.mrb[60].mxu1 }
0x1f9a   : > { %v6243_v62 = vpop.f32.mrb[32].mxu0  ;;  %v6206_v16 = vpop.f32.mrb[61].mxu1 }
0x1f9b   : > { %v5350_v17 = vadd.f32 %v6242_v14, %v5275_v5  ;;  %v6207_v0 = vadd.f32 %v6206_v16, %v6205_v15  ;;  %v6244_v54 = vpop.f32.mrb[33].mxu0 }
0x1f9c   : > { %v6245_v19 = vadd.f32 %v6244_v54, %v6243_v62 }
0x1f9d   : > { %v5280_v30 = vadd.f32 %v6207_v0, %v5941_v40  ;;  %v5358_v21 = vadd.f32 %v5350_v17, %v9368_v63 }
0x1f9f   : > { %v5355_v22 = vadd.f32 %v6245_v19, %v5280_v30  ;;  %5362 = vadd.xlane.f32.xlu0 %v5358_v21 }
0x1fa1   : > { %v5359_v23 = vadd.f32 %v5355_v22, %v9374_v28 }
0x1fa3   : > { %5364 = vadd.xlane.f32.xlu1 %v5359_v23 }
0x202c   : > { %v5363_v55 = vpop.xlane.xlu0 %5362 }
0x202d   : > { %v5366_v48 = vmul.f32 0.0078125, %v5363_v55 }
0x202f   : > { %v5368_v24 = vsub.f32 %v5358_v21, %v5366_v48 }
0x2030   : > { %v5365_v53 = vpop.xlane.xlu1 %5364 }
0x2031   : > { %v5367_v25 = vmul.f32 0.0078125, %v5365_v53  ;;  %v5370_v26 = vmul.f32 %v5368_v24, %v5368_v24 }
0x2033   : > { %v5369_v27 = vsub.f32 %v5359_v23, %v5367_v25  ;;  %5372 = vadd.xlane.f32.xlu0 %v5370_v26 }
0x2035   : > { %v5371_v29 = vmul.f32 %v5369_v27, %v5369_v27 }
0x2037   : > { %5374 = vadd.xlane.f32.xlu1 %v5371_v29 }
0x20c0   : > { %v5373_v32 = vpop.xlane.xlu0 %5372 }
0x20c1   : > { %v5376_v63 = vmul.f32 0.0078125, %v5373_v32 }
0x20c3   : > { %v5378_v33 = vadd.f32 1e-05, %v5376_v63 }
0x20c4   : > { %v5375_v34 = vpop.xlane.xlu1 %5374 }
0x20c5   : > { %7356 = vrsqrt.f32 %v5378_v33  ;;  %v5377_v28 = vmul.f32 0.0078125, %v5375_v34 }
0x20c7   : > { %v5379_v35 = vadd.f32 1e-05, %v5377_v28 }
0x20c9   : > { %7358 = vrsqrt.f32 %v5379_v35 }
0x20cf   : > { %v7357_v56 = vpop.eup %7356 }
0x20d0   : > { %v5382_v20 = vmul.f32 %v7357_v56, %v5368_v24 }
0x20d2   : > { %v5390_v31 = vmul.f32 %v5942_v36, %v5382_v20 }
0x20d3   : > { %v7359_v39 = vpop.eup %7358 }
0x20d4   : > { %v5383_v42 = vmul.f32 %v7359_v39, %v5369_v27  ;;  %v5398_v45 = vadd.f32 %v5943_v37, %v5390_v31 }
0x20d6   : > { %v5391_v46 = vmul.f32 %v5942_v36, %v5383_v42  ;;  %5400 = vst [vmem:[%s8744_s21] sm:$0xff] %v5398_v45 }
0x20d8   : > { %v5399_v50 = vadd.f32 %v5943_v37, %v5391_v46 }
0x20da   : > { %5401 = vst [vmem:[%s8744_s21 + $0x8] sm:$0xff] %v5399_v50 }
0x20db   : > { %7733 = shalt.err (!%p7730_p11)
}
0x20dc   : > { %s7734_s21 = scalar_lea.hbm %s9526_s10, 256  ;;  %s7738_s15 = scalar_lea.hbm %s9807_s14, 512 }
0x20dd   : > { %p7735_p0 = scmp.ne.s32.totalorder %s9526_s10, %s7734_s21  ;;  %p7739_p7 = scmp.lt.u32.totalorder %s9526_s10, %s9807_s14 }
0x20de   : > { %p7740_p1 = scmp.lt.u32.totalorder %s7738_s15, %s7734_s21  ;;  %p7742_p8 = scmp.lt.u32.totalorder %s7734_s21, %s9526_s10 }
0x20df   : > { %p7736_p5 = pnand %p7735_p0, %p9808_p10 }
0x20e0   : > { %p7741_p6 = por %p7740_p1, %p7739_p7 }
0x20e1   : > { %p7737_p13 = pneg %p7736_p5 }
0x20e2   : > { %p7743_p4 = por %p7742_p8, %p7741_p6 }
0x20e4   : > { %p7744_p3 = pnand %p7743_p4, %p7737_p13 }
0x20e6   : > { %7747 = shalt.err (!%p7744_p3)
}
0x20e7   : > { %s7894_s22 = smov 128   ;;  %s7895_s8 = smov 8  }
0x20e8   : > { %7094 = dma.vmem_to_hbm [thread:$0]  (%p9808_p10), %s9528_s4, 256, %s9526_s10, %s5403_s17, %s7894_s22, %s7894_s22, %s7895_s8  }
0x20e9 PF: > { %s9809_s19 = sld [smem:[#allocation41_spill]]  ;;  %s9810_s26 = sld [smem:[#allocation34_spill]] }
0x20ea   : > { %s9811_s29 = sld [smem:[#allocation50_spill]] }
0x20ef   : > { %p7138_p2 = scmp.ge.s32.totalorder %s9809_s19, 2  ;;  %s5431_s16 = sand.u32 1, %s9810_s26  }
0x20f0   : > { %p9812_p9 = scmp.ne.s32.totalorder %s9811_s29, 0  ;;  %s5432_s18 = scalar_lea.sflag [#allocation4], %s5431_s16 }
0x20f2   : > { %p7134_p12 = pnand %p7138_p2, %p9812_p9 }
0x20f4   : > { %7825 = dma.done.wait (!%p7134_p12), %s5432_s18, 256  }
0x20f5   : > { %7827 = vsyncadd (!%p7134_p12), %s5432_s18, 4294967040  ;;  %s56_s6 = sadd.s32 1, %s9809_s19   ;;  %s9813_s3 = sld [smem:[#allocation32_spill]] }
0x20f6   : > { %p53_p11 = scmp.ge.s32.totalorder %s56_s6, 6   ;;  %s9814_s28 = sld [smem:[#allocation33_spill]] }
0x20f7   : > { %s9815_s29 = sld [smem:[#allocation46_spill]]  ;;  %s9816_s30 = sld [smem:[#allocation35_spill]] }
0x20f8   : > { %s9817_s4 = sld [smem:[#allocation36_spill]]  ;;  %s9818_s0 = sld [smem:[#allocation47_spill]] }
0x20f9   : > { %s9819_s23 = sld [smem:[#allocation39_spill]]  ;;  %s9820_s1 = sld [smem:[#allocation40_spill]] }
0x20fa   : > { %s9821_s5 = sld [smem:[#allocation43_spill]]  ;;  %s9822_s24 = sld [smem:[#allocation44_spill]] }
0x20fb   :  { %55 = sbr.rel (!%p53_p11) target bundleno = 45 (0x2d), region = 320 }
0x2102   :  { %5437 = vsyncpa [#allocation3], 1 }
0x2103   :  { %5439 = vsyncpa [#allocation3 + $0x1], 1 }
0x2104   :  { %5440 = vsyncpa [#allocation6], 1 }
0x2105   :  { %5442 = vsyncpa [#allocation6 + $0x1], 1 }
0x2106   :  { %5443 = vsyncpa [#allocation9], 1 }
0x2107   :  { %5445 = vsyncpa [#allocation9 + $0x1], 1 }
0x2108   :  { %5446 = vsyncpa [#allocation12], 1 }
0x2109   :  { %5448 = vsyncpa [#allocation12 + $0x1], 1 }
0x210a   :  { %5449 = vsyncpa [#allocation15], 1 }
0x210b   :  { %5451 = vsyncpa [#allocation15 + $0x1], 1 }
0x210c   :  { %5452 = vsyncpa [#allocation18], 1 }
0x210d   :  { %5454 = vsyncpa [#allocation18 + $0x1], 1 }
0x210e   :  { %5455 = vsyncpa [#allocation21], 1 }
0x210f   :  { %5457 = vsyncpa [#allocation21 + $0x1], 1 }
0x2110   :  { %5458 = vsyncpa [#allocation4], 1 }
0x2111   :  { %5460 = vsyncpa [#allocation4 + $0x1], 1 }

</bundles_post_ra>
